<compile_context>
chip_gen: v7x
topology: tpu7x:2x2x1
jax: 0.10.0
libtpu: 0.0.40
codegen_flags: <defaults>
</compile_context>

<pallas_src>
import jax
import jax.numpy as jnp
from jax.experimental import pallas as pl
from jax.experimental.pallas import tpu as pltpu

# ---- architecture constants (fixed by Model4) -------------------------------
N_FILTERS = 100                      # conv out-channels per branch
NFP = 128                            # lane-padded filters
KS = (1, 2, 3, 4, 5)                 # conv kernel heights
NGROUPS = sum(KS)                    # 15 (k, j) weight components
FEAT = N_FILTERS * len(KS)           # 500
FEATP = NFP * len(KS)                # 640 (lane-padded feature width)
D1_OUT, D1_OUTP = 1000, 1024
D2_OUT, D2_OUTP = 200, 256
D3_OUT, D3_OUTP = 2, 128

# ---- small synthetic shapes for the (external) BERT output ------------------
B = 2          # batch
S = 8          # sequence length (must be >= 5 for the k=5 conv)
H = 32         # per-layer hidden size (scaled down from 768)
D4 = 4 * H     # concat of last 4 BERT layers -> 128 (lane aligned)
NSEQ = 2 * B   # vec1 and vec2 stacked
MROWS = NSEQ * S

assert S >= max(KS), "every conv branch needs at least one valid position"


def model4_kernel(vecs_ref, convw_ref, bias_ref, d1w_hbm, d2w_hbm, d3w_hbm,
                  out_ref, d1w_vmem, d2w_vmem, d3w_vmem, sem):
    # Kick off all dense-weight DMAs up front (d1w first — it dominates, ~3.9MB
    # bf16); they overlap the CNN-encoder compute below and are waited on just
    # before the matmul that needs them.
    d1w_copy = pltpu.make_async_copy(d1w_hbm, d1w_vmem, sem.at[0])
    d1w_copy.start()
    d2w_copy = pltpu.make_async_copy(d2w_hbm, d2w_vmem, sem.at[1])
    d2w_copy.start()
    d3w_copy = pltpu.make_async_copy(d3w_hbm, d3w_vmem, sem.at[2])
    d3w_copy.start()

    # ---- CNN encoder, both inputs at once -----------------------------------
    # Single lane-aligned MXU call covering all 15 (k, j) conv components.
    x = vecs_ref[...]                                               # (32, 128) bf16
    prod = jnp.dot(x, convw_ref[...],
                   preferred_element_type=jnp.float32)              # (32, 1920)

    # Hoisted position-index broadcast used for masking each branch.
    t_idx = jax.lax.broadcasted_iota(jnp.int32, (NSEQ, S, NFP), 1)

    feats = []
    col = 0
    for k in KS:
        # acc[t] = sum_j prod_j[t + j]; shift via XLU roll on the flat rows.
        acc = prod[:, col * NFP:(col + 1) * NFP]
        col += 1
        for j in range(1, k):
            gj = prod[:, col * NFP:(col + 1) * NFP]
            acc = acc + pltpu.roll(gj, shift=MROWS - j, axis=0)
            col += 1
        acc3 = acc.reshape(NSEQ, S, NFP)
        # Positions t > S-k picked up rows from the next sequence (rolled
        # across the boundary): mask them out before the max-pool.
        acc3 = jnp.where(t_idx <= S - k, acc3, -jnp.inf)
        feats.append(jnp.max(acc3, axis=1))                         # (NSEQ, 128)

    feat = jnp.concatenate(feats, axis=1)                           # (NSEQ, 640)
    # Conv bias is constant over positions -> add once after the max-pool.
    feat = feat + bias_ref[:, :FEATP]

    f1 = feat[:B, :]                                                # (B, 640)
    f2 = feat[B:, :]                                                # (B, 640)

    # ---- dense1: single MXU call on the K-concatenated LHS ------------------
    # (f1-f2) block was folded into the f1/f2 blocks at pack time, so the
    # packed d1w is (3*640, 1024) and lhs is [f1 | f2 | f1*f2].
    lhs = jnp.concatenate([f1, f2, f1 * f2], axis=1).astype(jnp.bfloat16)  # (B,1920)
    d1w_copy.wait()
    h1 = jnp.dot(lhs, d1w_vmem[...], preferred_element_type=jnp.float32)   # (B,1024)
    # dp1 = Dropout(0.1): identity at inference time.
    h1 = jnp.maximum(h1 + bias_ref[:, FEATP:FEATP + D1_OUTP], 0.0)

    d2w_copy.wait()
    h2 = jnp.maximum(
        jnp.dot(h1.astype(jnp.bfloat16), d2w_vmem[...],
                preferred_element_type=jnp.float32)
        + bias_ref[:, FEATP + D1_OUTP:FEATP + D1_OUTP + D2_OUTP],
        0.0)                                                         # (B, 256)

    d3w_copy.wait()
    logits = (jnp.dot(h2.astype(jnp.bfloat16), d3w_vmem[...],
                      preferred_element_type=jnp.float32)
              + bias_ref[:, FEATP + D1_OUTP + D2_OUTP:])             # (B, 128)

    # Softmax over the 2 real classes; padded lanes become exactly 0.
    lane = jax.lax.broadcasted_iota(jnp.int32, logits.shape, 1)
    logits = jnp.where(lane < D3_OUT, logits, -jnp.inf)
    m = jnp.max(logits, axis=1, keepdims=True)
    e = jnp.exp(logits - m)
    out_ref[...] = e / jnp.sum(e, axis=1, keepdims=True)


def pack_params(params):
    """Re-layout the PyTorch-shaped params into lane-aligned bf16/f32 slabs."""
    (w1, w2, w3, w4, w5, b1, b2, b3, b4, b5,
     d1w, d1b, d2w, d2b, d3w, d3b) = params
    conv_ws = (w1, w2, w3, w4, w5)
    conv_bs = (b1, b2, b3, b4, b5)

    # Conv weight slab: all 15 (k, j) components, each lane-padded 100 -> 128.
    cols = []
    for k, w in zip(KS, conv_ws):
        for j in range(k):
            wj = w[j * D4:(j + 1) * D4, :]                          # (D4, 100)
            cols.append(jnp.pad(wj, ((0, 0), (0, NFP - N_FILTERS))))
    conv_slab = jnp.concatenate(cols, axis=1).astype(jnp.bfloat16)   # (D4, 1920)

    # Bias slab: [conv (5*128) | d1b (1024) | d2b (256) | d3b (128)] = (1, 2048)
    conv_bias = jnp.concatenate(
        [jnp.pad(b.reshape(1, N_FILTERS), ((0, 0), (0, NFP - N_FILTERS)))
         for b in conv_bs], axis=1)                                  # (1, 640)
    bias_slab = jnp.concatenate(
        [conv_bias,
         jnp.pad(d1b.reshape(1, D1_OUT), ((0, 0), (0, D1_OUTP - D1_OUT))),
         jnp.pad(d2b.reshape(1, D2_OUT), ((0, 0), (0, D2_OUTP - D2_OUT))),
         jnp.pad(d3b.reshape(1, D3_OUT), ((0, 0), (0, D3_OUTP - D3_OUT)))],
        axis=1).astype(jnp.float32)                                  # (1, 2048)

    # dense1: original layout is 4 input blocks [f1 | f2 | f1-f2 | f1*f2].
    # Fold the (f1-f2) block Wc into the f1/f2 blocks (exact rewrite):
    #   f1@Wa + f2@Wb + (f1-f2)@Wc + (f1*f2)@Wd
    # = f1@(Wa+Wc) + f2@(Wb-Wc)   +  (f1*f2)@Wd
    Wa = d1w[0 * FEAT:1 * FEAT, :]
    Wb = d1w[1 * FEAT:2 * FEAT, :]
    Wc = d1w[2 * FEAT:3 * FEAT, :]
    Wd = d1w[3 * FEAT:4 * FEAT, :]
    folded_blocks = (Wa + Wc, Wb - Wc, Wd)

    # Rows permuted/padded to the padded feature layout (each 100-filter group
    # padded to 128 rows), then concatenated along K for one MXU call.
    def pad_feat_rows(w500):                                         # (500,n)->(640,n)
        chunks = []
        for i in range(len(KS)):
            chunks.append(w500[N_FILTERS * i:N_FILTERS * (i + 1), :])
            chunks.append(jnp.zeros((NFP - N_FILTERS, w500.shape[1]), w500.dtype))
        return jnp.concatenate(chunks, axis=0)

    d1_rows = []
    for blk in folded_blocks:
        blk = pad_feat_rows(blk)                                     # (640, 1000)
        blk = jnp.pad(blk, ((0, 0), (0, D1_OUTP - D1_OUT)))          # (640, 1024)
        d1_rows.append(blk)
    d1w_p = jnp.concatenate(d1_rows, axis=0).astype(jnp.bfloat16)    # (1920, 1024)

    d2w_p = jnp.pad(d2w, ((0, D1_OUTP - D1_OUT),
                          (0, D2_OUTP - D2_OUT))).astype(jnp.bfloat16)  # (1024, 256)
    d3w_p = jnp.pad(d3w, ((0, D2_OUTP - D2_OUT),
                          (0, D3_OUTP - D3_OUT))).astype(jnp.bfloat16)  # (256, 128)
    return conv_slab, bias_slab, d1w_p, d2w_p, d3w_p


def model4_forward(vec1, vec2, packed):
    conv_slab, bias_slab, d1w_p, d2w_p, d3w_p = packed
    # Stack both BERT-encoder outputs into one flat (2*B*S, D4) bf16 LHS.
    vecs = (jnp.concatenate([vec1, vec2], axis=0)
            .reshape(MROWS, D4).astype(jnp.bfloat16))

    vmem = pltpu.MemorySpace.VMEM
    out = pl.pallas_call(
        model4_kernel,
        out_shape=jax.ShapeDtypeStruct((B, D3_OUTP), jnp.float32),
        in_specs=[
            pl.BlockSpec(memory_space=vmem),      # vecs (flat BERT outputs)
            pl.BlockSpec(memory_space=vmem),      # conv weight slab
            pl.BlockSpec(memory_space=vmem),      # bias slab
            pl.BlockSpec(memory_space=pl.ANY),    # d1w slab (manual prefetch)
            pl.BlockSpec(memory_space=pl.ANY),    # d2w (manual prefetch)
            pl.BlockSpec(memory_space=pl.ANY),    # d3w (manual prefetch)
        ],
        out_specs=pl.BlockSpec(memory_space=vmem),
        scratch_shapes=[
            pltpu.VMEM((3 * FEATP, D1_OUTP), jnp.bfloat16),   # d1w landing buffer
            pltpu.VMEM((D1_OUTP, D2_OUTP), jnp.bfloat16),     # d2w landing buffer
            pltpu.VMEM((D2_OUTP, D3_OUTP), jnp.bfloat16),     # d3w landing buffer
            pltpu.SemaphoreType.DMA((3,)),
        ],
        compiler_params=pltpu.CompilerParams(vmem_limit_bytes=12 << 20),
    )(vecs, conv_slab, bias_slab, d1w_p, d2w_p, d3w_p)
    return out[:, :D3_OUT]


def init_params(key):
    """Parameters in the original PyTorch layout (unpadded, f32)."""
    keys = jax.random.split(key, 16)
    conv_ws = [0.02 * jax.random.normal(keys[i], (k * D4, N_FILTERS), jnp.float32)
               for i, k in enumerate(KS)]
    conv_bs = [jnp.full((1, N_FILTERS), 0.01 * (i + 1), jnp.float32)
               for i in range(len(KS))]
    d1w = 0.02 * jax.random.normal(keys[5], (4 * FEAT, D1_OUT), jnp.float32)
    d1b = jnp.full((1, D1_OUT), 0.01, jnp.float32)
    d2w = 0.02 * jax.random.normal(keys[6], (D1_OUT, D2_OUT), jnp.float32)
    d2b = jnp.full((1, D2_OUT), 0.02, jnp.float32)
    d3w = 0.02 * jax.random.normal(keys[7], (D2_OUT, D3_OUT), jnp.float32)
    d3b = jnp.full((1, D3_OUT), 0.03, jnp.float32)
    return tuple(conv_ws) + tuple(conv_bs) + (d1w, d1b, d2w, d2b, d3w, d3b)


if __name__ == "__main__":
    key = jax.random.PRNGKey(0)
    k_v1, k_v2, k_p = jax.random.split(key, 3)
    # Synthetic "bert_encoder" outputs: concat of last-4-layer hidden states.
    vec1 = jax.random.normal(k_v1, (B, S, D4), jnp.float32)
    vec2 = jax.random.normal(k_v2, (B, S, D4), jnp.float32)
    params = init_params(k_p)
    packed = pack_params(params)

    out = model4_forward(vec1, vec2, packed)
    out = jax.block_until_ready(out)

    assert out.shape == (B, D3_OUT)
    assert bool(jnp.all(jnp.isfinite(out)))
    # softmax rows must sum to 1
    assert bool(jnp.allclose(jnp.sum(out, axis=1), 1.0, atol=1e-5))
    print("KERNEL_OK")
</pallas_src>

<mosaic_0001>
module attributes {stable_mosaic.version = 11 : i64} {
  func.func @model4_kernel(%arg0: memref<32x128xbf16, #tpu.memory_space<vmem>>, %arg1: memref<128x1920xbf16, #tpu.memory_space<vmem>>, %arg2: memref<1x2048xf32, #tpu.memory_space<vmem>>, %arg3: memref<1920x1024xbf16, #tpu.memory_space<any>>, %arg4: memref<1024x256xbf16, #tpu.memory_space<any>>, %arg5: memref<256x128xbf16, #tpu.memory_space<any>>, %arg6: memref<2x128xf32, #tpu.memory_space<vmem>>, %arg7: memref<1920x1024xbf16, #tpu.memory_space<vmem>>, %arg8: memref<1024x256xbf16, #tpu.memory_space<vmem>>, %arg9: memref<256x128xbf16, #tpu.memory_space<vmem>>, %arg10: memref<3x!tpu.dma_semaphore, #tpu.memory_space<semaphore_mem>>) attributes {dimension_semantics = [], scalar_prefetch = 0 : i64, scratch_operands = 4 : i64, tpu.core_type = #tpu.core_type<tc>} {
    %c0_i32 = arith.constant 0 : i32
    %0 = tpu.memref_slice %arg10[%c0_i32] : memref<3x!tpu.dma_semaphore, #tpu.memory_space<semaphore_mem>> -> memref<1x!tpu.dma_semaphore, #tpu.memory_space<semaphore_mem>>
    %1 = tpu.memref_squeeze %0 : memref<1x!tpu.dma_semaphore, #tpu.memory_space<semaphore_mem>> -> memref<!tpu.dma_semaphore, #tpu.memory_space<semaphore_mem>>
    tpu.enqueue_dma source(%arg3 : memref<1920x1024xbf16, #tpu.memory_space<any>>) target(%arg7 : memref<1920x1024xbf16, #tpu.memory_space<vmem>>) target_semaphore(%1 : memref<!tpu.dma_semaphore, #tpu.memory_space<semaphore_mem>>)
    %c1_i32 = arith.constant 1 : i32
    %2 = tpu.memref_slice %arg10[%c1_i32] : memref<3x!tpu.dma_semaphore, #tpu.memory_space<semaphore_mem>> -> memref<1x!tpu.dma_semaphore, #tpu.memory_space<semaphore_mem>>
    %3 = tpu.memref_squeeze %2 : memref<1x!tpu.dma_semaphore, #tpu.memory_space<semaphore_mem>> -> memref<!tpu.dma_semaphore, #tpu.memory_space<semaphore_mem>>
    tpu.enqueue_dma source(%arg4 : memref<1024x256xbf16, #tpu.memory_space<any>>) target(%arg8 : memref<1024x256xbf16, #tpu.memory_space<vmem>>) target_semaphore(%3 : memref<!tpu.dma_semaphore, #tpu.memory_space<semaphore_mem>>)
    %c2_i32 = arith.constant 2 : i32
    %4 = tpu.memref_slice %arg10[%c2_i32] : memref<3x!tpu.dma_semaphore, #tpu.memory_space<semaphore_mem>> -> memref<1x!tpu.dma_semaphore, #tpu.memory_space<semaphore_mem>>
    %5 = tpu.memref_squeeze %4 : memref<1x!tpu.dma_semaphore, #tpu.memory_space<semaphore_mem>> -> memref<!tpu.dma_semaphore, #tpu.memory_space<semaphore_mem>>
    tpu.enqueue_dma source(%arg5 : memref<256x128xbf16, #tpu.memory_space<any>>) target(%arg9 : memref<256x128xbf16, #tpu.memory_space<vmem>>) target_semaphore(%5 : memref<!tpu.dma_semaphore, #tpu.memory_space<semaphore_mem>>)
    %c0 = arith.constant 0 : index
    %c0_0 = arith.constant 0 : index
    %6 = vector.load %arg0[%c0, %c0_0] : memref<32x128xbf16, #tpu.memory_space<vmem>>, vector<32x128xbf16>
    %c0_1 = arith.constant 0 : index
    %c0_2 = arith.constant 0 : index
    %7 = vector.load %arg1[%c0_1, %c0_2] : memref<128x1920xbf16, #tpu.memory_space<vmem>>, vector<128x1920xbf16>
    %cst = arith.constant dense<0.000000e+00> : vector<32x1920xf32>
    %8 = tpu.matmul %6, %7, %cst {dimension_numbers = #tpu.dot_dimension_numbers<[1], [0], [0], [1], [0, 0, 1, 1], [], []>} : vector<32x128xbf16>, vector<128x1920xbf16>, vector<32x1920xf32> -> vector<32x1920xf32>
    %9 = tpu.iota {dimensions = array<i32: 1>} : vector<4x8x128xi32>
    %10 = vector.extract_strided_slice %8 {offsets = [0, 0], sizes = [32, 128], strides = [1, 1]} : vector<32x1920xf32> to vector<32x128xf32>
    %11 = vector.shape_cast %10 : vector<32x128xf32> to vector<4x8x128xf32>
    %c7_i32 = arith.constant 7 : i32
    %12 = vector.broadcast %c7_i32 : i32 to vector<4x8x128xi32>
    %13 = arith.cmpi sle, %9, %12 : vector<4x8x128xi32>
    %cst_3 = arith.constant 0xFF800000 : f32
    %14 = vector.broadcast %cst_3 : f32 to vector<4x8x128xf32>
    %15 = arith.select %13, %11, %14 : vector<4x8x128xi1>, vector<4x8x128xf32>
    %cst_4 = arith.constant dense<0xFF800000> : vector<4x128xf32>
    %16 = vector.multi_reduction <maximumf>, %15, %cst_4 [1] : vector<4x8x128xf32> to vector<4x128xf32>
    %17 = vector.extract_strided_slice %8 {offsets = [0, 128], sizes = [32, 128], strides = [1, 1]} : vector<32x1920xf32> to vector<32x128xf32>
    %18 = vector.extract_strided_slice %8 {offsets = [0, 256], sizes = [32, 128], strides = [1, 1]} : vector<32x1920xf32> to vector<32x128xf32>
    %c31_i32 = arith.constant 31 : i32
    %19 = tpu.dynamic_rotate %18 by %c31_i32 dim 0 : vector<32x128xf32>, i32 -> vector<32x128xf32>
    %20 = arith.addf %17, %19 : vector<32x128xf32>
    %21 = vector.shape_cast %20 : vector<32x128xf32> to vector<4x8x128xf32>
    %c6_i32 = arith.constant 6 : i32
    %22 = vector.broadcast %c6_i32 : i32 to vector<4x8x128xi32>
    %23 = arith.cmpi sle, %9, %22 : vector<4x8x128xi32>
    %cst_5 = arith.constant 0xFF800000 : f32
    %24 = vector.broadcast %cst_5 : f32 to vector<4x8x128xf32>
    %25 = arith.select %23, %21, %24 : vector<4x8x128xi1>, vector<4x8x128xf32>
    %cst_6 = arith.constant dense<0xFF800000> : vector<4x128xf32>
    %26 = vector.multi_reduction <maximumf>, %25, %cst_6 [1] : vector<4x8x128xf32> to vector<4x128xf32>
    %27 = vector.extract_strided_slice %8 {offsets = [0, 384], sizes = [32, 128], strides = [1, 1]} : vector<32x1920xf32> to vector<32x128xf32>
    %28 = vector.extract_strided_slice %8 {offsets = [0, 512], sizes = [32, 128], strides = [1, 1]} : vector<32x1920xf32> to vector<32x128xf32>
    %c31_i32_7 = arith.constant 31 : i32
    %29 = tpu.dynamic_rotate %28 by %c31_i32_7 dim 0 : vector<32x128xf32>, i32 -> vector<32x128xf32>
    %30 = arith.addf %27, %29 : vector<32x128xf32>
    %31 = vector.extract_strided_slice %8 {offsets = [0, 640], sizes = [32, 128], strides = [1, 1]} : vector<32x1920xf32> to vector<32x128xf32>
    %c30_i32 = arith.constant 30 : i32
    %32 = tpu.dynamic_rotate %31 by %c30_i32 dim 0 : vector<32x128xf32>, i32 -> vector<32x128xf32>
    %33 = arith.addf %30, %32 : vector<32x128xf32>
    %34 = vector.shape_cast %33 : vector<32x128xf32> to vector<4x8x128xf32>
    %c5_i32 = arith.constant 5 : i32
    %35 = vector.broadcast %c5_i32 : i32 to vector<4x8x128xi32>
    %36 = arith.cmpi sle, %9, %35 : vector<4x8x128xi32>
    %cst_8 = arith.constant 0xFF800000 : f32
    %37 = vector.broadcast %cst_8 : f32 to vector<4x8x128xf32>
    %38 = arith.select %36, %34, %37 : vector<4x8x128xi1>, vector<4x8x128xf32>
    %cst_9 = arith.constant dense<0xFF800000> : vector<4x128xf32>
    %39 = vector.multi_reduction <maximumf>, %38, %cst_9 [1] : vector<4x8x128xf32> to vector<4x128xf32>
    %40 = vector.extract_strided_slice %8 {offsets = [0, 768], sizes = [32, 128], strides = [1, 1]} : vector<32x1920xf32> to vector<32x128xf32>
    %41 = vector.extract_strided_slice %8 {offsets = [0, 896], sizes = [32, 128], strides = [1, 1]} : vector<32x1920xf32> to vector<32x128xf32>
    %c31_i32_10 = arith.constant 31 : i32
    %42 = tpu.dynamic_rotate %41 by %c31_i32_10 dim 0 : vector<32x128xf32>, i32 -> vector<32x128xf32>
    %43 = arith.addf %40, %42 : vector<32x128xf32>
    %44 = vector.extract_strided_slice %8 {offsets = [0, 1024], sizes = [32, 128], strides = [1, 1]} : vector<32x1920xf32> to vector<32x128xf32>
    %c30_i32_11 = arith.constant 30 : i32
    %45 = tpu.dynamic_rotate %44 by %c30_i32_11 dim 0 : vector<32x128xf32>, i32 -> vector<32x128xf32>
    %46 = arith.addf %43, %45 : vector<32x128xf32>
    %47 = vector.extract_strided_slice %8 {offsets = [0, 1152], sizes = [32, 128], strides = [1, 1]} : vector<32x1920xf32> to vector<32x128xf32>
    %c29_i32 = arith.constant 29 : i32
    %48 = tpu.dynamic_rotate %47 by %c29_i32 dim 0 : vector<32x128xf32>, i32 -> vector<32x128xf32>
    %49 = arith.addf %46, %48 : vector<32x128xf32>
    %50 = vector.shape_cast %49 : vector<32x128xf32> to vector<4x8x128xf32>
    %c4_i32 = arith.constant 4 : i32
    %51 = vector.broadcast %c4_i32 : i32 to vector<4x8x128xi32>
    %52 = arith.cmpi sle, %9, %51 : vector<4x8x128xi32>
    %cst_12 = arith.constant 0xFF800000 : f32
    %53 = vector.broadcast %cst_12 : f32 to vector<4x8x128xf32>
    %54 = arith.select %52, %50, %53 : vector<4x8x128xi1>, vector<4x8x128xf32>
    %cst_13 = arith.constant dense<0xFF800000> : vector<4x128xf32>
    %55 = vector.multi_reduction <maximumf>, %54, %cst_13 [1] : vector<4x8x128xf32> to vector<4x128xf32>
    %56 = vector.extract_strided_slice %8 {offsets = [0, 1280], sizes = [32, 128], strides = [1, 1]} : vector<32x1920xf32> to vector<32x128xf32>
    %57 = vector.extract_strided_slice %8 {offsets = [0, 1408], sizes = [32, 128], strides = [1, 1]} : vector<32x1920xf32> to vector<32x128xf32>
    %c31_i32_14 = arith.constant 31 : i32
    %58 = tpu.dynamic_rotate %57 by %c31_i32_14 dim 0 : vector<32x128xf32>, i32 -> vector<32x128xf32>
    %59 = arith.addf %56, %58 : vector<32x128xf32>
    %60 = vector.extract_strided_slice %8 {offsets = [0, 1536], sizes = [32, 128], strides = [1, 1]} : vector<32x1920xf32> to vector<32x128xf32>
    %c30_i32_15 = arith.constant 30 : i32
    %61 = tpu.dynamic_rotate %60 by %c30_i32_15 dim 0 : vector<32x128xf32>, i32 -> vector<32x128xf32>
    %62 = arith.addf %59, %61 : vector<32x128xf32>
    %63 = vector.extract_strided_slice %8 {offsets = [0, 1664], sizes = [32, 128], strides = [1, 1]} : vector<32x1920xf32> to vector<32x128xf32>
    %c29_i32_16 = arith.constant 29 : i32
    %64 = tpu.dynamic_rotate %63 by %c29_i32_16 dim 0 : vector<32x128xf32>, i32 -> vector<32x128xf32>
    %65 = arith.addf %62, %64 : vector<32x128xf32>
    %66 = vector.extract_strided_slice %8 {offsets = [0, 1792], sizes = [32, 128], strides = [1, 1]} : vector<32x1920xf32> to vector<32x128xf32>
    %c28_i32 = arith.constant 28 : i32
    %67 = tpu.dynamic_rotate %66 by %c28_i32 dim 0 : vector<32x128xf32>, i32 -> vector<32x128xf32>
    %68 = arith.addf %65, %67 : vector<32x128xf32>
    %69 = vector.shape_cast %68 : vector<32x128xf32> to vector<4x8x128xf32>
    %c3_i32 = arith.constant 3 : i32
    %70 = vector.broadcast %c3_i32 : i32 to vector<4x8x128xi32>
    %71 = arith.cmpi sle, %9, %70 : vector<4x8x128xi32>
    %cst_17 = arith.constant 0xFF800000 : f32
    %72 = vector.broadcast %cst_17 : f32 to vector<4x8x128xf32>
    %73 = arith.select %71, %69, %72 : vector<4x8x128xi1>, vector<4x8x128xf32>
    %cst_18 = arith.constant dense<0xFF800000> : vector<4x128xf32>
    %74 = vector.multi_reduction <maximumf>, %73, %cst_18 [1] : vector<4x8x128xf32> to vector<4x128xf32>
    %75 = tpu.concatenate %16, %26, %39, %55, %74 in 1 : vector<4x128xf32>, vector<4x128xf32>, vector<4x128xf32>, vector<4x128xf32>, vector<4x128xf32> -> vector<4x640xf32>
    %c0_19 = arith.constant 0 : index
    %c0_20 = arith.constant 0 : index
    %76 = vector.load %arg2[%c0_19, %c0_20] : memref<1x2048xf32, #tpu.memory_space<vmem>>, vector<1x640xf32>
    %77 = vector.broadcast %76 : vector<1x640xf32> to vector<4x640xf32>
    %78 = arith.addf %75, %77 : vector<4x640xf32>
    %79 = vector.extract_strided_slice %78 {offsets = [0, 0], sizes = [2, 640], strides = [1, 1]} : vector<4x640xf32> to vector<2x640xf32>
    %80 = vector.extract_strided_slice %78 {offsets = [2, 0], sizes = [2, 640], strides = [1, 1]} : vector<4x640xf32> to vector<2x640xf32>
    %81 = arith.mulf %79, %80 : vector<2x640xf32>
    %82 = tpu.concatenate %79, %80, %81 in 1 : vector<2x640xf32>, vector<2x640xf32>, vector<2x640xf32> -> vector<2x1920xf32>
    %83 = arith.truncf %82 : vector<2x1920xf32> to vector<2x1920xbf16>
    %c0_i32_21 = arith.constant 0 : i32
    %84 = tpu.memref_slice %arg10[%c0_i32_21] : memref<3x!tpu.dma_semaphore, #tpu.memory_space<semaphore_mem>> -> memref<1x!tpu.dma_semaphore, #tpu.memory_space<semaphore_mem>>
    %85 = tpu.memref_squeeze %84 : memref<1x!tpu.dma_semaphore, #tpu.memory_space<semaphore_mem>> -> memref<!tpu.dma_semaphore, #tpu.memory_space<semaphore_mem>>
    tpu.wait_dma2 semaphore(%85 : memref<!tpu.dma_semaphore, #tpu.memory_space<semaphore_mem>>) src(%arg3 : memref<1920x1024xbf16, #tpu.memory_space<any>>) dst(%arg7 : memref<1920x1024xbf16, #tpu.memory_space<vmem>>)
    %c0_22 = arith.constant 0 : index
    %c0_23 = arith.constant 0 : index
    %86 = vector.load %arg7[%c0_22, %c0_23] : memref<1920x1024xbf16, #tpu.memory_space<vmem>>, vector<1920x1024xbf16>
    %cst_24 = arith.constant dense<0.000000e+00> : vector<2x1024xf32>
    %87 = tpu.matmul %83, %86, %cst_24 {dimension_numbers = #tpu.dot_dimension_numbers<[1], [0], [0], [1], [0, 0, 1, 1], [], []>} : vector<2x1920xbf16>, vector<1920x1024xbf16>, vector<2x1024xf32> -> vector<2x1024xf32>
    %c0_25 = arith.constant 0 : index
    %c640 = arith.constant 640 : index
    %88 = vector.load %arg2[%c0_25, %c640] : memref<1x2048xf32, #tpu.memory_space<vmem>>, vector<1x1024xf32>
    %89 = vector.broadcast %88 : vector<1x1024xf32> to vector<2x1024xf32>
    %90 = arith.addf %87, %89 : vector<2x1024xf32>
    %cst_26 = arith.constant 0.000000e+00 : f32
    %91 = vector.broadcast %cst_26 : f32 to vector<2x1024xf32>
    %92 = arith.maximumf %90, %91 : vector<2x1024xf32>
    %c1_i32_27 = arith.constant 1 : i32
    %93 = tpu.memref_slice %arg10[%c1_i32_27] : memref<3x!tpu.dma_semaphore, #tpu.memory_space<semaphore_mem>> -> memref<1x!tpu.dma_semaphore, #tpu.memory_space<semaphore_mem>>
    %94 = tpu.memref_squeeze %93 : memref<1x!tpu.dma_semaphore, #tpu.memory_space<semaphore_mem>> -> memref<!tpu.dma_semaphore, #tpu.memory_space<semaphore_mem>>
    tpu.wait_dma2 semaphore(%94 : memref<!tpu.dma_semaphore, #tpu.memory_space<semaphore_mem>>) src(%arg4 : memref<1024x256xbf16, #tpu.memory_space<any>>) dst(%arg8 : memref<1024x256xbf16, #tpu.memory_space<vmem>>)
    %95 = arith.truncf %92 : vector<2x1024xf32> to vector<2x1024xbf16>
    %c0_28 = arith.constant 0 : index
    %c0_29 = arith.constant 0 : index
    %96 = vector.load %arg8[%c0_28, %c0_29] : memref<1024x256xbf16, #tpu.memory_space<vmem>>, vector<1024x256xbf16>
    %cst_30 = arith.constant dense<0.000000e+00> : vector<2x256xf32>
    %97 = tpu.matmul %95, %96, %cst_30 {dimension_numbers = #tpu.dot_dimension_numbers<[1], [0], [0], [1], [0, 0, 1, 1], [], []>} : vector<2x1024xbf16>, vector<1024x256xbf16>, vector<2x256xf32> -> vector<2x256xf32>
    %c0_31 = arith.constant 0 : index
    %c1664 = arith.constant 1664 : index
    %98 = vector.load %arg2[%c0_31, %c1664] : memref<1x2048xf32, #tpu.memory_space<vmem>>, vector<1x256xf32>
    %99 = vector.broadcast %98 : vector<1x256xf32> to vector<2x256xf32>
    %100 = arith.addf %97, %99 : vector<2x256xf32>
    %cst_32 = arith.constant 0.000000e+00 : f32
    %101 = vector.broadcast %cst_32 : f32 to vector<2x256xf32>
    %102 = arith.maximumf %100, %101 : vector<2x256xf32>
    %c2_i32_33 = arith.constant 2 : i32
    %103 = tpu.memref_slice %arg10[%c2_i32_33] : memref<3x!tpu.dma_semaphore, #tpu.memory_space<semaphore_mem>> -> memref<1x!tpu.dma_semaphore, #tpu.memory_space<semaphore_mem>>
    %104 = tpu.memref_squeeze %103 : memref<1x!tpu.dma_semaphore, #tpu.memory_space<semaphore_mem>> -> memref<!tpu.dma_semaphore, #tpu.memory_space<semaphore_mem>>
    tpu.wait_dma2 semaphore(%104 : memref<!tpu.dma_semaphore, #tpu.memory_space<semaphore_mem>>) src(%arg5 : memref<256x128xbf16, #tpu.memory_space<any>>) dst(%arg9 : memref<256x128xbf16, #tpu.memory_space<vmem>>)
    %105 = arith.truncf %102 : vector<2x256xf32> to vector<2x256xbf16>
    %c0_34 = arith.constant 0 : index
    %c0_35 = arith.constant 0 : index
    %106 = vector.load %arg9[%c0_34, %c0_35] : memref<256x128xbf16, #tpu.memory_space<vmem>>, vector<256x128xbf16>
    %cst_36 = arith.constant dense<0.000000e+00> : vector<2x128xf32>
    %107 = tpu.matmul %105, %106, %cst_36 {dimension_numbers = #tpu.dot_dimension_numbers<[1], [0], [0], [1], [0, 0, 1, 1], [], []>} : vector<2x256xbf16>, vector<256x128xbf16>, vector<2x128xf32> -> vector<2x128xf32>
    %c0_37 = arith.constant 0 : index
    %c1920 = arith.constant 1920 : index
    %108 = vector.load %arg2[%c0_37, %c1920] : memref<1x2048xf32, #tpu.memory_space<vmem>>, vector<1x128xf32>
    %109 = vector.broadcast %108 : vector<1x128xf32> to vector<2x128xf32>
    %110 = arith.addf %107, %109 : vector<2x128xf32>
    %111 = tpu.iota {dimensions = array<i32: 1>} : vector<2x128xi32>
    %c2_i32_38 = arith.constant 2 : i32
    %112 = vector.broadcast %c2_i32_38 : i32 to vector<2x128xi32>
    %113 = arith.cmpi slt, %111, %112 : vector<2x128xi32>
    %cst_39 = arith.constant 0xFF800000 : f32
    %114 = vector.broadcast %cst_39 : f32 to vector<2x128xf32>
    %115 = arith.select %113, %110, %114 : vector<2x128xi1>, vector<2x128xf32>
    %cst_40 = arith.constant dense<0xFF800000> : vector<2xf32>
    %116 = vector.multi_reduction <maximumf>, %115, %cst_40 [1] : vector<2x128xf32> to vector<2xf32>
    %117 = vector.shape_cast %116 : vector<2xf32> to vector<2x1xf32>
    %118 = vector.broadcast %117 : vector<2x1xf32> to vector<2x128xf32>
    %119 = arith.subf %115, %118 : vector<2x128xf32>
    %120 = math.exp %119 : vector<2x128xf32>
    %cst_41 = arith.constant dense<0.000000e+00> : vector<2xf32>
    %121 = vector.multi_reduction <add>, %120, %cst_41 [1] : vector<2x128xf32> to vector<2xf32>
    %122 = vector.shape_cast %121 : vector<2xf32> to vector<2x1xf32>
    %123 = vector.broadcast %122 : vector<2x1xf32> to vector<2x128xf32>
    %124 = arith.divf %120, %123 : vector<2x128xf32>
    %c0_42 = arith.constant 0 : index
    %c0_43 = arith.constant 0 : index
    %125 = vector.load %arg6[%c0_42, %c0_43] : memref<2x128xf32, #tpu.memory_space<vmem>>, vector<2x128xf32>
    tpu.vector_store %arg6[%c0_42, %c0_43], %124 {strides = array<i32>} : memref<2x128xf32, #tpu.memory_space<vmem>>, vector<2x128xf32>,
    return
  }
}

</mosaic_0001>

<bundles_post_ra>
// kernel: tpu_custom_call.1
= control target key start
LH: loop header
LB: loop body
LE: loop exit
PB: predicated region body
PF: predicated region fallthrough
CT: control target
= control target key end

     0   :  { %11 = vsyncpa [#allocation7], 0  ;;  %s5633_s0 = inlined_call_operand.hbm [shape: bf16[32,128], index: 0, kind: input, shape index: {}]   ;;  %s5634_s1 = inlined_call_operand.hbm [shape: bf16[128,1920], index: 1, kind: input, shape index: {}]   ;;  %s5635_s2 = inlined_call_operand.hbm [shape: f32[1,2048], index: 2, kind: input, shape index: {}]   ;;  %s5636_s3 = inlined_call_operand.hbm [shape: bf16[1920,1024], index: 3, kind: input, shape index: {}]   ;;  %s5637_s4 = inlined_call_operand.hbm [shape: bf16[1024,256], index: 4, kind: input, shape index: {}]   ;;  %s5638_s5 = inlined_call_operand.hbm [shape: bf16[256,128], index: 5, kind: input, shape index: {}]   ;;  %s5639_s6 = inlined_call_operand.hbm [shape: f32[2,128], index: 6, kind: output, shape index: {}]  }
   0x1   :  { %12 = vsyncpa [#allocation10], 0 }
   0x2   :  { %13 = vsyncpa [#allocation8], 0  ;;  %s5100_s21 = smov [#allocation9]   ;;  %s4978_s25 = scalar_lea.hbm %s5634_s1, 15360 }
   0x3   :  { %s31_s22 = sshll.u32 %s5100_s21, 4  ;;  %p4979_p0 = scmp.ne.s32.totalorder %s5634_s1, %s4978_s25  ;;  %s32_s22 = int_to_ptr.vmem [resolvable:$true] %s31_s22 }
   0x4   :  { %p4982_p1 = scmp.lt.u32.totalorder %s4978_s25, %s5634_s1 }
   0x6   :  { %p4984_p2 = pnand %p4982_p1, %p4979_p0 }
   0x8   :  { %4987 = shalt.err (!%p4984_p2)
}
   0x9   :  { %s4988_s30 = scalar_lea.vmem %s32_s22, 15360  ;;  %p4993_p4 = scmp.lt.s32.totalorder %s32_s22, %s32_s22 }
   0xa   :  { %p4989_p3 = scmp.ne.s32.totalorder %s32_s22, %s4988_s30  ;;  %p4994_p5 = scmp.lt.s32.totalorder %s4988_s30, %s4988_s30 }
   0xc   :  { %p4995_p6 = por %p4994_p5, %p4993_p4 }
   0xe   :  { %p4996_p7 = pnand %p4995_p6, %p4989_p3 }
  0x10   :  { %4999 = shalt.err (!%p4996_p7)
}
  0x11   :  { %s5101_s7 = smov 960   ;;  %s5102_s8 = smov 60  }
  0x12   :  { %37 = dma.hbm_to_vmem [thread:$0]  %s5634_s1, 15360, %s32_s22, [#allocation10], %s5101_s7, %s5101_s7, %s5102_s8  }
  0x13   :  { %s5103_s11 = smov [#allocation6]   ;;  %s5000_s15 = scalar_lea.hbm %s5633_s0, 256 }
  0x14   :  { %s19_s12 = sshll.u32 %s5103_s11, 4  ;;  %p5001_p8 = scmp.ne.s32.totalorder %s5633_s0, %s5000_s15  ;;  %s20_s12 = int_to_ptr.vmem [resolvable:$true] %s19_s12 }
  0x15   :  { %p5004_p9 = scmp.lt.u32.totalorder %s5000_s15, %s5633_s0 }
  0x17   :  { %p5006_p10 = pnand %p5004_p9, %p5001_p8 }
  0x19   :  { %5009 = shalt.err (!%p5006_p10)
}
  0x1a   :  { %s5010_s20 = scalar_lea.vmem %s20_s12, 256  ;;  %p5015_p12 = scmp.lt.s32.totalorder %s20_s12, %s20_s12 }
  0x1b   :  { %p5011_p11 = scmp.ne.s32.totalorder %s20_s12, %s5010_s20  ;;  %p5016_p13 = scmp.lt.s32.totalorder %s5010_s20, %s5010_s20 }
  0x1d   :  { %p5017_p0 = por %p5016_p13, %p5015_p12 }
  0x1f   :  { %p5018_p1 = pnand %p5017_p0, %p5011_p11 }
  0x21   :  { %5021 = shalt.err (!%p5018_p1)
}
  0x22   :  { %s5104_s1 = smov 64   ;;  %s5105_s21 = smov 4  }
  0x23   :  { %25 = dma.hbm_to_vmem [thread:$0]  %s5633_s0, 256, %s20_s12, [#allocation7], %s5104_s1, %s5104_s1, %s5105_s21  }
  0x24   :  { %s5106_s24 = smov [#allocation11]   ;;  %s5022_s28 = scalar_lea.hbm %s5635_s2, 256 }
  0x25   :  { %s44_s25 = sshll.u32 %s5106_s24, 4  ;;  %p5023_p2 = scmp.ne.s32.totalorder %s5635_s2, %s5022_s28  ;;  %s45_s25 = int_to_ptr.vmem [resolvable:$true] %s44_s25 }
  0x26   :  { %p5026_p3 = scmp.lt.u32.totalorder %s5022_s28, %s5635_s2 }
  0x28   :  { %p5028_p4 = pnand %p5026_p3, %p5023_p2 }
  0x2a   :  { %5031 = shalt.err (!%p5028_p4)
}
  0x2b   :  { %s5032_s9 = scalar_lea.vmem %s45_s25, 256  ;;  %p5037_p6 = scmp.lt.s32.totalorder %s45_s25, %s45_s25 }
  0x2c   :  { %p5033_p5 = scmp.ne.s32.totalorder %s45_s25, %s5032_s9  ;;  %p5038_p7 = scmp.lt.s32.totalorder %s5032_s9, %s5032_s9 }
  0x2e   :  { %p5039_p8 = por %p5038_p7, %p5037_p6 }
  0x30   :  { %p5040_p9 = pnand %p5039_p8, %p5033_p5 }
  0x32   :  { %5043 = shalt.err (!%p5040_p9)
}
  0x33   :  { %47 = dma.hbm_to_vmem [thread:$0]  %s5635_s2, 256, %s45_s25, [#allocation10]  }
  0x34   :  { %5088 = dma.done.wait [#allocation7], 256  }
  0x35   :  { %5089 = vsyncadd [#allocation7], 4294967040 }
  0x36   :  { %5090 = dma.done.wait [#allocation10], 15616  }
  0x37   :  { %5091 = vsyncadd [#allocation10], 4294951680  ;;  %s62_s11 = sld [smem:[#allocation0]]   ;;  %s5107_s12 = smov 1024   ;;  %v5108_v0 = vmov 0   ;;  %vm1587_vm0 = vcmask 1041409  }
  0x38   :  { %74 = sst [smem:[#allocation14]] %s5107_s12  ;;  %924 = vmatprep.mubr.bf16.mxu1 %v5108_v0  ;;  %1030 = vmatprep.mubr.bf16.mxu0 %v5108_v0  ;;  %s5109_s13 = smov 8   ;;  %vm1589_vm3 = vcmask 1042434   ;;  %vm1591_vm4 = vcmask 1043459  }
  0x39   :  { %76 = sst [smem:[#allocation14 + $0x1]] %s5107_s12  ;;  %s5110_s14 = smov [#allocation2]  }
  0x3a   :  { %78 = sst [smem:[#allocation14 + $0x2]] %s5109_s13  ;;  %s70_s15 = sshll.u32 %s5110_s14, 4  ;;  %s71_s15 = int_to_ptr.vmem [resolvable:$true] %s70_s15 }
  0x3b   :  { %80 = sst [smem:[#allocation14 + $0x3]] %s5104_s1  ;;  %s5111_s2 = smov 512  }
  0x3c   :  { %86 = sst [smem:[#allocation14 + $0x6]] %s5111_s2  ;;  %s5112_s18 = smov 128  }
  0x3d   :  { %88 = sst [smem:[#allocation14 + $0x7]] %s5104_s1  ;;  %s4459_s16 = sshll.u32 %s62_s11, 26 }
  0x3e   :  { %90 = sst [smem:[#allocation14 + $0x8]] %s5105_s21  ;;  %s4460_s17 = sadd.s32 134217728, %s4459_s16 }
  0x3f   :  { %82 = sst [smem:[#allocation14 + $0x4]] %s5112_s18  ;;  %s5113_s19 = smov 2  }
  0x40   :  { %84 = sst [smem:[#allocation14 + $0x5]] %s5113_s19  ;;  %s5114_s20 = smov [#allocation5]  }
  0x41   :  { %s5115_s22 = smov [#allocation13]   ;;  %s5116_s25 = smov 256  }
  0x42   :  { %92 = dma.general %s5636_s3, 122880, %s71_s15, %s5114_s20, %s5115_s22, [#allocation14], %s4460_s17, 0  }
  0x43   :  { %113 = sst [smem:[#allocation16 + $0x2]] %s5113_s19  ;;  %s5117_s26 = smov [#allocation3]  }
  0x44   :  { %109 = sst [smem:[#allocation16]] %s5116_s25  ;;  %s105_s27 = sshll.u32 %s5117_s26, 4  ;;  %s106_s27 = int_to_ptr.vmem [resolvable:$true] %s105_s27 }
  0x45   :  { %111 = sst [smem:[#allocation16 + $0x1]] %s5116_s25  ;;  %s5118_s28 = smov [#allocation5 + $0x1]  }
  0x46   :  { %115 = sst [smem:[#allocation16 + $0x3]] %s5104_s1  ;;  %s5119_s29 = smov [#allocation15]  }
  0x47   :  { %117 = sst [smem:[#allocation16 + $0x4]] %s5112_s18  ;;  %s5044_s8 = scalar_lea.hbm %s5638_s5, 2048 }
  0x48   :  { %119 = sst [smem:[#allocation16 + $0x5]] %s5113_s19  ;;  %p5045_p10 = scmp.ne.s32.totalorder %s5638_s5, %s5044_s8 }
  0x49   :  { %121 = sst [smem:[#allocation16 + $0x6]] %s5112_s18  ;;  %p5048_p11 = scmp.lt.u32.totalorder %s5044_s8, %s5638_s5 }
  0x4a   :  { %123 = sst [smem:[#allocation16 + $0x7]] %s5104_s1 }
  0x4b   :  { %125 = sst [smem:[#allocation16 + $0x8]] %s5105_s21  ;;  %p5050_p12 = pnand %p5048_p11, %p5045_p10 }
  0x4c   :  { %127 = dma.general %s5637_s4, 16384, %s106_s27, %s5118_s28, %s5119_s29, [#allocation16], %s4460_s17, 0  }
  0x4d   :  { %v4795_v1 = vld [vmem:[#allocation9 + $0x4] ss:$60 sps:$4 sm:$0xff]   ;;  %v4798_v3 = vld [vmem:[#allocation9 + $0x7c] ss:$60 sps:$4 sm:$0xff]   ;;  %v4801_v5 = vld [vmem:[#allocation9 + $0xf4] ss:$60 sps:$4 sm:$0xff]  }
  0x4e   :  { %v4797_v2 = vld [vmem:[#allocation9] ss:$60 sps:$4 sm:$0xff]   ;;  %892 = vmatprep.subr.bf16.mxu1 %v4795_v1  ;;  %v4800_v4 = vld [vmem:[#allocation9 + $0x78] ss:$60 sps:$4 sm:$0xff]   ;;  %v4803_v6 = vld [vmem:[#allocation9 + $0xf0] ss:$60 sps:$4 sm:$0xff]  }
  0x4f   :  { %893 = vmatpush1.bf16.msra.mxu1 %v4797_v2  ;;  %v4804_v7 = vld [vmem:[#allocation9 + $0x16c] ss:$60 sps:$4 sm:$0xff]   ;;  %v4815_v8 = vld [vmem:[#allocation9 + $0x14] ss:$60 sps:$4 sm:$0xff]   ;;  %v4807_v11 = vld [vmem:[#allocation9 + $0x1e4] ss:$60 sps:$4 sm:$0xff]  }
  0x50   :  { %894 = vmatprep.subr.bf16.mxu1 %v4798_v3  ;;  %v4818_v9 = vld [vmem:[#allocation9 + $0x10] ss:$60 sps:$4 sm:$0xff]   ;;  %v4806_v10 = vld [vmem:[#allocation9 + $0x168] ss:$60 sps:$4 sm:$0xff]   ;;  %998 = vmatprep.subr.bf16.mxu0 %v4815_v8  ;;  %v4809_v14 = vld [vmem:[#allocation9 + $0x1e0] ss:$60 sps:$4 sm:$0xff]  }
  0x51   :  { %999 = vmatpush1.bf16.msra.mxu0 %v4818_v9  ;;  %v4821_v12 = vld [vmem:[#allocation9 + $0x8c] ss:$60 sps:$4 sm:$0xff]   ;;  %v4810_v15 = vld [vmem:[#allocation9 + $0x25c] ss:$60 sps:$4 sm:$0xff]   ;;  %v4829_v16 = vld [vmem:[#allocation9 + $0x104] ss:$60 sps:$4 sm:$0xff]  }
  0x52   :  { %v4824_v13 = vld [vmem:[#allocation9 + $0x88] ss:$60 sps:$4 sm:$0xff]   ;;  %1000 = vmatprep.subr.bf16.mxu0 %v4821_v12  ;;  %v4831_v17 = vld [vmem:[#allocation9 + $0x100] ss:$60 sps:$4 sm:$0xff]   ;;  %v4812_v18 = vld [vmem:[#allocation9 + $0x258] ss:$60 sps:$4 sm:$0xff]  }
  0x53   :  { %895 = vmatpush1.bf16.msra.mxu1 %v4800_v4  ;;  %v4813_v19 = vld [vmem:[#allocation9 + $0x2d4] ss:$60 sps:$4 sm:$0xff]   ;;  %v4835_v20 = vld [vmem:[#allocation9 + $0x17c] ss:$60 sps:$4 sm:$0xff]   ;;  %v4819_v24 = vld [vmem:[#allocation9 + $0x34c] ss:$60 sps:$4 sm:$0xff]  }
  0x54   :  { %896 = vmatprep.subr.bf16.mxu1 %v4801_v5  ;;  %v4837_v21 = vld [vmem:[#allocation9 + $0x178] ss:$60 sps:$4 sm:$0xff]   ;;  %v4817_v23 = vld [vmem:[#allocation9 + $0x2d0] ss:$60 sps:$4 sm:$0xff]   ;;  %v4823_v27 = vld [vmem:[#allocation9 + $0x348] ss:$60 sps:$4 sm:$0xff]  }
  0x55   :  { %1001 = vmatpush1.bf16.msra.mxu0 %v4824_v13  ;;  %v4842_v22 = vld [vmem:[#allocation9 + $0x1f4] ss:$60 sps:$4 sm:$0xff]   ;;  %v4848_v26 = vld [vmem:[#allocation9 + $0x26c] ss:$60 sps:$4 sm:$0xff]   ;;  %v4854_v30 = vld [vmem:[#allocation9 + $0x2e4] ss:$60 sps:$4 sm:$0xff]  }
  0x56   :  { %1002 = vmatprep.subr.bf16.mxu0 %v4829_v16  ;;  %v4844_v25 = vld [vmem:[#allocation9 + $0x1f0] ss:$60 sps:$4 sm:$0xff]   ;;  %v4850_v29 = vld [vmem:[#allocation9 + $0x268] ss:$60 sps:$4 sm:$0xff]   ;;  %v4856_v34 = vld [vmem:[#allocation9 + $0x2e0] ss:$60 sps:$4 sm:$0xff]  }
  0x57   :  { %897 = vmatpush1.bf16.msra.mxu1 %v4803_v6  ;;  %v4828_v28 = vld [vmem:[#allocation9 + $0xc] ss:$60 sps:$4 sm:$0xff]   ;;  %v5210_v31 = vld [vmem:[#allocation6] sm:$0xff]   ;;  %v4834_v33 = vld [vmem:[#allocation9 + $0x84] ss:$60 sps:$4 sm:$0xff]   ;;  %s5120_s4 = smov [#allocation4]  }
  0x58   :  { %898 = vmatprep.subr.bf16.mxu1 %v4804_v7  ;;  %v4826_v32 = vld [vmem:[#allocation9 + $0x8] ss:$60 sps:$4 sm:$0xff]   ;;  %v4860_v35 = vld [vmem:[#allocation9 + $0x35c] ss:$60 sps:$4 sm:$0xff]   ;;  %v4847_v42 = vld [vmem:[#allocation9 + $0x174] ss:$60 sps:$4 sm:$0xff]  }
  0x59   :  { %1003 = vmatpush1.bf16.msra.mxu0 %v4831_v17  ;;  %v4832_v36 = vld [vmem:[#allocation9 + $0x80] ss:$60 sps:$4 sm:$0xff]   ;;  %v4862_v38 = vld [vmem:[#allocation9 + $0x358] ss:$60 sps:$4 sm:$0xff]   ;;  %v4845_v45 = vld [vmem:[#allocation9 + $0x170] ss:$60 sps:$4 sm:$0xff]  }
  0x5a   :  { %1004 = vmatprep.subr.bf16.mxu0 %v4835_v20  ;;  %v4841_v37 = vld [vmem:[#allocation9 + $0xfc] ss:$60 sps:$4 sm:$0xff]   ;;  %v4874_v39 = vld [vmem:[#allocation9 + $0x24] ss:$60 sps:$4 sm:$0xff]   ;;  %v4853_v46 = vld [vmem:[#allocation9 + $0x1ec] ss:$60 sps:$4 sm:$0xff]  }
  0x5b   :  { %899 = vmatpush1.bf16.msra.mxu1 %v4806_v10  ;;  %v5214_v40 = vld [vmem:[#allocation6 + $0x8] sm:$0xff]   ;;  %v4886_v48 = vld [vmem:[#allocation9 + $0x114] ss:$60 sps:$4 sm:$0xff]   ;;  %v4851_v49 = vld [vmem:[#allocation9 + $0x1e8] ss:$60 sps:$4 sm:$0xff]   ;;  %s136_s1 = sshll.u32 %s5120_s4, 4  ;;  %s137_s1 = int_to_ptr.vmem [resolvable:$true] %s136_s1 }
  0x5c   :  { %900 = vmatprep.subr.bf16.mxu1 %v4807_v11  ;;  %v4839_v41 = vld [vmem:[#allocation9 + $0xf8] ss:$60 sps:$4 sm:$0xff]   ;;  %v4872_v43 = vld [vmem:[#allocation9 + $0x20] ss:$60 sps:$4 sm:$0xff]   ;;  %v4884_v51 = vld [vmem:[#allocation9 + $0x110] ss:$60 sps:$4 sm:$0xff]  }
  0x5d   :  { %1005 = vmatpush1.bf16.msra.mxu0 %v4837_v21  ;;  %v4880_v44 = vld [vmem:[#allocation9 + $0x9c] ss:$60 sps:$4 sm:$0xff]   ;;  %v4859_v50 = vld [vmem:[#allocation9 + $0x264] ss:$60 sps:$4 sm:$0xff]   ;;  %v4892_v52 = vld [vmem:[#allocation9 + $0x18c] ss:$60 sps:$4 sm:$0xff]  }
  0x5e   :  { %1006 = vmatprep.subr.bf16.mxu0 %v4842_v22  ;;  %v4878_v47 = vld [vmem:[#allocation9 + $0x98] ss:$60 sps:$4 sm:$0xff]   ;;  %v4857_v53 = vld [vmem:[#allocation9 + $0x260] ss:$60 sps:$4 sm:$0xff]   ;;  %v4890_v55 = vld [vmem:[#allocation9 + $0x188] ss:$60 sps:$4 sm:$0xff]  }
  0x5f   :  { %901 = vmatpush1.bf16.msra.mxu1 %v4809_v14  ;;  %v4865_v54 = vld [vmem:[#allocation9 + $0x2dc] ss:$60 sps:$4 sm:$0xff]   ;;  %v4898_v56 = vld [vmem:[#allocation9 + $0x204] ss:$60 sps:$4 sm:$0xff]   ;;  %v4868_v58 = vld [vmem:[#allocation9 + $0x354] ss:$60 sps:$4 sm:$0xff]  }
  0x60   :  { %902 = vmatprep.subr.bf16.mxu1 %v4810_v15  ;;  %v4863_v57 = vld [vmem:[#allocation9 + $0x2d8] ss:$60 sps:$4 sm:$0xff]   ;;  %v4896_v59 = vld [vmem:[#allocation9 + $0x200] ss:$60 sps:$4 sm:$0xff]   ;;  %v4866_v61 = vld [vmem:[#allocation9 + $0x350] ss:$60 sps:$4 sm:$0xff]  }
  0x61   :  { %1007 = vmatpush1.bf16.msra.mxu0 %v4844_v25  ;;  %v4904_v60 = vld [vmem:[#allocation9 + $0x27c] ss:$60 sps:$4 sm:$0xff]   ;;  %v4910_v1 = vld [vmem:[#allocation9 + $0x2f4] ss:$60 sps:$4 sm:$0xff]   ;;  %v4916_v5 = vld [vmem:[#allocation9 + $0x36c] ss:$60 sps:$4 sm:$0xff]  }
  0x62   :  { %1008 = vmatprep.subr.bf16.mxu0 %v4848_v26  ;;  %v4871_v62 = vld [vmem:[#allocation9 + $0x1c] ss:$60 sps:$4 sm:$0xff]   ;;  %v4877_v3 = vld [vmem:[#allocation9 + $0x94] ss:$60 sps:$4 sm:$0xff]   ;;  %v4883_v7 = vld [vmem:[#allocation9 + $0x10c] ss:$60 sps:$4 sm:$0xff]  }
  0x63   :  { %903 = vmatpush1.bf16.msra.mxu1 %v4812_v18  ;;  %v4902_v63 = vld [vmem:[#allocation9 + $0x278] ss:$60 sps:$4 sm:$0xff]   ;;  %v4908_v4 = vld [vmem:[#allocation9 + $0x2f0] ss:$60 sps:$4 sm:$0xff]   ;;  %v4914_v8 = vld [vmem:[#allocation9 + $0x368] ss:$60 sps:$4 sm:$0xff]  }
  0x64   :  { %904 = vmatprep.subr.bf16.mxu1 %v4813_v19  ;;  %v4869_v2 = vld [vmem:[#allocation9 + $0x18] ss:$60 sps:$4 sm:$0xff]   ;;  %v4875_v6 = vld [vmem:[#allocation9 + $0x90] ss:$60 sps:$4 sm:$0xff]   ;;  %v4881_v10 = vld [vmem:[#allocation9 + $0x108] ss:$60 sps:$4 sm:$0xff]  }
  0x65   :  { %1009 = vmatpush1.bf16.msra.mxu0 %v4850_v29  ;;  %v4922_v9 = vld [vmem:[#allocation9 + $0x34] ss:$60 sps:$4 sm:$0xff]   ;;  %v4889_v11 = vld [vmem:[#allocation9 + $0x184] ss:$60 sps:$4 sm:$0xff]   ;;  %v4928_v13 = vld [vmem:[#allocation9 + $0xac] ss:$60 sps:$4 sm:$0xff]  }
  0x66   :  { %1010 = vmatprep.subr.bf16.mxu0 %v4854_v30  ;;  %v4920_v12 = vld [vmem:[#allocation9 + $0x30] ss:$60 sps:$4 sm:$0xff]   ;;  %v4887_v14 = vld [vmem:[#allocation9 + $0x180] ss:$60 sps:$4 sm:$0xff]   ;;  %v4926_v16 = vld [vmem:[#allocation9 + $0xa8] ss:$60 sps:$4 sm:$0xff]  }
  0x67   :  { %905 = vmatpush1.bf16.msra.mxu1 %v4817_v23  ;;  %v4895_v15 = vld [vmem:[#allocation9 + $0x1fc] ss:$60 sps:$4 sm:$0xff]   ;;  %v4934_v17 = vld [vmem:[#allocation9 + $0x124] ss:$60 sps:$4 sm:$0xff]   ;;  %v4901_v19 = vld [vmem:[#allocation9 + $0x274] ss:$60 sps:$4 sm:$0xff]  }
  0x68   :  { %906 = vmatprep.subr.bf16.mxu1 %v4819_v24  ;;  %v4893_v18 = vld [vmem:[#allocation9 + $0x1f8] ss:$60 sps:$4 sm:$0xff]   ;;  %v4932_v20 = vld [vmem:[#allocation9 + $0x120] ss:$60 sps:$4 sm:$0xff]   ;;  %v4899_v22 = vld [vmem:[#allocation9 + $0x270] ss:$60 sps:$4 sm:$0xff]  }
  0x69   :  { %1011 = vmatpush1.bf16.msra.mxu0 %v4856_v34  ;;  %v4940_v21 = vld [vmem:[#allocation9 + $0x19c] ss:$60 sps:$4 sm:$0xff]   ;;  %v4907_v23 = vld [vmem:[#allocation9 + $0x2ec] ss:$60 sps:$4 sm:$0xff]   ;;  %v4946_v25 = vld [vmem:[#allocation9 + $0x214] ss:$60 sps:$4 sm:$0xff]  }
  0x6a   :  { %1012 = vmatprep.subr.bf16.mxu0 %v4860_v35  ;;  %v4938_v24 = vld [vmem:[#allocation9 + $0x198] ss:$60 sps:$4 sm:$0xff]   ;;  %v4905_v26 = vld [vmem:[#allocation9 + $0x2e8] ss:$60 sps:$4 sm:$0xff]   ;;  %v4911_v30 = vld [vmem:[#allocation9 + $0x360] ss:$60 sps:$4 sm:$0xff]  }
  0x6b   :  { %907 = vmatpush1.bf16.msra.mxu1 %v4823_v27  ;;  %v4913_v27 = vld [vmem:[#allocation9 + $0x364] ss:$60 sps:$4 sm:$0xff]   ;;  %v4952_v29 = vld [vmem:[#allocation9 + $0x28c] ss:$60 sps:$4 sm:$0xff]  }
  0x6c   :  { %945 = vmatprep.subr.bf16.mxu1 %v4828_v28  ;;  %v4944_v28 = vld [vmem:[#allocation9 + $0x210] ss:$60 sps:$4 sm:$0xff]   ;;  %v4958_v34 = vld [vmem:[#allocation9 + $0x304] ss:$60 sps:$4 sm:$0xff]  }
  0x6d   :  { %1013 = vmatpush1.bf16.msra.mxu0 %v4862_v38  ;;  %v4917_v35 = vld [vmem:[#allocation9 + $0x28] ss:$60 sps:$4 sm:$0xff]   ;;  %v4964_v38 = vld [vmem:[#allocation9 + $0x37c] ss:$60 sps:$4 sm:$0xff]  }
  0x6e   :  { %925 = vmatmul.mubr.bf16.vlgmr.msra.gmra.mrb[0].mxu1 %v5210_v31  ;;  %1104 = vmatprep.subr.bf16.mxu0 %v4874_v39  ;;  %v4923_v39 = vld [vmem:[#allocation9 + $0xa0] ss:$60 sps:$4 sm:$0xff]  }
  0x6f   :  { %946 = vmatpush1.bf16.msra.mxu1 %v4826_v32  ;;  %934 = vmatprep.mubr.bf16.mxu1 %v5108_v0  ;;  %v4919_v32 = vld [vmem:[#allocation9 + $0x2c] ss:$60 sps:$4 sm:$0xff]  }
  0x70   :  { %947 = vmatprep.subr.bf16.mxu1 %v4834_v33  ;;  %1031 = vmatmul.mubr.bf16.vlgmr.msra.gmra.mrb[0].mxu0 %v5210_v31  ;;  %v4950_v33 = vld [vmem:[#allocation9 + $0x288] ss:$60 sps:$4 sm:$0xff]  }
  0x71   :  { %1040 = vmatprep.mubr.bf16.mxu0 %v5108_v0  ;;  %1105 = vmatpush1.bf16.msra.mxu0 %v4872_v43  ;;  %v4929_v43 = vld [vmem:[#allocation9 + $0x118] ss:$60 sps:$4 sm:$0xff]  }
  0x72   :  { %1106 = vmatprep.subr.bf16.mxu0 %v4880_v44  ;;  %v4937_v44 = vld [vmem:[#allocation9 + $0x194] ss:$60 sps:$4 sm:$0xff]  }
  0x73   :  { %948 = vmatpush1.bf16.msra.mxu1 %v4832_v36  ;;  %v4925_v36 = vld [vmem:[#allocation9 + $0xa4] ss:$60 sps:$4 sm:$0xff]  }
  0x74   :  { %949 = vmatprep.subr.bf16.mxu1 %v4841_v37  ;;  %v4956_v37 = vld [vmem:[#allocation9 + $0x300] ss:$60 sps:$4 sm:$0xff]  }
  0x75   :  { %1107 = vmatpush1.bf16.msra.mxu0 %v4878_v47  ;;  %v4941_v47 = vld [vmem:[#allocation9 + $0x208] ss:$60 sps:$4 sm:$0xff]  }
  0x76   :  { %935 = vmatmul.mubr.bf16.gmra.mrb[4].mxu1 %v5214_v40  ;;  %1108 = vmatprep.subr.bf16.mxu0 %v4886_v48  ;;  %v4949_v48 = vld [vmem:[#allocation9 + $0x284] ss:$60 sps:$4 sm:$0xff]  }
  0x77   :  { %950 = vmatpush1.bf16.msra.mxu1 %v4839_v41  ;;  %977 = vmatprep.mubr.bf16.mxu1 %v5108_v0  ;;  %v4931_v41 = vld [vmem:[#allocation9 + $0x11c] ss:$60 sps:$4 sm:$0xff]  }
  0x78   :  { %951 = vmatprep.subr.bf16.mxu1 %v4847_v42  ;;  %1041 = vmatmul.mubr.bf16.gmra.mrb[4].mxu0 %v5214_v40  ;;  %v4962_v42 = vld [vmem:[#allocation9 + $0x378] ss:$60 sps:$4 sm:$0xff]  }
  0x79   :  { %1136 = vmatprep.mubr.bf16.mxu0 %v5108_v0  ;;  %1109 = vmatpush1.bf16.msra.mxu0 %v4884_v51  ;;  %v4953_v51 = vld [vmem:[#allocation9 + $0x2f8] ss:$60 sps:$4 sm:$0xff]  }
  0x7a   :  { %1110 = vmatprep.subr.bf16.mxu0 %v4892_v52  ;;  %v4961_v52 = vld [vmem:[#allocation9 + $0x374] ss:$60 sps:$4 sm:$0xff]  }
  0x7b   :  { %952 = vmatpush1.bf16.msra.mxu1 %v4845_v45  ;;  %v4935_v45 = vld [vmem:[#allocation9 + $0x190] ss:$60 sps:$4 sm:$0xff]  }
  0x7c   :  { %953 = vmatprep.subr.bf16.mxu1 %v4853_v46  ;;  %v4943_v46 = vld [vmem:[#allocation9 + $0x20c] ss:$60 sps:$4 sm:$0xff]  }
  0x7d   :  { %1111 = vmatpush1.bf16.msra.mxu0 %v4890_v55  ;;  %v4966_v55 = vld [vmem:[#allocation9 + $0xb0] ss:$60 sps:$4 sm:$0xff]  }
  0x7e   :  { %1112 = vmatprep.subr.bf16.mxu0 %v4898_v56  ;;  %v4967_v56 = vld [vmem:[#allocation9 + $0x128] ss:$60 sps:$4 sm:$0xff]  }
  0x7f   :  { %954 = vmatpush1.bf16.msra.mxu1 %v4851_v49  ;;  %v4947_v49 = vld [vmem:[#allocation9 + $0x280] ss:$60 sps:$4 sm:$0xff]  }
  0x80   :  { %955 = vmatprep.subr.bf16.mxu1 %v4859_v50  ;;  %v4955_v50 = vld [vmem:[#allocation9 + $0x2fc] ss:$60 sps:$4 sm:$0xff]  }
  0x81   :  { %1113 = vmatpush1.bf16.msra.mxu0 %v4896_v59  ;;  %v4970_v59 = vld [vmem:[#allocation9 + $0x290] ss:$60 sps:$4 sm:$0xff]  }
  0x82   :  { %1114 = vmatprep.subr.bf16.mxu0 %v4904_v60  ;;  %v4971_v60 = vld [vmem:[#allocation9 + $0x308] ss:$60 sps:$4 sm:$0xff]  }
  0x83   :  { %956 = vmatpush1.bf16.msra.mxu1 %v4857_v53  ;;  %v4959_v53 = vld [vmem:[#allocation9 + $0x370] ss:$60 sps:$4 sm:$0xff]  }
  0x84   :  { %957 = vmatprep.subr.bf16.mxu1 %v4865_v54  ;;  %v4965_v54 = vld [vmem:[#allocation9 + $0x38] ss:$60 sps:$4 sm:$0xff]  }
  0x85   :  { %1115 = vmatpush1.bf16.msra.mxu0 %v4902_v63 }
  0x86   :  { %1116 = vmatprep.subr.bf16.mxu0 %v4910_v1 }
  0x87   :  { %958 = vmatpush1.bf16.msra.mxu1 %v4863_v57  ;;  %v4968_v57 = vld [vmem:[#allocation9 + $0x1a0] ss:$60 sps:$4 sm:$0xff]  }
  0x88   :  { %959 = vmatprep.subr.bf16.mxu1 %v4868_v58  ;;  %v4969_v58 = vld [vmem:[#allocation9 + $0x218] ss:$60 sps:$4 sm:$0xff]  }
  0x89   :  { %1117 = vmatpush1.bf16.msra.mxu0 %v4908_v4 }
  0x8a   :  { %1118 = vmatprep.subr.bf16.mxu0 %v4916_v5 }
  0x8b   :  { %960 = vmatpush1.bf16.msra.mxu1 %v4866_v61  ;;  %v4972_v61 = vld [vmem:[#allocation9 + $0x380] ss:$60 sps:$4 sm:$0xff]  }
  0x8c   :  { %1051 = vmatprep.subr.bf16.mxu1 %v4871_v62 }
  0x8d   :  { %1119 = vmatpush1.bf16.msra.mxu0 %v4914_v8 }
  0x8e   :  { %978 = vmatmul.mubr.bf16.vlgmr.msra.gmra.mrb[8].mxu1 %v5210_v31  ;;  %1210 = vmatprep.subr.bf16.mxu0 %v4922_v9 }
  0x8f   :  { %1052 = vmatpush1.bf16.msra.mxu1 %v4869_v2  ;;  %987 = vmatprep.mubr.bf16.mxu1 %v5108_v0 }
  0x90   :  { %1053 = vmatprep.subr.bf16.mxu1 %v4877_v3  ;;  %1137 = vmatmul.mubr.bf16.vlgmr.msra.gmra.mrb[8].mxu0 %v5210_v31 }
  0x91   :  { %1211 = vmatpush1.bf16.msra.mxu0 %v4920_v12  ;;  %1146 = vmatprep.mubr.bf16.mxu0 %v5108_v0 }
  0x92   :  { %1212 = vmatprep.subr.bf16.mxu0 %v4928_v13 }
  0x93   :  { %1054 = vmatpush1.bf16.msra.mxu1 %v4875_v6 }
  0x94   :  { %1055 = vmatprep.subr.bf16.mxu1 %v4883_v7  ;;  %v1312_v7 = vlaneseq }
  0x95   :  { %1213 = vmatpush1.bf16.msra.mxu0 %v4926_v16 }
  0x96   :  { %988 = vmatmul.mubr.bf16.gmra.mrb[12].mxu1 %v5214_v40  ;;  %1214 = vmatprep.subr.bf16.mxu0 %v4934_v17 }
  0x97   :  { %1056 = vmatpush1.bf16.msra.mxu1 %v4881_v10  ;;  %1083 = vmatprep.mubr.bf16.mxu1 %v5108_v0 }
  0x98   :  { %1057 = vmatprep.subr.bf16.mxu1 %v4889_v11  ;;  %1147 = vmatmul.mubr.bf16.gmra.mrb[12].mxu0 %v5214_v40 }
  0x99   :  { %1215 = vmatpush1.bf16.msra.mxu0 %v4932_v20  ;;  %1242 = vmatprep.mubr.bf16.mxu0 %v5108_v0 }
  0x9a   :  { %1216 = vmatprep.subr.bf16.mxu0 %v4940_v21 }
  0x9b   :  { %1058 = vmatpush1.bf16.msra.mxu1 %v4887_v14 }
  0x9c   :  { %1059 = vmatprep.subr.bf16.mxu1 %v4895_v15 }
  0x9d   :  { %1217 = vmatpush1.bf16.msra.mxu0 %v4938_v24 }
  0x9e   :  { %1218 = vmatprep.subr.bf16.mxu0 %v4946_v25 }
  0x9f   :  { %1060 = vmatpush1.bf16.msra.mxu1 %v4893_v18 }
  0xa0   :  { %1061 = vmatprep.subr.bf16.mxu1 %v4901_v19 }
  0xa1   :  { %1219 = vmatpush1.bf16.msra.mxu0 %v4944_v28 }
  0xa2   :  { %1220 = vmatprep.subr.bf16.mxu0 %v4952_v29 }
  0xa3   :  { %1062 = vmatpush1.bf16.msra.mxu1 %v4899_v22 }
  0xa4   :  { %1063 = vmatprep.subr.bf16.mxu1 %v4907_v23 }
  0xa5   :  { %1221 = vmatpush1.bf16.msra.mxu0 %v4950_v33 }
  0xa6   :  { %1222 = vmatprep.subr.bf16.mxu0 %v4958_v34 }
  0xa7   :  { %1064 = vmatpush1.bf16.msra.mxu1 %v4905_v26 }
  0xa8   :  { %1065 = vmatprep.subr.bf16.mxu1 %v4913_v27 }
  0xa9   :  { %1223 = vmatpush1.bf16.msra.mxu0 %v4956_v37 }
  0xaa   :  { %1224 = vmatprep.subr.bf16.mxu0 %v4964_v38 }
  0xab   :  { %1066 = vmatpush1.bf16.msra.mxu1 %v4911_v30 }
  0xac   :  { %1157 = vmatprep.subr.bf16.mxu1 %v4919_v32 }
  0xad   :  { %1225 = vmatpush1.bf16.msra.mxu0 %v4962_v42  ;;  %v5263_v42 = vld [vmem:[#allocation11] sm:$0x1f] }
  0xae   :  { %1084 = vmatmul.mubr.bf16.vlgmr.msra.gmra.mrb[16].mxu1 %v5210_v31 }
  0xaf   :  { %1158 = vmatpush1.bf16.msra.mxu1 %v4917_v35  ;;  %1093 = vmatprep.mubr.bf16.mxu1 %v5108_v0 }
  0xb0   :  { %1159 = vmatprep.subr.bf16.mxu1 %v4925_v36  ;;  %1243 = vmatmul.mubr.bf16.vlgmr.msra.gmra.mrb[16].mxu0 %v5210_v31 }
  0xb1   :  { %1252 = vmatprep.mubr.bf16.mxu0 %v5108_v0 }
  0xb3   :  { %1160 = vmatpush1.bf16.msra.mxu1 %v4923_v39 }
  0xb4   :  { %1161 = vmatprep.subr.bf16.mxu1 %v4931_v41 }
  0xb6   :  { %1094 = vmatmul.mubr.bf16.gmra.mrb[20].mxu1 %v5214_v40 }
  0xb7   :  { %1162 = vmatpush1.bf16.msra.mxu1 %v4929_v43  ;;  %1189 = vmatprep.mubr.bf16.mxu1 %v5108_v0 }
  0xb8   :  { %1163 = vmatprep.subr.bf16.mxu1 %v4937_v44  ;;  %1253 = vmatmul.mubr.bf16.gmra.mrb[20].mxu0 %v5214_v40 }
  0xbb   :  { %1164 = vmatpush1.bf16.msra.mxu1 %v4935_v45 }
  0xbc   :  { %1165 = vmatprep.subr.bf16.mxu1 %v4943_v46 }
  0xbf   :  { %1166 = vmatpush1.bf16.msra.mxu1 %v4941_v47 }
  0xc0   :  { %1167 = vmatprep.subr.bf16.mxu1 %v4949_v48 }
  0xc3   :  { %1168 = vmatpush1.bf16.msra.mxu1 %v4947_v49 }
  0xc4   :  { %1169 = vmatprep.subr.bf16.mxu1 %v4955_v50 }
  0xc7   :  { %1170 = vmatpush1.bf16.msra.mxu1 %v4953_v51 }
  0xc8   :  { %1171 = vmatprep.subr.bf16.mxu1 %v4961_v52 }
  0xcb   :  { %1172 = vmatpush1.bf16.msra.mxu1 %v4959_v53 }
  0xcc   :  { %4621 = vmatprep.subr.bf16.mxu1 %v4965_v54 }
  0xce   :  { %1190 = vmatmul.mubr.bf16.vlgmr.msra.gmra.mrb[24].mxu1 %v5210_v31 }
  0xcf   :  { %4622 = vmatpush3.bf16.msra.mxu1 %v4965_v54  ;;  %1199 = vmatprep.mubr.bf16.mxu1 %v5108_v0 }
  0xd0   :  { %4623 = vmatprep.subr.bf16.mxu1 %v4966_v55 }
  0xd3   :  { %4624 = vmatpush3.bf16.msra.mxu1 %v4966_v55 }
  0xd4   :  { %4625 = vmatprep.subr.bf16.mxu1 %v4967_v56 }
  0xd6   :  { %1200 = vmatmul.mubr.bf16.gmra.mrb[28].mxu1 %v5214_v40 }
  0xd7   :  { %4626 = vmatpush3.bf16.msra.mxu1 %v4967_v56  ;;  %4637 = vmatprep.mubr.bf16.mxu1 %v5210_v31 }
  0xd8   :  { %4627 = vmatprep.subr.bf16.mxu1 %v4968_v57 }
  0xdb   :  { %4628 = vmatpush3.bf16.msra.mxu1 %v4968_v57 }
  0xdc   :  { %4629 = vmatprep.subr.bf16.mxu1 %v4969_v58 }
  0xdf   :  { %4630 = vmatpush3.bf16.msra.mxu1 %v4969_v58 }
  0xe0   :  { %4631 = vmatprep.subr.bf16.mxu1 %v4970_v59 }
  0xe3   :  { %4632 = vmatpush3.bf16.msra.mxu1 %v4970_v59 }
  0xe4   :  { %4633 = vmatprep.subr.bf16.mxu1 %v4971_v60 }
  0xe7   :  { %4634 = vmatpush3.bf16.msra.mxu1 %v4971_v60 }
  0xe8   :  { %4635 = vmatprep.subr.bf16.mxu1 %v4972_v61 }
  0xeb   :  { %4636 = vmatpush3.bf16.msra.mxu1 %v4972_v61 }
  0xee   :  { %4638 = vmatmul.mubr.bf16.vlgmr.msra.gmra.mrb[32].mxu1 %v5214_v40  ;;  %v5249_v40 = vshrl.u32 %v1312_v7, 7 }
  0xf0   :  { %vm1347_vm1 = vcmp.lt.s32.totalorder %v5249_v40, 7  ;;  %vm1401_vm2 = vcmp.lt.s32.totalorder %v5249_v40, 6  ;;  %v5261_v38 = vsub.s32 0, %v5249_v40 }
  0xf2   :  { %v1631_v50 = vrot.slane %v5263_v42, %v5261_v38 }
 0x141   :  { %v926_v62 = vpop.f32.mrb[0].mxu1 }
 0x142   :  { %v1319_v63 = vrot.slane %v926_v62, 4  ;;  %v5242_v1 = vpop.f32.mrb[1].mxu1 }
 0x143   :  { %v930_v31 = vpop.f32.mrb[2].mxu1  ;;  %v1032_v15 = vpop.f32.mrb[0].mxu0 }
 0x144   :  { %v1320_v2 = vmax.f32 %v926_v62, %v1319_v63  ;;  %v1325_v3 = vrot.slane %v930_v31, 4  ;;  %v5244_v4 = vpop.f32.mrb[3].mxu1  ;;  %v1385_v17 = vrot.slane %v1032_v15, 1  ;;  %v1034_v18 = vpop.f32.mrb[1].mxu0 }
 0x145   :  { %v1036_v23 = vpop.f32.mrb[2].mxu0  ;;  %v1397_v25 = vrot.slane %v1034_v18, 2 }
 0x146   :  { %v1321_v5 = vrot.slane %v1320_v2, 2  ;;  %v1326_v6 = vmax.f32 %v930_v31, %v1325_v3  ;;  %v1386_v26 = vrot.slane %v1036_v23, 1  ;;  %v1038_v27 = vpop.f32.mrb[3].mxu0 }
 0x147   :  { %v1398_v32 = vrot.slane %v1038_v27, 2 }
 0x148   :  { %v1322_v8 = vmax.f32 %v1320_v2, %v1321_v5  ;;  %v1327_v9 = vrot.slane %v1326_v6, 2  ;;  %v1391_v33 = vsel %vm1347_vm1, %v1385_v17, %v1386_v26 }
 0x149   :  { %v936_v10 = vpop.f32.mrb[4].mxu1  ;;  %v1404_v37 = vsel %vm1401_vm2, %v1397_v25, %v1398_v32 }
 0x14a   :  { %v1323_v11 = vrot.slane %v1322_v8, 1  ;;  %v1328_v12 = vmax.f32 %v1326_v6, %v1327_v9  ;;  %v1331_v13 = vrot.slane %v936_v10, 4  ;;  %v5246_v14 = vpop.f32.mrb[5].mxu1 }
 0x14b   :  { %v940_v16 = vpop.f32.mrb[6].mxu1  ;;  %v1042_v43 = vpop.f32.mrb[4].mxu0 }
 0x14c   :  { %v1329_v19 = vrot.slane %v1328_v12, 1  ;;  %v1332_v20 = vmax.f32 %v936_v10, %v1331_v13  ;;  %v1337_v21 = vrot.slane %v940_v16, 4  ;;  %v5251_v22 = vpop.f32.mrb[7].mxu1  ;;  %v1324_v24 = vmax.f32 %v1322_v8, %v1323_v11  ;;  %v1044_v45 = vpop.f32.mrb[5].mxu0 }
 0x14d   :  { %v1387_v44 = vrot.slane %v1042_v43, 1  ;;  %v1399_v48 = vrot.slane %v1044_v45, 2  ;;  %v1046_v49 = vpop.f32.mrb[6].mxu0 }
 0x14e   :  { %v1330_v28 = vmax.f32 %v1328_v12, %v1329_v19  ;;  %v1333_v29 = vrot.slane %v1332_v20, 2  ;;  %v1338_v30 = vmax.f32 %v940_v16, %v1337_v21  ;;  %v1388_v52 = vrot.slane %v1046_v49, 1  ;;  %v1048_v53 = vpop.f32.mrb[7].mxu0 }
 0x14f   :  { %v1390_v51 = vsel %vm1347_vm1, %v1386_v26, %v1387_v44  ;;  %v1403_v56 = vsel %vm1401_vm2, %v1398_v32, %v1399_v48  ;;  %v1400_v57 = vrot.slane %v1048_v53, 2 }
 0x150   :  { %v1588_v34 = vsel %vm1587_vm0, %v1330_v28, %v1324_v24  ;;  %v1334_v35 = vmax.f32 %v1332_v20, %v1333_v29  ;;  %v1339_v36 = vrot.slane %v1338_v30, 2  ;;  %v1389_v58 = vsel %vm1347_vm1, %v1387_v44, %v1388_v52 }
 0x151   :  { %v5276_v59 = vsel %vm1347_vm1, %v1388_v52, %v1385_v17  ;;  %v1402_v61 = vsel %vm1401_vm2, %v1399_v48, %v1400_v57  ;;  %v5283_v62 = vsel %vm1401_vm2, %v1400_v57, %v1397_v25 }
 0x152   :  { %v1335_v39 = vrot.slane %v1334_v35, 1  ;;  %v1340_v41 = vmax.f32 %v1338_v30, %v1339_v36 }
 0x154   :  { %v1336_v46 = vmax.f32 %v1334_v35, %v1335_v39  ;;  %v1341_v47 = vrot.slane %v1340_v41, 1 }
 0x156   :  { %v1590_v54 = vsel %vm1589_vm3, %v1336_v46, %v1588_v34  ;;  %v1342_v55 = vmax.f32 %v1340_v41, %v1341_v47 }
 0x158   :  { %v1592_v60 = vsel %vm1591_vm4, %v1342_v55, %v1590_v54 }
 0x159   :  { %v1653_v63 = vadd.f32 %v1631_v50, %v1592_v60 }
 0x15b   :  { %v1663_v31 = vrot.slane %v1653_v63, 2  ;;  %v5285_v2 = vpack.c.bf16 %v1653_v63, %v1653_v63 }
 0x15d   :  { %v1673_v3 = vmul.f32 %v1663_v31, %v1653_v63  ;;  %v5287_v5 = vpack.c.bf16 %v1663_v31, %v1663_v31 }
 0x15f   :  { %v5289_v6 = vpack.c.bf16 %v1673_v3, %v1673_v3 }
 0x161   :  { %v5291_v8 = vpop.f32.mrb[8].mxu1 }
 0x162   :  { %v1343_v9 = vrot.slane %v5291_v8, 1  ;;  %v981_v10 = vpop.f32.mrb[9].mxu1 }
 0x163   :  { %v1393_v11 = vadd.f32 %v1391_v33, %v981_v10  ;;  %v983_v12 = vpop.f32.mrb[10].mxu1 }
 0x164   :  { %5053 = shalt.err (!%p5050_p12)  }
 0x165   :  { %s5054_s12 = scalar_lea.vmem %s137_s1, 2048  ;;  %p5059_p0 = scmp.lt.s32.totalorder %s137_s1, %s137_s1 }
 0x166   :  { %p5055_p13 = scmp.ne.s32.totalorder %s137_s1, %s5054_s12  ;;  %p5060_p1 = scmp.lt.s32.totalorder %s5054_s12, %s5054_s12 }
 0x168   :  { %p5061_p2 = por %p5060_p1, %p5059_p0 }
 0x16a   :  { %p5062_p3 = pnand %p5061_p2, %p5055_p13 }
 0x16c   :  { %5065 = shalt.err (!%p5062_p3)  }
 0x16d   :  { %139 = dma.hbm_to_vmem [thread:$0]  %s5638_s5, 2048, %s137_s1, [#allocation5 + $0x2]  ;;  %vm1410_vm5 = vcmp.le.s32.totalorder %v5249_v40, 5  ;;  %v1344_v13 = vrot.slane %v983_v12, 1  ;;  %v985_v15 = vpop.f32.mrb[11].mxu1  ;;  %v1406_v16 = vadd.f32 %v1404_v37, %v1393_v11  ;;  %vm1356_vm6 = vcmp.le.s32.totalorder %v5249_v40, 6 }
 0x16e   :  { %v1394_v17 = vadd.f32 %v1390_v51, %v985_v15  ;;  %v1638_v19 = vsub.s32 2, %v5249_v40  ;;  %v5317_v24 = vsub.s32 1, %v5249_v40  ;;  %v989_v28 = vpop.f32.mrb[12].mxu1  ;;  %v5330_v39 = vpop.f32.mrb[8].mxu0  ;;  %vm1467_vm7 = vcmp.lt.s32.totalorder %v5249_v40, 5 }
 0x16f   :  { %v1350_v18 = vsel %vm1347_vm1, %v1343_v9, %v1344_v13  ;;  %v1411_v20 = vsel %vm1410_vm5, %v1406_v16, -inf  ;;  %v1345_v33 = vrot.slane %v989_v28, 1  ;;  %v991_v34 = vpop.f32.mrb[13].mxu1  ;;  %v5334_v47 = vpop.f32.mrb[9].mxu0  ;;  %vm1476_vm8 = vcmp.le.s32.totalorder %v5249_v40, 4 }
 0x170   :  { %v1352_v21 = vadd.f32 %v1350_v18, %v5242_v1  ;;  %v1407_v23 = vadd.f32 %v1403_v56, %v1394_v17  ;;  %v1415_v25 = vrot.slane %v1411_v20, 4  ;;  %v1395_v35 = vadd.f32 %v1389_v58, %v991_v34  ;;  %v993_v36 = vpop.f32.mrb[14].mxu1  ;;  %v1142_v52 = vpop.f32.mrb[10].mxu0 }
 0x171   :  { %v1635_v1 = vrot.slane %v5263_v42, %v5317_v24  ;;  %v5328_v37 = vrot.slane %v5263_v42, %v1638_v19  ;;  %v1349_v45 = vsel %vm1347_vm1, %v1344_v13, %v1345_v33  ;;  %v995_v46 = vpop.f32.mrb[15].mxu1  ;;  %v1346_v50 = vrot.slane %v993_v36, 1  ;;  %v1144_v57 = vpop.f32.mrb[11].mxu0 }
 0x172   :  { %v1357_v26 = vsel %vm1356_vm6, %v1352_v21, -inf  ;;  %v1412_v27 = vsel %vm1410_vm5, %v1407_v23, -inf  ;;  %v1416_v29 = vmax.f32 %v1411_v20, %v1415_v25  ;;  %v1353_v48 = vadd.f32 %v1349_v45, %v5244_v4  ;;  %v1148_v23 = vpop.f32.mrb[12].mxu0 }
 0x173   :  { %v1361_v30 = vrot.slane %v1357_v26, 4  ;;  %v1421_v32 = vrot.slane %v1412_v27, 4  ;;  %v1408_v49 = vadd.f32 %v1402_v61, %v1395_v35  ;;  %v1396_v51 = vadd.f32 %v5276_v59, %v995_v46 }
 0x174   :  { %v1417_v41 = vrot.slane %v1416_v29, 2  ;;  %v1451_v56 = vrot.slane %v5330_v39, 2  ;;  %v1358_v58 = vsel %vm1356_vm6, %v1353_v48, -inf  ;;  %v1348_v4 = vsel %vm1347_vm1, %v1345_v33, %v1346_v50 }
 0x175   :  { %v1362_v43 = vmax.f32 %v1357_v26, %v1361_v30  ;;  %v1422_v44 = vmax.f32 %v1412_v27, %v1421_v32  ;;  %v1413_v60 = vsel %vm1410_vm5, %v1408_v49, -inf  ;;  %v1351_v59 = vsel %vm1347_vm1, %v1346_v50, %v1343_v9 }
 0x176   :  { %v1418_v53 = vmax.f32 %v1416_v29, %v1417_v41  ;;  %v1367_v3 = vrot.slane %v1358_v58, 4  ;;  %v1427_v10 = vrot.slane %v1413_v60, 4  ;;  %v1354_v11 = vadd.f32 %v1348_v4, %v5246_v14 }
 0x177   :  { %v1363_v54 = vrot.slane %v1362_v43, 2  ;;  %v1423_v55 = vrot.slane %v1422_v44, 2  ;;  %v1355_v12 = vadd.f32 %v1351_v59, %v5251_v22  ;;  %v1409_v13 = vadd.f32 %v5283_v62, %v1396_v51  ;;  %v1150_v62 = vpop.f32.mrb[13].mxu0 }
 0x178   :  { %v1419_v61 = vrot.slane %v1418_v53, 1  ;;  %v1368_v18 = vmax.f32 %v1358_v58, %v1367_v3  ;;  %v1428_v20 = vmax.f32 %v1413_v60, %v1427_v10  ;;  %v1359_v8 = vsel %vm1356_vm6, %v1354_v11, -inf  ;;  %v1152_v32 = vpop.f32.mrb[14].mxu0 }
 0x179   :  { %v1364_v63 = vmax.f32 %v1362_v43, %v1363_v54  ;;  %v1424_v31 = vmax.f32 %v1422_v44, %v1423_v55  ;;  %v1360_v9 = vsel %vm1356_vm6, %v1355_v12, -inf  ;;  %v1414_v21 = vsel %vm1410_vm5, %v1409_v13, -inf  ;;  %v1154_v41 = vpop.f32.mrb[15].mxu0 }
 0x17a   :  { %v1420_v15 = vmax.f32 %v1418_v53, %v1419_v61  ;;  %v1369_v22 = vrot.slane %v1368_v18, 2  ;;  %v1373_v26 = vrot.slane %v1359_v8, 4  ;;  %v1429_v27 = vrot.slane %v1428_v20, 2 }
 0x17b   :  { %v1365_v16 = vrot.slane %v1364_v63, 1  ;;  %v1425_v17 = vrot.slane %v1424_v31, 1  ;;  %v1379_v28 = vrot.slane %v1360_v9, 4  ;;  %v1433_v29 = vrot.slane %v1414_v21, 4 }
 0x17c   :  { %v1463_v30 = vrot.slane %v5334_v47, 3  ;;  %v1370_v34 = vmax.f32 %v1368_v18, %v1369_v22  ;;  %v1374_v35 = vmax.f32 %v1359_v8, %v1373_v26  ;;  %v1452_v36 = vrot.slane %v1142_v52, 2 }
 0x17d   :  { %v1366_v14 = vmax.f32 %v1364_v63, %v1365_v16  ;;  %v1426_v25 = vmax.f32 %v1424_v31, %v1425_v17  ;;  %v1430_v43 = vmax.f32 %v1428_v20, %v1429_v27  ;;  %v1380_v44 = vmax.f32 %v1360_v9, %v1379_v28 }
 0x17e   :  { %v1434_v45 = vmax.f32 %v1414_v21, %v1433_v29  ;;  %v1464_v46 = vrot.slane %v1144_v57, 3  ;;  %v1371_v48 = vrot.slane %v1370_v34, 1  ;;  %v1375_v49 = vrot.slane %v1374_v35, 2 }
 0x17f   :  { %v1606_v33 = vsel %vm1587_vm0, %v1426_v25, %v1420_v15  ;;  %v1457_v50 = vsel %vm1401_vm2, %v1451_v56, %v1452_v36  ;;  %v1453_v51 = vrot.slane %v1148_v23, 2  ;;  %v1431_v47 = vrot.slane %v1430_v43, 1 }
 0x180   :  { %v1381_v53 = vrot.slane %v1380_v44, 2  ;;  %v1435_v54 = vrot.slane %v1434_v45, 2  ;;  %v1470_v55 = vsel %vm1467_vm7, %v1463_v30, %v1464_v46  ;;  %v1372_v52 = vmax.f32 %v1370_v34, %v1371_v48 }
 0x181   :  { %v1376_v58 = vmax.f32 %v1374_v35, %v1375_v49  ;;  %v5369_v60 = vsel %vm1401_vm2, %v1452_v36, %v1453_v51  ;;  %v1465_v57 = vrot.slane %v1150_v62, 3  ;;  %v1432_v4 = vmax.f32 %v1430_v43, %v1431_v47  ;;  %v1085_v22 = vpop.f32.mrb[16].mxu1 }
 0x182   :  { %v1382_v59 = vmax.f32 %v1380_v44, %v1381_v53  ;;  %v1436_v61 = vmax.f32 %v1434_v45, %v1435_v54  ;;  %v1454_v63 = vrot.slane %v1152_v32, 2  ;;  %v1598_v31 = vsel %vm1587_vm0, %v1372_v52, %v1366_v14  ;;  %v1087_v26 = vpop.f32.mrb[17].mxu1 }
 0x183   :  { %v1377_v3 = vrot.slane %v1376_v58, 1  ;;  %v5374_v10 = vsel %vm1467_vm7, %v1464_v46, %v1465_v57  ;;  %v1466_v11 = vrot.slane %v1154_v41, 3  ;;  %v1607_v12 = vsel %vm1589_vm3, %v1432_v4, %v1606_v33  ;;  %v1089_v62 = vpop.f32.mrb[18].mxu1  ;;  %v1244_v53 = vpop.f32.mrb[16].mxu0 }
 0x184   :  { %v1383_v13 = vrot.slane %v1382_v59, 1  ;;  %v1437_v15 = vrot.slane %v1436_v61, 1  ;;  %v1455_v16 = vsel %vm1401_vm2, %v1453_v51, %v1454_v63  ;;  %v1458_v18 = vsel %vm1401_vm2, %v1454_v63, %v1451_v56  ;;  %v1091_v32 = vpop.f32.mrb[19].mxu1 }
 0x185   :  { %v1378_v17 = vmax.f32 %v1376_v58, %v1377_v3  ;;  %v1468_v20 = vsel %vm1467_vm7, %v1465_v57, %v1466_v11  ;;  %v1471_v8 = vsel %vm1467_vm7, %v1466_v11, %v1463_v30  ;;  %v1439_v33 = vrot.slane %v1087_v26, 1  ;;  %v1246_v57 = vpop.f32.mrb[17].mxu0 }
 0x186   :  { %v1384_v9 = vmax.f32 %v1382_v59, %v1383_v13  ;;  %v1438_v21 = vmax.f32 %v1436_v61, %v1437_v15  ;;  %v1440_v34 = vrot.slane %v1091_v32, 1  ;;  %v1517_v58 = vrot.slane %v1244_v53, 2  ;;  %v1248_v63 = vpop.f32.mrb[18].mxu0 }
 0x187   :  { %v1599_v23 = vsel %vm1589_vm3, %v1378_v17, %v1598_v31  ;;  %v1529_v61 = vrot.slane %v1246_v57, 3  ;;  %v1518_v3 = vrot.slane %v1248_v63, 2  ;;  %v1250_v11 = vpop.f32.mrb[19].mxu0  ;;  %vm1545_vm9 = vcmp.lt.s32.totalorder %v5249_v40, 4 }
 0x188   :  { %v1600_v14 = vsel %vm1591_vm4, %v1384_v9, %v1599_v23  ;;  %v1608_v25 = vsel %vm1591_vm4, %v1438_v21, %v1607_v12  ;;  %v1530_v15 = vrot.slane %v1250_v11, 3  ;;  %vm1554_vm10 = vcmp.le.s32.totalorder %v5249_v40, 3 }
 0x189   :  { %v1654_v39 = vadd.f32 %v1635_v1, %v1600_v14  ;;  %v1655_v56 = vadd.f32 %v5328_v37, %v1608_v25  ;;  %v1445_v1 = vsel %vm1347_vm1, %v1439_v33, %v1440_v34  ;;  %v1095_v46 = vpop.f32.mrb[20].mxu1  ;;  %v5420_v23 = vsel %vm1401_vm2, %v1517_v58, %v1518_v3 }
 0x18a   :  { %v1447_v45 = vadd.f32 %v1445_v1, %v1085_v22  ;;  %v1097_v49 = vpop.f32.mrb[21].mxu1  ;;  %v5424_v25 = vsel %vm1467_vm7, %v1529_v61, %v1530_v15 }
 0x18b   :  { %v1664_v27 = vrot.slane %v1654_v39, 2  ;;  %v5394_v28 = vpack.c.bf16 %v1654_v39, %v1654_v39  ;;  %v1665_v29 = vrot.slane %v1655_v56, 2  ;;  %v5396_v30 = vpack.c.bf16 %v1655_v56, %v1655_v56  ;;  %v1099_v47 = vpop.f32.mrb[22].mxu1 }
 0x18c   :  { %v1459_v48 = vadd.f32 %v1457_v50, %v1447_v45  ;;  %v1441_v51 = vrot.slane %v1097_v49, 1  ;;  %v1101_v52 = vpop.f32.mrb[23].mxu1 }
 0x18d   :  { %v1674_v35 = vmul.f32 %v1664_v27, %v1654_v39  ;;  %v5398_v36 = vpack.c.bf16 %v1664_v27, %v1664_v27  ;;  %v1675_v41 = vmul.f32 %v1665_v29, %v1655_v56  ;;  %v5400_v43 = vpack.c.bf16 %v1665_v29, %v1665_v29 }
 0x18e   :  { %v1472_v54 = vadd.f32 %v1470_v55, %v1459_v48  ;;  %v1444_v4 = vsel %vm1347_vm1, %v1440_v34, %v1441_v51  ;;  %v1442_v59 = vrot.slane %v1101_v52, 1 }
 0x18f   :  { %v5404_v37 = vpack.c.bf16 %v1674_v35, %v1674_v35  ;;  %v5406_v44 = vpack.c.bf16 %v1675_v41, %v1675_v41  ;;  %v1448_v50 = vadd.f32 %v1444_v4, %v1089_v62  ;;  %v1254_v62 = vpop.f32.mrb[20].mxu0 }
 0x190   :  { %v1477_v31 = vsel %vm1476_vm8, %v1472_v54, -inf  ;;  %v1443_v13 = vsel %vm1347_vm1, %v1441_v51, %v1442_v59  ;;  %v1446_v55 = vsel %vm1347_vm1, %v1442_v59, %v1439_v33  ;;  %v1519_v32 = vrot.slane %v1254_v62, 2  ;;  %v1256_v33 = vpop.f32.mrb[21].mxu0 }
 0x191   :  { %v1481_v12 = vrot.slane %v1477_v31, 4  ;;  %v1449_v17 = vadd.f32 %v1443_v13, %v1095_v46  ;;  %v1450_v9 = vadd.f32 %v1446_v55, %v1099_v47  ;;  %v1460_v21 = vadd.f32 %v5369_v60, %v1448_v50  ;;  %v1258_v41 = vpop.f32.mrb[22].mxu0 }
 0x192   :  { %v1531_v35 = vrot.slane %v1256_v33, 3  ;;  %v1260_v45 = vpop.f32.mrb[23].mxu0  ;;  %v1642_v55 = vsub.s32 3, %v5249_v40 }
 0x193   :  { %v1482_v14 = vmax.f32 %v1477_v31, %v1481_v12  ;;  %v1473_v22 = vadd.f32 %v5374_v10, %v1460_v21  ;;  %v1461_v39 = vadd.f32 %v1455_v16, %v1449_v17  ;;  %v1462_v56 = vadd.f32 %v1458_v18, %v1450_v9 }
 0x194   :  { %v1522_v16 = vsel %vm1401_vm2, %v1518_v3, %v1519_v32  ;;  %v1520_v18 = vrot.slane %v1258_v41, 2  ;;  %v1534_v49 = vsel %vm1467_vm7, %v1530_v15, %v1531_v35  ;;  %v1532_v53 = vrot.slane %v1260_v45, 3 }
 0x195   :  { %v1483_v26 = vrot.slane %v1482_v14, 2  ;;  %v1478_v27 = vsel %vm1476_vm8, %v1473_v22, -inf  ;;  %v1474_v29 = vadd.f32 %v1468_v20, %v1461_v39  ;;  %v1475_v60 = vadd.f32 %v1471_v8, %v1462_v56 }
 0x196   :  { %v1487_v34 = vrot.slane %v1478_v27, 4  ;;  %v1521_v51 = vsel %vm1401_vm2, %v1519_v32, %v1520_v18  ;;  %v1524_v47 = vsel %vm1401_vm2, %v1520_v18, %v1517_v58  ;;  %v1533_v4 = vsel %vm1467_vm7, %v1531_v35, %v1532_v53 }
 0x197   :  { %v1479_v1 = vsel %vm1476_vm8, %v1474_v29, -inf  ;;  %v1480_v10 = vsel %vm1476_vm8, %v1475_v60, -inf  ;;  %v1484_v46 = vmax.f32 %v1482_v14, %v1483_v26  ;;  %v1536_v59 = vsel %vm1467_vm7, %v1532_v53, %v1529_v61 }
 0x198   :  { %v1488_v48 = vmax.f32 %v1478_v27, %v1487_v34  ;;  %v1493_v20 = vrot.slane %v1479_v1, 4  ;;  %v1499_v8 = vrot.slane %v1480_v10, 4  ;;  %v1643_v61 = vrot.slane %v5263_v42, %v1642_v55 }
 0x199   :  { %v1485_v63 = vrot.slane %v1484_v46, 1 }
 0x19a   :  { %v1489_v54 = vrot.slane %v1488_v48, 2  ;;  %v1494_v52 = vmax.f32 %v1479_v1, %v1493_v20  ;;  %v1500_v57 = vmax.f32 %v1480_v10, %v1499_v8 }
 0x19b   :  { %v1486_v58 = vmax.f32 %v1484_v46, %v1485_v63 }
 0x19c   :  { %v1490_v31 = vmax.f32 %v1488_v48, %v1489_v54  ;;  %v1495_v50 = vrot.slane %v1494_v52, 2  ;;  %v1501_v3 = vrot.slane %v1500_v57, 2 }
 0x19e   :  { %v1491_v11 = vrot.slane %v1490_v31, 1  ;;  %v1496_v12 = vmax.f32 %v1494_v52, %v1495_v50  ;;  %v1502_v13 = vmax.f32 %v1500_v57, %v1501_v3 }
 0x1a0   :  { %v1492_v15 = vmax.f32 %v1490_v31, %v1491_v11  ;;  %v1497_v17 = vrot.slane %v1496_v12, 1  ;;  %v1503_v9 = vrot.slane %v1502_v13, 1 }
 0x1a1   :  { %v1191_v39 = vpop.f32.mrb[24].mxu1 }
 0x1a2   :  { %v1614_v21 = vsel %vm1587_vm0, %v1492_v15, %v1486_v58  ;;  %v1498_v14 = vmax.f32 %v1496_v12, %v1497_v17  ;;  %v1504_v22 = vmax.f32 %v1502_v13, %v1503_v9  ;;  %v1193_v56 = vpop.f32.mrb[25].mxu1 }
 0x1a3   :  { %v1195_v62 = vpop.f32.mrb[26].mxu1  ;;  %v1505_v32 = vrot.slane %v1193_v56, 1 }
 0x1a4   :  { %v1615_v26 = vsel %vm1589_vm3, %v1498_v14, %v1614_v21  ;;  %v1197_v29 = vpop.f32.mrb[27].mxu1 }
 0x1a5   :  { %v1616_v27 = vsel %vm1591_vm4, %v1504_v22, %v1615_v26  ;;  %v1506_v33 = vrot.slane %v1197_v29, 1 }
 0x1a6   :  { %v1656_v60 = vadd.f32 %v1643_v61, %v1616_v27 }
 0x1a7   :  { %v1511_v41 = vsel %vm1347_vm1, %v1505_v32, %v1506_v33 }
 0x1a8   :  { %v1666_v34 = vrot.slane %v1656_v60, 2  ;;  %v5452_v35 = vpack.c.bf16 %v1656_v60, %v1656_v60  ;;  %v1513_v1 = vadd.f32 %v1511_v41, %v1191_v39 }
 0x1a9   :  { %v1201_v45 = vpop.f32.mrb[28].mxu1 }
 0x1aa   :  { %v1676_v10 = vmul.f32 %v1666_v34, %v1656_v60  ;;  %v5456_v18 = vpack.c.bf16 %v1666_v34, %v1666_v34  ;;  %v1525_v46 = vadd.f32 %v5420_v23, %v1513_v1  ;;  %v1203_v48 = vpop.f32.mrb[29].mxu1 }
 0x1ab   :  { %v1507_v8 = vrot.slane %v1203_v48, 1  ;;  %v1205_v53 = vpop.f32.mrb[30].mxu1 }
 0x1ac   :  { %v5459_v20 = vpack.c.bf16 %v1676_v10, %v1676_v10  ;;  %v1537_v54 = vadd.f32 %v5424_v25, %v1525_v46  ;;  %v1207_v52 = vpop.f32.mrb[31].mxu1 }
 0x1ad   :  { %v1510_v57 = vsel %vm1347_vm1, %v1506_v33, %v1507_v8  ;;  %v1508_v63 = vrot.slane %v1207_v52, 1 }
 0x1ae   :  { %v1514_v31 = vadd.f32 %v1510_v57, %v1195_v62 }
 0x1af   :  { %v1509_v50 = vsel %vm1347_vm1, %v1507_v8, %v1508_v63  ;;  %v1512_v3 = vsel %vm1347_vm1, %v1508_v63, %v1505_v32 }
 0x1b0   :  { %v1515_v23 = vadd.f32 %v1509_v50, %v1201_v45  ;;  %v1516_v11 = vadd.f32 %v1512_v3, %v1205_v53  ;;  %v1526_v12 = vadd.f32 %v1522_v16, %v1514_v31 }
 0x1b2   :  { %v1538_v13 = vadd.f32 %v1534_v49, %v1526_v12  ;;  %v1527_v58 = vadd.f32 %v1521_v51, %v1515_v23  ;;  %v1528_v15 = vadd.f32 %v1524_v47, %v1516_v11  ;;  %v1646_v11 = vsub.s32 4, %v5249_v40 }
 0x1b4   :  { %v1539_v17 = vadd.f32 %v1533_v4, %v1527_v58  ;;  %v1540_v25 = vadd.f32 %v1536_v59, %v1528_v15 }
 0x1c1   :  { %v4639_v9 = vpop.f32.mrb[32].mxu1 }
 0x1c2   :  { %v1297_v21 = vpop.f32.mrb[33].mxu1  ;;  %v1543_v61 = vrot.slane %v4639_v9, 4  ;;  %v1647_v9 = vrot.slane %v5263_v42, %v1646_v11 }
 0x1c3   :  { %v1541_v14 = vrot.slane %v1297_v21, 4  ;;  %v4640_v22 = vpop.f32.mrb[34].mxu1 }
 0x1c4   :  { %v1544_v39 = vrot.slane %v4640_v22, 4  ;;  %v1300_v56 = vpop.f32.mrb[35].mxu1 }
 0x1c5   :  { %v1542_v26 = vrot.slane %v1300_v56, 4 }
 0x1c6   :  { %v1546_v62 = vsel %vm1545_vm9, %v1543_v61, %v1544_v39  ;;  %v1549_v27 = vsel %vm1545_vm9, %v1544_v39, %v1541_v14 }
 0x1c7   :  { %v1552_v16 = vadd.f32 %v1546_v62, %v1539_v17  ;;  %v1553_v49 = vadd.f32 %v1549_v27, %v1540_v25  ;;  %v1547_v51 = vsel %vm1545_vm9, %v1542_v26, %v1543_v61  ;;  %v1548_v47 = vsel %vm1545_vm9, %v1541_v14, %v1542_v26 }
 0x1c8   :  { %v1550_v4 = vadd.f32 %v1548_v47, %v1537_v54  ;;  %v1551_v59 = vadd.f32 %v1547_v51, %v1538_v13 }
 0x1c9   :  { %v1557_v29 = vsel %vm1554_vm10, %v1552_v16, -inf  ;;  %v1558_v60 = vsel %vm1554_vm10, %v1553_v49, -inf }
 0x1ca   :  { %v1571_v32 = vrot.slane %v1557_v29, 4  ;;  %v1577_v33 = vrot.slane %v1558_v60, 4  ;;  %v1555_v34 = vsel %vm1554_vm10, %v1550_v4, -inf  ;;  %v1556_v41 = vsel %vm1554_vm10, %v1551_v59, -inf }
 0x1cb   :  { %v1559_v1 = vrot.slane %v1555_v34, 4  ;;  %v1565_v10 = vrot.slane %v1556_v41, 4 }
 0x1cc   :  { %v1572_v45 = vmax.f32 %v1557_v29, %v1571_v32  ;;  %v1578_v46 = vmax.f32 %v1558_v60, %v1577_v33 }
 0x1cd   :  { %v1560_v48 = vmax.f32 %v1555_v34, %v1559_v1  ;;  %v1566_v8 = vmax.f32 %v1556_v41, %v1565_v10 }
 0x1ce   :  { %v1573_v53 = vrot.slane %v1572_v45, 2  ;;  %v1579_v52 = vrot.slane %v1578_v46, 2 }
 0x1cf   :  { %v1561_v57 = vrot.slane %v1560_v48, 2  ;;  %v1567_v63 = vrot.slane %v1566_v8, 2 }
 0x1d0   :  { %v1574_v31 = vmax.f32 %v1572_v45, %v1573_v53  ;;  %v1580_v50 = vmax.f32 %v1578_v46, %v1579_v52 }
 0x1d1   :  { %v1562_v54 = vmax.f32 %v1560_v48, %v1561_v57  ;;  %v1568_v3 = vmax.f32 %v1566_v8, %v1567_v63 }
 0x1d2   :  { %v1575_v23 = vrot.slane %v1574_v31, 1  ;;  %v1581_v12 = vrot.slane %v1580_v50, 1 }
 0x1d3   :  { %v1563_v13 = vrot.slane %v1562_v54, 1  ;;  %v1569_v58 = vrot.slane %v1568_v3, 1 }
 0x1d4   :  { %v1576_v25 = vmax.f32 %v1574_v31, %v1575_v23  ;;  %v1582_v21 = vmax.f32 %v1580_v50, %v1581_v12 }
 0x1d5   :  { %v1564_v15 = vmax.f32 %v1562_v54, %v1563_v13  ;;  %v1570_v17 = vmax.f32 %v1568_v3, %v1569_v58 }
 0x1d7   :  { %v1622_v14 = vsel %vm1587_vm0, %v1570_v17, %v1564_v15 }
 0x1d8   :  { %v1623_v22 = vsel %vm1589_vm3, %v1576_v25, %v1622_v14 }
 0x1d9   :  { %v1624_v61 = vsel %vm1591_vm4, %v1582_v21, %v1623_v22 }
 0x1da   :  { %v1657_v39 = vadd.f32 %v1647_v9, %v1624_v61 }
 0x1dc   :  { %v1667_v56 = vrot.slane %v1657_v39, 2  ;;  %v5477_v26 = vpack.c.bf16 %v1657_v39, %v1657_v39 }
 0x1de   :  { %v1677_v62 = vmul.f32 %v1667_v56, %v1657_v39  ;;  %v5479_v27 = vpack.c.bf16 %v1667_v56, %v1667_v56 }
 0x1e0   :  { %v5481_v16 = vpack.c.bf16 %v1677_v62, %v1677_v62 }
 0x1e1   :  { %5092 = dma.done.wait [#allocation5], 122880 }
 0x1e2   :  { %5093 = vsyncadd [#allocation5], 4294844416  ;;  %2731 = vmatprep.mubr.bf16.mxu1 %v5394_v28  ;;  %2772 = vmatprep.mubr.bf16.mxu0 %v5452_v35  ;;  %v1698_v42 = vld [vmem:[#allocation2 + $0x8] sm:$0xff]  ;;  %v1697_v51 = vld [vmem:[#allocation2] sm:$0xff] }
 0x1e3   :  { %v1826_v49 = vld [vmem:[#allocation2 + $0x408] sm:$0xff]  ;;  %2699 = vmatprep.subr.bf16.mxu1 %v1698_v42  ;;  %v1825_v47 = vld [vmem:[#allocation2 + $0x400] sm:$0xff] }
 0x1e4   :  { %2740 = vmatprep.subr.bf16.mxu0 %v1826_v49  ;;  %v1706_v4 = vld [vmem:[#allocation2 + $0x48] sm:$0xff]  ;;  %2700 = vmatpush1.bf16.msra.mxu1 %v1697_v51  ;;  %v1705_v29 = vld [vmem:[#allocation2 + $0x40] sm:$0xff] }
 0x1e5   :  { %v1834_v59 = vld [vmem:[#allocation2 + $0x448] sm:$0xff]  ;;  %2741 = vmatpush1.bf16.msra.mxu0 %v1825_v47  ;;  %2701 = vmatprep.subr.bf16.mxu1 %v1706_v4  ;;  %v1833_v60 = vld [vmem:[#allocation2 + $0x440] sm:$0xff] }
 0x1e6   :  { %2742 = vmatprep.subr.bf16.mxu0 %v1834_v59  ;;  %v1714_v32 = vld [vmem:[#allocation2 + $0x88] sm:$0xff]  ;;  %v1713_v34 = vld [vmem:[#allocation2 + $0x80] sm:$0xff] }
 0x1e7   :  { %v1842_v33 = vld [vmem:[#allocation2 + $0x488] sm:$0xff]  ;;  %v1841_v41 = vld [vmem:[#allocation2 + $0x480] sm:$0xff] }
 0x1e8   :  { %2702 = vmatpush1.bf16.msra.mxu1 %v1705_v29  ;;  %v1722_v1 = vld [vmem:[#allocation2 + $0xc8] sm:$0xff]  ;;  %v1721_v45 = vld [vmem:[#allocation2 + $0xc0] sm:$0xff] }
 0x1e9   :  { %2743 = vmatpush1.bf16.msra.mxu0 %v1833_v60  ;;  %2703 = vmatprep.subr.bf16.mxu1 %v1714_v32  ;;  %v1850_v10 = vld [vmem:[#allocation2 + $0x4c8] sm:$0xff]  ;;  %v1849_v46 = vld [vmem:[#allocation2 + $0x4c0] sm:$0xff] }
 0x1ea   :  { %2744 = vmatprep.subr.bf16.mxu0 %v1842_v33  ;;  %v1730_v48 = vld [vmem:[#allocation2 + $0x108] sm:$0xff]  ;;  %v1729_v53 = vld [vmem:[#allocation2 + $0x100] sm:$0xff] }
 0x1eb   :  { %v1858_v8 = vld [vmem:[#allocation2 + $0x508] sm:$0xff]  ;;  %v1857_v52 = vld [vmem:[#allocation2 + $0x500] sm:$0xff] }
 0x1ec   :  { %2704 = vmatpush1.bf16.msra.mxu1 %v1713_v34  ;;  %v1738_v57 = vld [vmem:[#allocation2 + $0x148] sm:$0xff]  ;;  %v1737_v31 = vld [vmem:[#allocation2 + $0x140] sm:$0xff] }
 0x1ed   :  { %2745 = vmatpush1.bf16.msra.mxu0 %v1841_v41  ;;  %2705 = vmatprep.subr.bf16.mxu1 %v1722_v1  ;;  %v1866_v63 = vld [vmem:[#allocation2 + $0x548] sm:$0xff]  ;;  %v1865_v50 = vld [vmem:[#allocation2 + $0x540] sm:$0xff] }
 0x1ee   :  { %2746 = vmatprep.subr.bf16.mxu0 %v1850_v10  ;;  %v1746_v54 = vld [vmem:[#allocation2 + $0x188] sm:$0xff]  ;;  %v1745_v23 = vld [vmem:[#allocation2 + $0x180] sm:$0xff] }
 0x1ef   :  { %v1874_v3 = vld [vmem:[#allocation2 + $0x588] sm:$0xff]  ;;  %v1873_v12 = vld [vmem:[#allocation2 + $0x580] sm:$0xff] }
 0x1f0   :  { %2706 = vmatpush1.bf16.msra.mxu1 %v1721_v45  ;;  %v1754_v13 = vld [vmem:[#allocation2 + $0x1c8] sm:$0xff]  ;;  %v1753_v15 = vld [vmem:[#allocation2 + $0x1c0] sm:$0xff] }
 0x1f1   :  { %2747 = vmatpush1.bf16.msra.mxu0 %v1849_v46  ;;  %2707 = vmatprep.subr.bf16.mxu1 %v1730_v48  ;;  %v1882_v58 = vld [vmem:[#allocation2 + $0x5c8] sm:$0xff]  ;;  %v1881_v17 = vld [vmem:[#allocation2 + $0x5c0] sm:$0xff] }
 0x1f2   :  { %2748 = vmatprep.subr.bf16.mxu0 %v1858_v8  ;;  %v1762_v25 = vld [vmem:[#allocation2 + $0x208] sm:$0xff]  ;;  %v1761_v21 = vld [vmem:[#allocation2 + $0x200] sm:$0xff] }
 0x1f3   :  { %v1890_v9 = vld [vmem:[#allocation2 + $0x608] sm:$0xff]  ;;  %v1889_v14 = vld [vmem:[#allocation2 + $0x600] sm:$0xff] }
 0x1f4   :  { %2708 = vmatpush1.bf16.msra.mxu1 %v1729_v53  ;;  %v1770_v22 = vld [vmem:[#allocation2 + $0x248] sm:$0xff]  ;;  %v1769_v39 = vld [vmem:[#allocation2 + $0x240] sm:$0xff] }
 0x1f5   :  { %2749 = vmatpush1.bf16.msra.mxu0 %v1857_v52  ;;  %2709 = vmatprep.subr.bf16.mxu1 %v1738_v57  ;;  %v1898_v61 = vld [vmem:[#allocation2 + $0x648] sm:$0xff]  ;;  %v1897_v56 = vld [vmem:[#allocation2 + $0x640] sm:$0xff] }
 0x1f6   :  { %2750 = vmatprep.subr.bf16.mxu0 %v1866_v63  ;;  %v1778_v62 = vld [vmem:[#allocation2 + $0x288] sm:$0xff]  ;;  %v1777_v49 = vld [vmem:[#allocation2 + $0x280] sm:$0xff] }
 0x1f7   :  { %v1906_v42 = vld [vmem:[#allocation2 + $0x688] sm:$0xff]  ;;  %v1905_v51 = vld [vmem:[#allocation2 + $0x680] sm:$0xff] }
 0x1f8   :  { %2710 = vmatpush1.bf16.msra.mxu1 %v1737_v31  ;;  %v1786_v47 = vld [vmem:[#allocation2 + $0x2c8] sm:$0xff]  ;;  %v1785_v59 = vld [vmem:[#allocation2 + $0x2c0] sm:$0xff] }
 0x1f9   :  { %2751 = vmatpush1.bf16.msra.mxu0 %v1865_v50  ;;  %2711 = vmatprep.subr.bf16.mxu1 %v1746_v54  ;;  %v1914_v4 = vld [vmem:[#allocation2 + $0x6c8] sm:$0xff]  ;;  %v1913_v29 = vld [vmem:[#allocation2 + $0x6c0] sm:$0xff]  ;;  %v1700_v54 = vld [vmem:[#allocation2 + $0x18] sm:$0xff] }
 0x1fa   :  { %2752 = vmatprep.subr.bf16.mxu0 %v1874_v3  ;;  %v1794_v60 = vld [vmem:[#allocation2 + $0x308] sm:$0xff]  ;;  %v1793_v33 = vld [vmem:[#allocation2 + $0x300] sm:$0xff] }
 0x1fb   :  { %v1922_v32 = vld [vmem:[#allocation2 + $0x708] sm:$0xff]  ;;  %v1921_v34 = vld [vmem:[#allocation2 + $0x700] sm:$0xff] }
 0x1fc   :  { %2712 = vmatpush1.bf16.msra.mxu1 %v1745_v23  ;;  %v1802_v41 = vld [vmem:[#allocation2 + $0x348] sm:$0xff]  ;;  %v1801_v10 = vld [vmem:[#allocation2 + $0x340] sm:$0xff]  ;;  %v1699_v23 = vld [vmem:[#allocation2 + $0x10] sm:$0xff] }
 0x1fd   :  { %2753 = vmatpush1.bf16.msra.mxu0 %v1873_v12  ;;  %2713 = vmatprep.subr.bf16.mxu1 %v1754_v13  ;;  %v1930_v1 = vld [vmem:[#allocation2 + $0x748] sm:$0xff]  ;;  %v1929_v45 = vld [vmem:[#allocation2 + $0x740] sm:$0xff]  ;;  %v1708_v13 = vld [vmem:[#allocation2 + $0x58] sm:$0xff] }
 0x1fe   :  { %2754 = vmatprep.subr.bf16.mxu0 %v1882_v58  ;;  %v1810_v46 = vld [vmem:[#allocation2 + $0x388] sm:$0xff]  ;;  %v1809_v8 = vld [vmem:[#allocation2 + $0x380] sm:$0xff] }
 0x1ff   :  { %v1938_v48 = vld [vmem:[#allocation2 + $0x788] sm:$0xff]  ;;  %v1937_v53 = vld [vmem:[#allocation2 + $0x780] sm:$0xff] }
 0x200   :  { %2714 = vmatpush1.bf16.msra.mxu1 %v1753_v15  ;;  %v1818_v52 = vld [vmem:[#allocation2 + $0x3c8] sm:$0xff]  ;;  %v1817_v63 = vld [vmem:[#allocation2 + $0x3c0] sm:$0xff]  ;;  %v1707_v15 = vld [vmem:[#allocation2 + $0x50] sm:$0xff] }
 0x201   :  { %2755 = vmatpush1.bf16.msra.mxu0 %v1881_v17  ;;  %2715 = vmatprep.subr.bf16.mxu1 %v1762_v25  ;;  %v1946_v57 = vld [vmem:[#allocation2 + $0x7c8] sm:$0xff]  ;;  %v1945_v31 = vld [vmem:[#allocation2 + $0x7c0] sm:$0xff]  ;;  %v1716_v25 = vld [vmem:[#allocation2 + $0x98] sm:$0xff] }
 0x202   :  { %2756 = vmatprep.subr.bf16.mxu0 %v1890_v9  ;;  %v1954_v50 = vld [vmem:[#allocation2 + $0x808] sm:$0xff]  ;;  %v1953_v3 = vld [vmem:[#allocation2 + $0x800] sm:$0xff] }
 0x203   :  { %v1962_v12 = vld [vmem:[#allocation2 + $0x848] sm:$0xff]  ;;  %v1961_v58 = vld [vmem:[#allocation2 + $0x840] sm:$0xff] }
 0x204   :  { %2716 = vmatpush1.bf16.msra.mxu1 %v1761_v21  ;;  %v1970_v17 = vld [vmem:[#allocation2 + $0x888] sm:$0xff]  ;;  %v1969_v9 = vld [vmem:[#allocation2 + $0x880] sm:$0xff]  ;;  %v1715_v21 = vld [vmem:[#allocation2 + $0x90] sm:$0xff] }
 0x205   :  { %2757 = vmatpush1.bf16.msra.mxu0 %v1889_v14  ;;  %2717 = vmatprep.subr.bf16.mxu1 %v1770_v22  ;;  %v1978_v14 = vld [vmem:[#allocation2 + $0x8c8] sm:$0xff]  ;;  %v1724_v22 = vld [vmem:[#allocation2 + $0xd8] sm:$0xff] }
 0x206   :  { %2758 = vmatprep.subr.bf16.mxu0 %v1898_v61  ;;  %v1977_v61 = vld [vmem:[#allocation2 + $0x8c0] sm:$0xff] }
 0x208   :  { %2718 = vmatpush1.bf16.msra.mxu1 %v1769_v39  ;;  %v1723_v39 = vld [vmem:[#allocation2 + $0xd0] sm:$0xff] }
 0x209   :  { %2759 = vmatpush1.bf16.msra.mxu0 %v1897_v56  ;;  %2719 = vmatprep.subr.bf16.mxu1 %v1778_v62  ;;  %v1986_v56 = vld [vmem:[#allocation2 + $0x908] sm:$0xff]  ;;  %v1732_v62 = vld [vmem:[#allocation2 + $0x118] sm:$0xff] }
 0x20a   :  { %2760 = vmatprep.subr.bf16.mxu0 %v1906_v42  ;;  %v1985_v42 = vld [vmem:[#allocation2 + $0x900] sm:$0xff] }
 0x20c   :  { %2720 = vmatpush1.bf16.msra.mxu1 %v1777_v49  ;;  %v1731_v49 = vld [vmem:[#allocation2 + $0x110] sm:$0xff] }
 0x20d   :  { %2761 = vmatpush1.bf16.msra.mxu0 %v1905_v51  ;;  %2721 = vmatprep.subr.bf16.mxu1 %v1786_v47  ;;  %v1994_v51 = vld [vmem:[#allocation2 + $0x948] sm:$0xff]  ;;  %v1740_v47 = vld [vmem:[#allocation2 + $0x158] sm:$0xff] }
 0x20e   :  { %2762 = vmatprep.subr.bf16.mxu0 %v1914_v4  ;;  %v1993_v4 = vld [vmem:[#allocation2 + $0x940] sm:$0xff] }
 0x210   :  { %2722 = vmatpush1.bf16.msra.mxu1 %v1785_v59  ;;  %v1739_v59 = vld [vmem:[#allocation2 + $0x150] sm:$0xff] }
 0x211   :  { %2763 = vmatpush1.bf16.msra.mxu0 %v1913_v29  ;;  %2723 = vmatprep.subr.bf16.mxu1 %v1794_v60  ;;  %v2002_v29 = vld [vmem:[#allocation2 + $0x988] sm:$0xff]  ;;  %v1748_v60 = vld [vmem:[#allocation2 + $0x198] sm:$0xff] }
 0x212   :  { %2764 = vmatprep.subr.bf16.mxu0 %v1922_v32  ;;  %v2001_v32 = vld [vmem:[#allocation2 + $0x980] sm:$0xff] }
 0x214   :  { %2724 = vmatpush1.bf16.msra.mxu1 %v1793_v33  ;;  %v1747_v33 = vld [vmem:[#allocation2 + $0x190] sm:$0xff] }
 0x215   :  { %2765 = vmatpush1.bf16.msra.mxu0 %v1921_v34  ;;  %2725 = vmatprep.subr.bf16.mxu1 %v1802_v41  ;;  %v2010_v34 = vld [vmem:[#allocation2 + $0x9c8] sm:$0xff]  ;;  %v1756_v41 = vld [vmem:[#allocation2 + $0x1d8] sm:$0xff] }
 0x216   :  { %2766 = vmatprep.subr.bf16.mxu0 %v1930_v1  ;;  %v2009_v1 = vld [vmem:[#allocation2 + $0x9c0] sm:$0xff] }
 0x218   :  { %2726 = vmatpush1.bf16.msra.mxu1 %v1801_v10  ;;  %v1755_v10 = vld [vmem:[#allocation2 + $0x1d0] sm:$0xff] }
 0x219   :  { %2767 = vmatpush1.bf16.msra.mxu0 %v1929_v45  ;;  %2727 = vmatprep.subr.bf16.mxu1 %v1810_v46  ;;  %v2018_v45 = vld [vmem:[#allocation2 + $0xa08] sm:$0xff]  ;;  %v1764_v46 = vld [vmem:[#allocation2 + $0x218] sm:$0xff] }
 0x21a   :  { %2768 = vmatprep.subr.bf16.mxu0 %v1938_v48  ;;  %v2017_v48 = vld [vmem:[#allocation2 + $0xa00] sm:$0xff] }
 0x21c   :  { %2728 = vmatpush1.bf16.msra.mxu1 %v1809_v8  ;;  %v1763_v8 = vld [vmem:[#allocation2 + $0x210] sm:$0xff] }
 0x21d   :  { %2769 = vmatpush1.bf16.msra.mxu0 %v1937_v53  ;;  %2729 = vmatprep.subr.bf16.mxu1 %v1818_v52  ;;  %v2026_v53 = vld [vmem:[#allocation2 + $0xa48] sm:$0xff]  ;;  %v1772_v52 = vld [vmem:[#allocation2 + $0x258] sm:$0xff] }
 0x21e   :  { %2770 = vmatprep.subr.bf16.mxu0 %v1946_v57  ;;  %v2025_v57 = vld [vmem:[#allocation2 + $0xa40] sm:$0xff] }
 0x220   :  { %2730 = vmatpush1.bf16.msra.mxu1 %v1817_v63  ;;  %v1771_v63 = vld [vmem:[#allocation2 + $0x250] sm:$0xff] }
 0x221   :  { %2771 = vmatpush1.bf16.msra.mxu0 %v1945_v31  ;;  %3027 = vmatprep.subr.bf16.mxu1 %v1700_v54  ;;  %v2034_v31 = vld [vmem:[#allocation2 + $0xa88] sm:$0xff]  ;;  %v2033_v54 = vld [vmem:[#allocation2 + $0xa80] sm:$0xff] }
 0x222   :  { %2781 = vmatprep.subr.bf16.mxu0 %v1954_v50  ;;  %v1780_v50 = vld [vmem:[#allocation2 + $0x298] sm:$0xff] }
 0x223   :  { %2732 = vmatmul.mubr.bf16.vlgmr.msra.gmra.mrb[36].mxu1 %v5285_v2 }
 0x224   :  { %2773 = vmatmul.mubr.bf16.vlgmr.msra.gmra.mrb[24].mxu0 %v5396_v30  ;;  %3028 = vmatpush1.bf16.msra.mxu1 %v1699_v23  ;;  %v2042_v23 = vld [vmem:[#allocation2 + $0xac8] sm:$0xff] }
 0x225   :  { %2782 = vmatpush1.bf16.msra.mxu0 %v1953_v3  ;;  %3029 = vmatprep.subr.bf16.mxu1 %v1708_v13  ;;  %v1779_v3 = vld [vmem:[#allocation2 + $0x290] sm:$0xff]  ;;  %v2041_v13 = vld [vmem:[#allocation2 + $0xac0] sm:$0xff] }
 0x226   :  { %2783 = vmatprep.subr.bf16.mxu0 %v1962_v12  ;;  %2813 = vmatprep.mubr.bf16.mxu0 %v5287_v5  ;;  %v1788_v12 = vld [vmem:[#allocation2 + $0x2d8] sm:$0xff] }
 0x227   :  { %3059 = vmatprep.mubr.bf16.mxu1 %v5394_v28 }
 0x228   :  { %3030 = vmatpush1.bf16.msra.mxu1 %v1707_v15  ;;  %v2050_v15 = vld [vmem:[#allocation2 + $0xb08] sm:$0xff] }
 0x229   :  { %2784 = vmatpush1.bf16.msra.mxu0 %v1961_v58  ;;  %3031 = vmatprep.subr.bf16.mxu1 %v1716_v25  ;;  %v1787_v58 = vld [vmem:[#allocation2 + $0x2d0] sm:$0xff]  ;;  %v2049_v25 = vld [vmem:[#allocation2 + $0xb00] sm:$0xff] }
 0x22a   :  { %2785 = vmatprep.subr.bf16.mxu0 %v1970_v17  ;;  %v1796_v17 = vld [vmem:[#allocation2 + $0x318] sm:$0xff] }
 0x22c   :  { %3032 = vmatpush1.bf16.msra.mxu1 %v1715_v21  ;;  %v2058_v21 = vld [vmem:[#allocation2 + $0xb48] sm:$0xff] }
 0x22d   :  { %2786 = vmatpush1.bf16.msra.mxu0 %v1969_v9  ;;  %3033 = vmatprep.subr.bf16.mxu1 %v1724_v22  ;;  %v1795_v9 = vld [vmem:[#allocation2 + $0x310] sm:$0xff]  ;;  %v2057_v22 = vld [vmem:[#allocation2 + $0xb40] sm:$0xff] }
 0x22e   :  { %2787 = vmatprep.subr.bf16.mxu0 %v1978_v14  ;;  %v1804_v14 = vld [vmem:[#allocation2 + $0x358] sm:$0xff] }
 0x230   :  { %3034 = vmatpush1.bf16.msra.mxu1 %v1723_v39  ;;  %v2066_v39 = vld [vmem:[#allocation2 + $0xb88] sm:$0xff] }
 0x231   :  { %2788 = vmatpush1.bf16.msra.mxu0 %v1977_v61  ;;  %3035 = vmatprep.subr.bf16.mxu1 %v1732_v62  ;;  %v1803_v61 = vld [vmem:[#allocation2 + $0x350] sm:$0xff]  ;;  %v2065_v62 = vld [vmem:[#allocation2 + $0xb80] sm:$0xff] }
 0x232   :  { %2789 = vmatprep.subr.bf16.mxu0 %v1986_v56  ;;  %v1812_v56 = vld [vmem:[#allocation2 + $0x398] sm:$0xff] }
 0x234   :  { %3036 = vmatpush1.bf16.msra.mxu1 %v1731_v49  ;;  %v2074_v49 = vld [vmem:[#allocation2 + $0xbc8] sm:$0xff] }
 0x235   :  { %2790 = vmatpush1.bf16.msra.mxu0 %v1985_v42  ;;  %3037 = vmatprep.subr.bf16.mxu1 %v1740_v47  ;;  %v1811_v42 = vld [vmem:[#allocation2 + $0x390] sm:$0xff]  ;;  %v2073_v47 = vld [vmem:[#allocation2 + $0xbc0] sm:$0xff] }
 0x236   :  { %2791 = vmatprep.subr.bf16.mxu0 %v1994_v51  ;;  %v1820_v51 = vld [vmem:[#allocation2 + $0x3d8] sm:$0xff] }
 0x238   :  { %3038 = vmatpush1.bf16.msra.mxu1 %v1739_v59  ;;  %v2082_v59 = vld [vmem:[#allocation2 + $0xc08] sm:$0xff] }
 0x239   :  { %2792 = vmatpush1.bf16.msra.mxu0 %v1993_v4  ;;  %3039 = vmatprep.subr.bf16.mxu1 %v1748_v60  ;;  %v1819_v4 = vld [vmem:[#allocation2 + $0x3d0] sm:$0xff]  ;;  %v2081_v60 = vld [vmem:[#allocation2 + $0xc00] sm:$0xff] }
 0x23a   :  { %2793 = vmatprep.subr.bf16.mxu0 %v2002_v29  ;;  %v1828_v29 = vld [vmem:[#allocation2 + $0x418] sm:$0xff] }
 0x23c   :  { %3040 = vmatpush1.bf16.msra.mxu1 %v1747_v33  ;;  %v2090_v33 = vld [vmem:[#allocation2 + $0xc48] sm:$0xff] }
 0x23d   :  { %2794 = vmatpush1.bf16.msra.mxu0 %v2001_v32  ;;  %3041 = vmatprep.subr.bf16.mxu1 %v1756_v41  ;;  %v1827_v32 = vld [vmem:[#allocation2 + $0x410] sm:$0xff]  ;;  %v2089_v41 = vld [vmem:[#allocation2 + $0xc40] sm:$0xff] }
 0x23e   :  { %2795 = vmatprep.subr.bf16.mxu0 %v2010_v34  ;;  %v1836_v34 = vld [vmem:[#allocation2 + $0x458] sm:$0xff] }
 0x240   :  { %3042 = vmatpush1.bf16.msra.mxu1 %v1755_v10  ;;  %v2098_v10 = vld [vmem:[#allocation2 + $0xc88] sm:$0xff] }
 0x241   :  { %2796 = vmatpush1.bf16.msra.mxu0 %v2009_v1  ;;  %3043 = vmatprep.subr.bf16.mxu1 %v1764_v46  ;;  %v1835_v1 = vld [vmem:[#allocation2 + $0x450] sm:$0xff]  ;;  %v2097_v46 = vld [vmem:[#allocation2 + $0xc80] sm:$0xff] }
 0x242   :  { %2797 = vmatprep.subr.bf16.mxu0 %v2018_v45  ;;  %v1844_v45 = vld [vmem:[#allocation2 + $0x498] sm:$0xff] }
 0x244   :  { %3044 = vmatpush1.bf16.msra.mxu1 %v1763_v8  ;;  %v2106_v8 = vld [vmem:[#allocation2 + $0xcc8] sm:$0xff] }
 0x245   :  { %2798 = vmatpush1.bf16.msra.mxu0 %v2017_v48  ;;  %3045 = vmatprep.subr.bf16.mxu1 %v1772_v52  ;;  %v1843_v48 = vld [vmem:[#allocation2 + $0x490] sm:$0xff]  ;;  %v2105_v52 = vld [vmem:[#allocation2 + $0xcc0] sm:$0xff] }
 0x246   :  { %2799 = vmatprep.subr.bf16.mxu0 %v2026_v53  ;;  %v1852_v53 = vld [vmem:[#allocation2 + $0x4d8] sm:$0xff] }
 0x248   :  { %3046 = vmatpush1.bf16.msra.mxu1 %v1771_v63  ;;  %v2114_v63 = vld [vmem:[#allocation2 + $0xd08] sm:$0xff] }
 0x249   :  { %2800 = vmatpush1.bf16.msra.mxu0 %v2025_v57  ;;  %3047 = vmatprep.subr.bf16.mxu1 %v1780_v50  ;;  %v1851_v57 = vld [vmem:[#allocation2 + $0x4d0] sm:$0xff]  ;;  %v2113_v50 = vld [vmem:[#allocation2 + $0xd00] sm:$0xff] }
 0x24a   :  { %2801 = vmatprep.subr.bf16.mxu0 %v2034_v31  ;;  %v1860_v31 = vld [vmem:[#allocation2 + $0x518] sm:$0xff] }
 0x24c   :  { %3048 = vmatpush1.bf16.msra.mxu1 %v1779_v3  ;;  %v2122_v3 = vld [vmem:[#allocation2 + $0xd48] sm:$0xff] }
 0x24d   :  { %2802 = vmatpush1.bf16.msra.mxu0 %v2033_v54  ;;  %3049 = vmatprep.subr.bf16.mxu1 %v1788_v12  ;;  %v1859_v54 = vld [vmem:[#allocation2 + $0x510] sm:$0xff]  ;;  %v2121_v12 = vld [vmem:[#allocation2 + $0xd40] sm:$0xff] }
 0x24e   :  { %2803 = vmatprep.subr.bf16.mxu0 %v2042_v23  ;;  %v1868_v23 = vld [vmem:[#allocation2 + $0x558] sm:$0xff] }
 0x250   :  { %3050 = vmatpush1.bf16.msra.mxu1 %v1787_v58  ;;  %v2130_v58 = vld [vmem:[#allocation2 + $0xd88] sm:$0xff] }
 0x251   :  { %2804 = vmatpush1.bf16.msra.mxu0 %v2041_v13  ;;  %3051 = vmatprep.subr.bf16.mxu1 %v1796_v17  ;;  %v1867_v13 = vld [vmem:[#allocation2 + $0x550] sm:$0xff]  ;;  %v2129_v17 = vld [vmem:[#allocation2 + $0xd80] sm:$0xff] }
 0x252   :  { %2805 = vmatprep.subr.bf16.mxu0 %v2050_v15  ;;  %v1876_v15 = vld [vmem:[#allocation2 + $0x598] sm:$0xff] }
 0x254   :  { %3052 = vmatpush1.bf16.msra.mxu1 %v1795_v9  ;;  %v2138_v9 = vld [vmem:[#allocation2 + $0xdc8] sm:$0xff] }
 0x255   :  { %2806 = vmatpush1.bf16.msra.mxu0 %v2049_v25  ;;  %3053 = vmatprep.subr.bf16.mxu1 %v1804_v14  ;;  %v1875_v25 = vld [vmem:[#allocation2 + $0x590] sm:$0xff]  ;;  %v2137_v14 = vld [vmem:[#allocation2 + $0xdc0] sm:$0xff] }
 0x256   :  { %2807 = vmatprep.subr.bf16.mxu0 %v2058_v21  ;;  %v1884_v21 = vld [vmem:[#allocation2 + $0x5d8] sm:$0xff] }
 0x258   :  { %3054 = vmatpush1.bf16.msra.mxu1 %v1803_v61  ;;  %v2146_v61 = vld [vmem:[#allocation2 + $0xe08] sm:$0xff] }
 0x259   :  { %2808 = vmatpush1.bf16.msra.mxu0 %v2057_v22  ;;  %3055 = vmatprep.subr.bf16.mxu1 %v1812_v56  ;;  %v1883_v22 = vld [vmem:[#allocation2 + $0x5d0] sm:$0xff]  ;;  %v2145_v56 = vld [vmem:[#allocation2 + $0xe00] sm:$0xff] }
 0x25a   :  { %2809 = vmatprep.subr.bf16.mxu0 %v2066_v39  ;;  %v1892_v39 = vld [vmem:[#allocation2 + $0x618] sm:$0xff] }
 0x25c   :  { %3056 = vmatpush1.bf16.msra.mxu1 %v1811_v42  ;;  %v2154_v42 = vld [vmem:[#allocation2 + $0xe48] sm:$0xff] }
 0x25d   :  { %2810 = vmatpush1.bf16.msra.mxu0 %v2065_v62  ;;  %3057 = vmatprep.subr.bf16.mxu1 %v1820_v51  ;;  %v1891_v62 = vld [vmem:[#allocation2 + $0x610] sm:$0xff]  ;;  %v2153_v51 = vld [vmem:[#allocation2 + $0xe40] sm:$0xff] }
 0x25e   :  { %2811 = vmatprep.subr.bf16.mxu0 %v2074_v49  ;;  %v1900_v49 = vld [vmem:[#allocation2 + $0x658] sm:$0xff] }
 0x260   :  { %3058 = vmatpush1.bf16.msra.mxu1 %v1819_v4  ;;  %v2162_v4 = vld [vmem:[#allocation2 + $0xe88] sm:$0xff] }
 0x261   :  { %2812 = vmatpush1.bf16.msra.mxu0 %v2073_v47  ;;  %3068 = vmatprep.subr.bf16.mxu1 %v1828_v29  ;;  %v1899_v47 = vld [vmem:[#allocation2 + $0x650] sm:$0xff]  ;;  %v2161_v29 = vld [vmem:[#allocation2 + $0xe80] sm:$0xff] }
 0x262   :  { %2822 = vmatprep.subr.bf16.mxu0 %v2082_v59  ;;  %v1908_v59 = vld [vmem:[#allocation2 + $0x698] sm:$0xff] }
 0x263   :  { %3060 = vmatmul.mubr.bf16.vlgmr.msra.gmra.mrb[40].mxu1 %v5285_v2 }
 0x264   :  { %2814 = vmatmul.mubr.bf16.vlgmr.msra.gmra.mrb[24].mxu0 %v5477_v26  ;;  %3069 = vmatpush1.bf16.msra.mxu1 %v1827_v32  ;;  %v2170_v32 = vld [vmem:[#allocation2 + $0xec8] sm:$0xff] }
 0x265   :  { %2823 = vmatpush1.bf16.msra.mxu0 %v2081_v60  ;;  %3070 = vmatprep.subr.bf16.mxu1 %v1836_v34  ;;  %v1907_v60 = vld [vmem:[#allocation2 + $0x690] sm:$0xff]  ;;  %v2169_v34 = vld [vmem:[#allocation2 + $0xec0] sm:$0xff] }
 0x266   :  { %2824 = vmatprep.subr.bf16.mxu0 %v2090_v33  ;;  %2854 = vmatprep.mubr.bf16.mxu0 %v5400_v43  ;;  %v1916_v33 = vld [vmem:[#allocation2 + $0x6d8] sm:$0xff] }
 0x267   :  { %3100 = vmatprep.mubr.bf16.mxu1 %v5452_v35 }
 0x268   :  { %3071 = vmatpush1.bf16.msra.mxu1 %v1835_v1  ;;  %v2178_v1 = vld [vmem:[#allocation2 + $0xf08] sm:$0xff] }
 0x269   :  { %2825 = vmatpush1.bf16.msra.mxu0 %v2089_v41  ;;  %3072 = vmatprep.subr.bf16.mxu1 %v1844_v45  ;;  %v1915_v41 = vld [vmem:[#allocation2 + $0x6d0] sm:$0xff]  ;;  %v2177_v45 = vld [vmem:[#allocation2 + $0xf00] sm:$0xff] }
 0x26a   :  { %2826 = vmatprep.subr.bf16.mxu0 %v2098_v10  ;;  %v1924_v10 = vld [vmem:[#allocation2 + $0x718] sm:$0xff] }
 0x26c   :  { %3073 = vmatpush1.bf16.msra.mxu1 %v1843_v48  ;;  %v2186_v48 = vld [vmem:[#allocation2 + $0xf48] sm:$0xff] }
 0x26d   :  { %2827 = vmatpush1.bf16.msra.mxu0 %v2097_v46  ;;  %3074 = vmatprep.subr.bf16.mxu1 %v1852_v53  ;;  %v1923_v46 = vld [vmem:[#allocation2 + $0x710] sm:$0xff]  ;;  %v2185_v53 = vld [vmem:[#allocation2 + $0xf40] sm:$0xff] }
 0x26e   :  { %2828 = vmatprep.subr.bf16.mxu0 %v2106_v8  ;;  %v1932_v8 = vld [vmem:[#allocation2 + $0x758] sm:$0xff] }
 0x270   :  { %3075 = vmatpush1.bf16.msra.mxu1 %v1851_v57  ;;  %v2194_v57 = vld [vmem:[#allocation2 + $0xf88] sm:$0xff] }
 0x271   :  { %2829 = vmatpush1.bf16.msra.mxu0 %v2105_v52  ;;  %3076 = vmatprep.subr.bf16.mxu1 %v1860_v31  ;;  %v1931_v52 = vld [vmem:[#allocation2 + $0x750] sm:$0xff]  ;;  %v2193_v31 = vld [vmem:[#allocation2 + $0xf80] sm:$0xff] }
 0x272   :  { %2830 = vmatprep.subr.bf16.mxu0 %v2114_v63  ;;  %v1940_v63 = vld [vmem:[#allocation2 + $0x798] sm:$0xff] }
 0x274   :  { %3077 = vmatpush1.bf16.msra.mxu1 %v1859_v54  ;;  %v2202_v54 = vld [vmem:[#allocation2 + $0xfc8] sm:$0xff] }
 0x275   :  { %2831 = vmatpush1.bf16.msra.mxu0 %v2113_v50  ;;  %3078 = vmatprep.subr.bf16.mxu1 %v1868_v23  ;;  %v1939_v50 = vld [vmem:[#allocation2 + $0x790] sm:$0xff]  ;;  %v2201_v23 = vld [vmem:[#allocation2 + $0xfc0] sm:$0xff] }
 0x276   :  { %2832 = vmatprep.subr.bf16.mxu0 %v2122_v3  ;;  %v1948_v3 = vld [vmem:[#allocation2 + $0x7d8] sm:$0xff] }
 0x278   :  { %3079 = vmatpush1.bf16.msra.mxu1 %v1867_v13  ;;  %v2210_v13 = vld [vmem:[#allocation2 + $0x1008] sm:$0xff] }
 0x279   :  { %2833 = vmatpush1.bf16.msra.mxu0 %v2121_v12  ;;  %3080 = vmatprep.subr.bf16.mxu1 %v1876_v15  ;;  %v1947_v12 = vld [vmem:[#allocation2 + $0x7d0] sm:$0xff]  ;;  %v2209_v15 = vld [vmem:[#allocation2 + $0x1000] sm:$0xff] }
 0x27a   :  { %2834 = vmatprep.subr.bf16.mxu0 %v2130_v58  ;;  %v1956_v58 = vld [vmem:[#allocation2 + $0x818] sm:$0xff] }
 0x27c   :  { %3081 = vmatpush1.bf16.msra.mxu1 %v1875_v25  ;;  %v2218_v25 = vld [vmem:[#allocation2 + $0x1048] sm:$0xff] }
 0x27d   :  { %2835 = vmatpush1.bf16.msra.mxu0 %v2129_v17  ;;  %3082 = vmatprep.subr.bf16.mxu1 %v1884_v21  ;;  %v1955_v17 = vld [vmem:[#allocation2 + $0x810] sm:$0xff]  ;;  %v2217_v21 = vld [vmem:[#allocation2 + $0x1040] sm:$0xff] }
 0x27e   :  { %2836 = vmatprep.subr.bf16.mxu0 %v2138_v9  ;;  %v1964_v9 = vld [vmem:[#allocation2 + $0x858] sm:$0xff] }
 0x280   :  { %3083 = vmatpush1.bf16.msra.mxu1 %v1883_v22  ;;  %v2226_v22 = vld [vmem:[#allocation2 + $0x1088] sm:$0xff] }
 0x281   :  { %2837 = vmatpush1.bf16.msra.mxu0 %v2137_v14  ;;  %3084 = vmatprep.subr.bf16.mxu1 %v1892_v39  ;;  %v1963_v14 = vld [vmem:[#allocation2 + $0x850] sm:$0xff]  ;;  %v2225_v39 = vld [vmem:[#allocation2 + $0x1080] sm:$0xff] }
 0x282   :  { %2838 = vmatprep.subr.bf16.mxu0 %v2146_v61  ;;  %v1972_v61 = vld [vmem:[#allocation2 + $0x898] sm:$0xff] }
 0x284   :  { %3085 = vmatpush1.bf16.msra.mxu1 %v1891_v62  ;;  %v2234_v62 = vld [vmem:[#allocation2 + $0x10c8] sm:$0xff] }
 0x285   :  { %2839 = vmatpush1.bf16.msra.mxu0 %v2145_v56  ;;  %3086 = vmatprep.subr.bf16.mxu1 %v1900_v49  ;;  %v1971_v56 = vld [vmem:[#allocation2 + $0x890] sm:$0xff]  ;;  %v2233_v49 = vld [vmem:[#allocation2 + $0x10c0] sm:$0xff] }
 0x286   :  { %2840 = vmatprep.subr.bf16.mxu0 %v2154_v42  ;;  %v1980_v42 = vld [vmem:[#allocation2 + $0x8d8] sm:$0xff] }
 0x288   :  { %3087 = vmatpush1.bf16.msra.mxu1 %v1899_v47  ;;  %v2242_v47 = vld [vmem:[#allocation2 + $0x1108] sm:$0xff] }
 0x289   :  { %2841 = vmatpush1.bf16.msra.mxu0 %v2153_v51  ;;  %3088 = vmatprep.subr.bf16.mxu1 %v1908_v59  ;;  %v1979_v51 = vld [vmem:[#allocation2 + $0x8d0] sm:$0xff]  ;;  %v2241_v59 = vld [vmem:[#allocation2 + $0x1100] sm:$0xff] }
 0x28a   :  { %2842 = vmatprep.subr.bf16.mxu0 %v2162_v4  ;;  %v1988_v4 = vld [vmem:[#allocation2 + $0x918] sm:$0xff] }
 0x28c   :  { %3089 = vmatpush1.bf16.msra.mxu1 %v1907_v60  ;;  %v2250_v60 = vld [vmem:[#allocation2 + $0x1148] sm:$0xff] }
 0x28d   :  { %2843 = vmatpush1.bf16.msra.mxu0 %v2161_v29  ;;  %3090 = vmatprep.subr.bf16.mxu1 %v1916_v33  ;;  %v1987_v29 = vld [vmem:[#allocation2 + $0x910] sm:$0xff]  ;;  %v2249_v33 = vld [vmem:[#allocation2 + $0x1140] sm:$0xff] }
 0x28e   :  { %2844 = vmatprep.subr.bf16.mxu0 %v2170_v32  ;;  %v1996_v32 = vld [vmem:[#allocation2 + $0x958] sm:$0xff] }
 0x290   :  { %3091 = vmatpush1.bf16.msra.mxu1 %v1915_v41  ;;  %v2258_v41 = vld [vmem:[#allocation2 + $0x1188] sm:$0xff] }
 0x291   :  { %2845 = vmatpush1.bf16.msra.mxu0 %v2169_v34  ;;  %3092 = vmatprep.subr.bf16.mxu1 %v1924_v10  ;;  %v1995_v34 = vld [vmem:[#allocation2 + $0x950] sm:$0xff]  ;;  %v2257_v10 = vld [vmem:[#allocation2 + $0x1180] sm:$0xff] }
 0x292   :  { %2846 = vmatprep.subr.bf16.mxu0 %v2178_v1  ;;  %v2004_v1 = vld [vmem:[#allocation2 + $0x998] sm:$0xff] }
 0x294   :  { %3093 = vmatpush1.bf16.msra.mxu1 %v1923_v46  ;;  %v2266_v46 = vld [vmem:[#allocation2 + $0x11c8] sm:$0xff] }
 0x295   :  { %2847 = vmatpush1.bf16.msra.mxu0 %v2177_v45  ;;  %3094 = vmatprep.subr.bf16.mxu1 %v1932_v8  ;;  %v2003_v45 = vld [vmem:[#allocation2 + $0x990] sm:$0xff]  ;;  %v2265_v8 = vld [vmem:[#allocation2 + $0x11c0] sm:$0xff] }
 0x296   :  { %2848 = vmatprep.subr.bf16.mxu0 %v2186_v48  ;;  %v2012_v48 = vld [vmem:[#allocation2 + $0x9d8] sm:$0xff] }
 0x298   :  { %3095 = vmatpush1.bf16.msra.mxu1 %v1931_v52  ;;  %v2274_v52 = vld [vmem:[#allocation2 + $0x1208] sm:$0xff] }
 0x299   :  { %2849 = vmatpush1.bf16.msra.mxu0 %v2185_v53  ;;  %3096 = vmatprep.subr.bf16.mxu1 %v1940_v63  ;;  %v2011_v53 = vld [vmem:[#allocation2 + $0x9d0] sm:$0xff]  ;;  %v2273_v63 = vld [vmem:[#allocation2 + $0x1200] sm:$0xff] }
 0x29a   :  { %2850 = vmatprep.subr.bf16.mxu0 %v2194_v57  ;;  %v2020_v57 = vld [vmem:[#allocation2 + $0xa18] sm:$0xff] }
 0x29c   :  { %3097 = vmatpush1.bf16.msra.mxu1 %v1939_v50  ;;  %v2282_v50 = vld [vmem:[#allocation2 + $0x1248] sm:$0xff] }
 0x29d   :  { %2851 = vmatpush1.bf16.msra.mxu0 %v2193_v31  ;;  %3098 = vmatprep.subr.bf16.mxu1 %v1948_v3  ;;  %v2019_v31 = vld [vmem:[#allocation2 + $0xa10] sm:$0xff]  ;;  %v2281_v3 = vld [vmem:[#allocation2 + $0x1240] sm:$0xff] }
 0x29e   :  { %2852 = vmatprep.subr.bf16.mxu0 %v2202_v54  ;;  %v2028_v54 = vld [vmem:[#allocation2 + $0xa58] sm:$0xff] }
 0x2a0   :  { %3099 = vmatpush1.bf16.msra.mxu1 %v1947_v12  ;;  %v2290_v12 = vld [vmem:[#allocation2 + $0x1288] sm:$0xff] }
 0x2a1   :  { %2853 = vmatpush1.bf16.msra.mxu0 %v2201_v23  ;;  %3109 = vmatprep.subr.bf16.mxu1 %v1956_v58  ;;  %v2027_v23 = vld [vmem:[#allocation2 + $0xa50] sm:$0xff]  ;;  %v2289_v58 = vld [vmem:[#allocation2 + $0x1280] sm:$0xff] }
 0x2a2   :  { %2863 = vmatprep.subr.bf16.mxu0 %v2210_v13  ;;  %v2036_v13 = vld [vmem:[#allocation2 + $0xa98] sm:$0xff] }
 0x2a3   :  { %3101 = vmatmul.mubr.bf16.vlgmr.msra.gmra.mrb[40].mxu1 %v5396_v30 }
 0x2a4   :  { %2855 = vmatmul.mubr.bf16.vlgmr.msra.gmra.mrb[24].mxu0 %v5398_v36  ;;  %3110 = vmatpush1.bf16.msra.mxu1 %v1955_v17  ;;  %v2298_v17 = vld [vmem:[#allocation2 + $0x12c8] sm:$0xff] }
 0x2a5   :  { %2864 = vmatpush1.bf16.msra.mxu0 %v2209_v15  ;;  %3111 = vmatprep.subr.bf16.mxu1 %v1964_v9  ;;  %v2035_v15 = vld [vmem:[#allocation2 + $0xa90] sm:$0xff]  ;;  %v2297_v9 = vld [vmem:[#allocation2 + $0x12c0] sm:$0xff] }
 0x2a6   :  { %2865 = vmatprep.subr.bf16.mxu0 %v2218_v25  ;;  %2895 = vmatprep.mubr.bf16.mxu0 %v5479_v27  ;;  %v2044_v25 = vld [vmem:[#allocation2 + $0xad8] sm:$0xff] }
 0x2a7   :  { %3141 = vmatprep.mubr.bf16.mxu1 %v5287_v5 }
 0x2a8   :  { %3112 = vmatpush1.bf16.msra.mxu1 %v1963_v14  ;;  %v2306_v14 = vld [vmem:[#allocation2 + $0x1308] sm:$0xff] }
 0x2a9   :  { %2866 = vmatpush1.bf16.msra.mxu0 %v2217_v21  ;;  %3113 = vmatprep.subr.bf16.mxu1 %v1972_v61  ;;  %v2043_v21 = vld [vmem:[#allocation2 + $0xad0] sm:$0xff]  ;;  %v2305_v61 = vld [vmem:[#allocation2 + $0x1300] sm:$0xff] }
 0x2aa   :  { %2867 = vmatprep.subr.bf16.mxu0 %v2226_v22  ;;  %v2052_v22 = vld [vmem:[#allocation2 + $0xb18] sm:$0xff] }
 0x2ac   :  { %3114 = vmatpush1.bf16.msra.mxu1 %v1971_v56  ;;  %v2314_v56 = vld [vmem:[#allocation2 + $0x1348] sm:$0xff] }
 0x2ad   :  { %2868 = vmatpush1.bf16.msra.mxu0 %v2225_v39  ;;  %3115 = vmatprep.subr.bf16.mxu1 %v1980_v42  ;;  %v2051_v39 = vld [vmem:[#allocation2 + $0xb10] sm:$0xff]  ;;  %v2313_v42 = vld [vmem:[#allocation2 + $0x1340] sm:$0xff] }
 0x2ae   :  { %2869 = vmatprep.subr.bf16.mxu0 %v2234_v62  ;;  %v2060_v62 = vld [vmem:[#allocation2 + $0xb58] sm:$0xff] }
 0x2b0   :  { %3116 = vmatpush1.bf16.msra.mxu1 %v1979_v51  ;;  %v2322_v51 = vld [vmem:[#allocation2 + $0x1388] sm:$0xff] }
 0x2b1   :  { %2870 = vmatpush1.bf16.msra.mxu0 %v2233_v49  ;;  %3117 = vmatprep.subr.bf16.mxu1 %v1988_v4  ;;  %v2059_v49 = vld [vmem:[#allocation2 + $0xb50] sm:$0xff]  ;;  %v2321_v4 = vld [vmem:[#allocation2 + $0x1380] sm:$0xff] }
 0x2b2   :  { %2871 = vmatprep.subr.bf16.mxu0 %v2242_v47  ;;  %v2068_v47 = vld [vmem:[#allocation2 + $0xb98] sm:$0xff] }
 0x2b4   :  { %3118 = vmatpush1.bf16.msra.mxu1 %v1987_v29  ;;  %v2330_v29 = vld [vmem:[#allocation2 + $0x13c8] sm:$0xff] }
 0x2b5   :  { %2872 = vmatpush1.bf16.msra.mxu0 %v2241_v59  ;;  %3119 = vmatprep.subr.bf16.mxu1 %v1996_v32  ;;  %v2067_v59 = vld [vmem:[#allocation2 + $0xb90] sm:$0xff]  ;;  %v2329_v32 = vld [vmem:[#allocation2 + $0x13c0] sm:$0xff] }
 0x2b6   :  { %2873 = vmatprep.subr.bf16.mxu0 %v2250_v60  ;;  %v2076_v60 = vld [vmem:[#allocation2 + $0xbd8] sm:$0xff] }
 0x2b8   :  { %3120 = vmatpush1.bf16.msra.mxu1 %v1995_v34  ;;  %v2338_v34 = vld [vmem:[#allocation2 + $0x1408] sm:$0xff] }
 0x2b9   :  { %2874 = vmatpush1.bf16.msra.mxu0 %v2249_v33  ;;  %3121 = vmatprep.subr.bf16.mxu1 %v2004_v1  ;;  %v2075_v33 = vld [vmem:[#allocation2 + $0xbd0] sm:$0xff]  ;;  %v2337_v1 = vld [vmem:[#allocation2 + $0x1400] sm:$0xff] }
 0x2ba   :  { %2875 = vmatprep.subr.bf16.mxu0 %v2258_v41  ;;  %v2084_v41 = vld [vmem:[#allocation2 + $0xc18] sm:$0xff] }
 0x2bc   :  { %3122 = vmatpush1.bf16.msra.mxu1 %v2003_v45  ;;  %v2346_v45 = vld [vmem:[#allocation2 + $0x1448] sm:$0xff] }
 0x2bd   :  { %2876 = vmatpush1.bf16.msra.mxu0 %v2257_v10  ;;  %3123 = vmatprep.subr.bf16.mxu1 %v2012_v48  ;;  %v2083_v10 = vld [vmem:[#allocation2 + $0xc10] sm:$0xff]  ;;  %v2345_v48 = vld [vmem:[#allocation2 + $0x1440] sm:$0xff] }
 0x2be   :  { %2877 = vmatprep.subr.bf16.mxu0 %v2266_v46  ;;  %v2092_v46 = vld [vmem:[#allocation2 + $0xc58] sm:$0xff] }
 0x2c0   :  { %3124 = vmatpush1.bf16.msra.mxu1 %v2011_v53  ;;  %v2354_v53 = vld [vmem:[#allocation2 + $0x1488] sm:$0xff] }
 0x2c1   :  { %2878 = vmatpush1.bf16.msra.mxu0 %v2265_v8  ;;  %3125 = vmatprep.subr.bf16.mxu1 %v2020_v57  ;;  %v2091_v8 = vld [vmem:[#allocation2 + $0xc50] sm:$0xff]  ;;  %v2353_v57 = vld [vmem:[#allocation2 + $0x1480] sm:$0xff] }
 0x2c2   :  { %2879 = vmatprep.subr.bf16.mxu0 %v2274_v52  ;;  %v2100_v52 = vld [vmem:[#allocation2 + $0xc98] sm:$0xff] }
 0x2c4   :  { %3126 = vmatpush1.bf16.msra.mxu1 %v2019_v31  ;;  %v2362_v31 = vld [vmem:[#allocation2 + $0x14c8] sm:$0xff] }
 0x2c5   :  { %2880 = vmatpush1.bf16.msra.mxu0 %v2273_v63  ;;  %3127 = vmatprep.subr.bf16.mxu1 %v2028_v54  ;;  %v2099_v63 = vld [vmem:[#allocation2 + $0xc90] sm:$0xff]  ;;  %v2361_v54 = vld [vmem:[#allocation2 + $0x14c0] sm:$0xff] }
 0x2c6   :  { %2881 = vmatprep.subr.bf16.mxu0 %v2282_v50  ;;  %v2108_v50 = vld [vmem:[#allocation2 + $0xcd8] sm:$0xff] }
 0x2c8   :  { %3128 = vmatpush1.bf16.msra.mxu1 %v2027_v23  ;;  %v2370_v23 = vld [vmem:[#allocation2 + $0x1508] sm:$0xff] }
 0x2c9   :  { %2882 = vmatpush1.bf16.msra.mxu0 %v2281_v3  ;;  %3129 = vmatprep.subr.bf16.mxu1 %v2036_v13  ;;  %v2107_v3 = vld [vmem:[#allocation2 + $0xcd0] sm:$0xff]  ;;  %v2369_v13 = vld [vmem:[#allocation2 + $0x1500] sm:$0xff] }
 0x2ca   :  { %2883 = vmatprep.subr.bf16.mxu0 %v2290_v12  ;;  %v2116_v12 = vld [vmem:[#allocation2 + $0xd18] sm:$0xff] }
 0x2cc   :  { %3130 = vmatpush1.bf16.msra.mxu1 %v2035_v15  ;;  %v2378_v15 = vld [vmem:[#allocation2 + $0x1548] sm:$0xff] }
 0x2cd   :  { %2884 = vmatpush1.bf16.msra.mxu0 %v2289_v58  ;;  %3131 = vmatprep.subr.bf16.mxu1 %v2044_v25  ;;  %v2115_v58 = vld [vmem:[#allocation2 + $0xd10] sm:$0xff]  ;;  %v2377_v25 = vld [vmem:[#allocation2 + $0x1540] sm:$0xff] }
 0x2ce   :  { %2885 = vmatprep.subr.bf16.mxu0 %v2298_v17  ;;  %v2124_v17 = vld [vmem:[#allocation2 + $0xd58] sm:$0xff] }
 0x2d0   :  { %3132 = vmatpush1.bf16.msra.mxu1 %v2043_v21 }
 0x2d1   :  { %2886 = vmatpush1.bf16.msra.mxu0 %v2297_v9  ;;  %3133 = vmatprep.subr.bf16.mxu1 %v2052_v22  ;;  %v2123_v9 = vld [vmem:[#allocation2 + $0xd50] sm:$0xff]  ;;  %v2132_v22 = vld [vmem:[#allocation2 + $0xd98] sm:$0xff] }
 0x2d2   :  { %2887 = vmatprep.subr.bf16.mxu0 %v2306_v14  ;;  %v2386_v14 = vld [vmem:[#allocation2 + $0x1588] sm:$0xff] }
 0x2d4   :  { %3134 = vmatpush1.bf16.msra.mxu1 %v2051_v39 }
 0x2d5   :  { %2888 = vmatpush1.bf16.msra.mxu0 %v2305_v61  ;;  %3135 = vmatprep.subr.bf16.mxu1 %v2060_v62  ;;  %v2385_v62 = vld [vmem:[#allocation2 + $0x1580] sm:$0xff] }
 0x2d6   :  { %2889 = vmatprep.subr.bf16.mxu0 %v2314_v56 }
 0x2d8   :  { %3136 = vmatpush1.bf16.msra.mxu1 %v2059_v49  ;;  %v2394_v49 = vld [vmem:[#allocation2 + $0x15c8] sm:$0xff] }
 0x2d9   :  { %2890 = vmatpush1.bf16.msra.mxu0 %v2313_v42  ;;  %3137 = vmatprep.subr.bf16.mxu1 %v2068_v47  ;;  %v2131_v42 = vld [vmem:[#allocation2 + $0xd90] sm:$0xff]  ;;  %v2393_v47 = vld [vmem:[#allocation2 + $0x15c0] sm:$0xff] }
 0x2da   :  { %2891 = vmatprep.subr.bf16.mxu0 %v2322_v51  ;;  %v2140_v51 = vld [vmem:[#allocation2 + $0xdd8] sm:$0xff] }
 0x2dc   :  { %3138 = vmatpush1.bf16.msra.mxu1 %v2067_v59  ;;  %v2402_v59 = vld [vmem:[#allocation2 + $0x1608] sm:$0xff] }
 0x2dd   :  { %2892 = vmatpush1.bf16.msra.mxu0 %v2321_v4  ;;  %3139 = vmatprep.subr.bf16.mxu1 %v2076_v60  ;;  %v2139_v4 = vld [vmem:[#allocation2 + $0xdd0] sm:$0xff]  ;;  %v2401_v60 = vld [vmem:[#allocation2 + $0x1600] sm:$0xff] }
 0x2de   :  { %2893 = vmatprep.subr.bf16.mxu0 %v2330_v29  ;;  %v2148_v29 = vld [vmem:[#allocation2 + $0xe18] sm:$0xff] }
 0x2e0   :  { %3140 = vmatpush1.bf16.msra.mxu1 %v2075_v33  ;;  %v2410_v33 = vld [vmem:[#allocation2 + $0x1648] sm:$0xff] }
 0x2e1   :  { %2894 = vmatpush1.bf16.msra.mxu0 %v2329_v32  ;;  %3150 = vmatprep.subr.bf16.mxu1 %v2084_v41  ;;  %v2147_v32 = vld [vmem:[#allocation2 + $0xe10] sm:$0xff]  ;;  %v2409_v41 = vld [vmem:[#allocation2 + $0x1640] sm:$0xff] }
 0x2e2   :  { %2904 = vmatprep.subr.bf16.mxu0 %v2338_v34  ;;  %v2156_v34 = vld [vmem:[#allocation2 + $0xe58] sm:$0xff] }
 0x2e3   :  { %3142 = vmatmul.mubr.bf16.vlgmr.msra.gmra.mrb[40].mxu1 %v5477_v26 }
 0x2e4   :  { %2896 = vmatmul.mubr.bf16.vlgmr.msra.gmra.mrb[24].mxu0 %v5456_v18  ;;  %3151 = vmatpush1.bf16.msra.mxu1 %v2083_v10  ;;  %v2418_v10 = vld [vmem:[#allocation2 + $0x1688] sm:$0xff] }
 0x2e5   :  { %2905 = vmatpush1.bf16.msra.mxu0 %v2337_v1  ;;  %3152 = vmatprep.subr.bf16.mxu1 %v2092_v46  ;;  %v2155_v1 = vld [vmem:[#allocation2 + $0xe50] sm:$0xff]  ;;  %v2417_v46 = vld [vmem:[#allocation2 + $0x1680] sm:$0xff] }
 0x2e6   :  { %2906 = vmatprep.subr.bf16.mxu0 %v2346_v45  ;;  %2936 = vmatprep.mubr.bf16.mxu0 %v5404_v37  ;;  %v2164_v45 = vld [vmem:[#allocation2 + $0xe98] sm:$0xff] }
 0x2e7   :  { %3182 = vmatprep.mubr.bf16.mxu1 %v5400_v43 }
 0x2e8   :  { %3153 = vmatpush1.bf16.msra.mxu1 %v2091_v8  ;;  %v2426_v8 = vld [vmem:[#allocation2 + $0x16c8] sm:$0xff] }
 0x2e9   :  { %2907 = vmatpush1.bf16.msra.mxu0 %v2345_v48  ;;  %3154 = vmatprep.subr.bf16.mxu1 %v2100_v52  ;;  %v2163_v48 = vld [vmem:[#allocation2 + $0xe90] sm:$0xff]  ;;  %v2425_v52 = vld [vmem:[#allocation2 + $0x16c0] sm:$0xff] }
 0x2ea   :  { %2908 = vmatprep.subr.bf16.mxu0 %v2354_v53  ;;  %v2172_v53 = vld [vmem:[#allocation2 + $0xed8] sm:$0xff] }
 0x2ec   :  { %3155 = vmatpush1.bf16.msra.mxu1 %v2099_v63  ;;  %v2434_v63 = vld [vmem:[#allocation2 + $0x1708] sm:$0xff] }
 0x2ed   :  { %2909 = vmatpush1.bf16.msra.mxu0 %v2353_v57  ;;  %3156 = vmatprep.subr.bf16.mxu1 %v2108_v50  ;;  %v2171_v57 = vld [vmem:[#allocation2 + $0xed0] sm:$0xff]  ;;  %v2433_v50 = vld [vmem:[#allocation2 + $0x1700] sm:$0xff] }
 0x2ee   :  { %2910 = vmatprep.subr.bf16.mxu0 %v2362_v31  ;;  %v2180_v31 = vld [vmem:[#allocation2 + $0xf18] sm:$0xff] }
 0x2f0   :  { %3157 = vmatpush1.bf16.msra.mxu1 %v2107_v3  ;;  %v2442_v3 = vld [vmem:[#allocation2 + $0x1748] sm:$0xff] }
 0x2f1   :  { %2911 = vmatpush1.bf16.msra.mxu0 %v2361_v54  ;;  %3158 = vmatprep.subr.bf16.mxu1 %v2116_v12  ;;  %v2179_v54 = vld [vmem:[#allocation2 + $0xf10] sm:$0xff]  ;;  %v2441_v12 = vld [vmem:[#allocation2 + $0x1740] sm:$0xff] }
 0x2f2   :  { %2912 = vmatprep.subr.bf16.mxu0 %v2370_v23  ;;  %v2188_v23 = vld [vmem:[#allocation2 + $0xf58] sm:$0xff] }
 0x2f4   :  { %3159 = vmatpush1.bf16.msra.mxu1 %v2115_v58  ;;  %v2450_v58 = vld [vmem:[#allocation2 + $0x1788] sm:$0xff] }
 0x2f5   :  { %2913 = vmatpush1.bf16.msra.mxu0 %v2369_v13  ;;  %3160 = vmatprep.subr.bf16.mxu1 %v2124_v17  ;;  %v2187_v13 = vld [vmem:[#allocation2 + $0xf50] sm:$0xff]  ;;  %v2449_v17 = vld [vmem:[#allocation2 + $0x1780] sm:$0xff] }
 0x2f6   :  { %2914 = vmatprep.subr.bf16.mxu0 %v2378_v15  ;;  %v5501_v21 = vpop.f32.mrb[36].mxu1  ;;  %v2196_v15 = vld [vmem:[#allocation2 + $0xf98] sm:$0xff] }
 0x2f7   :  { %v5503_v61 = vpop.f32.mrb[37].mxu1 }
 0x2f8   :  { %v2737_v39 = vpop.f32.mrb[38].mxu1  ;;  %3161 = vmatpush1.bf16.msra.mxu1 %v2123_v9  ;;  %v2458_v9 = vld [vmem:[#allocation2 + $0x17c8] sm:$0xff] }
 0x2f9   :  { %2915 = vmatpush1.bf16.msra.mxu0 %v2377_v25  ;;  %v2738_v56 = vpop.f32.mrb[39].mxu1  ;;  %3162 = vmatprep.subr.bf16.mxu1 %v2132_v22  ;;  %v2195_v25 = vld [vmem:[#allocation2 + $0xf90] sm:$0xff]  ;;  %v2457_v22 = vld [vmem:[#allocation2 + $0x17c0] sm:$0xff] }
 0x2fa   :  { %2916 = vmatprep.subr.bf16.mxu0 %v2386_v14  ;;  %v2204_v14 = vld [vmem:[#allocation2 + $0xfd8] sm:$0xff]  ;;  %v2203_v39 = vld [vmem:[#allocation2 + $0xfd0] sm:$0xff]  ;;  %v2466_v56 = vld [vmem:[#allocation2 + $0x1808] sm:$0xff] }
 0x2fc   :  { %3163 = vmatpush1.bf16.msra.mxu1 %v2131_v42  ;;  %v2465_v42 = vld [vmem:[#allocation2 + $0x1800] sm:$0xff] }
 0x2fd   :  { %2917 = vmatpush1.bf16.msra.mxu0 %v2385_v62  ;;  %3164 = vmatprep.subr.bf16.mxu1 %v2140_v51  ;;  %v2212_v62 = vld [vmem:[#allocation2 + $0x1018] sm:$0xff]  ;;  %v2474_v51 = vld [vmem:[#allocation2 + $0x1848] sm:$0xff] }
 0x2fe   :  { %2918 = vmatprep.subr.bf16.mxu0 %v2394_v49  ;;  %v2211_v49 = vld [vmem:[#allocation2 + $0x1010] sm:$0xff] }
 0x300   :  { %3165 = vmatpush1.bf16.msra.mxu1 %v2139_v4  ;;  %v2473_v4 = vld [vmem:[#allocation2 + $0x1840] sm:$0xff] }
 0x301   :  { %2919 = vmatpush1.bf16.msra.mxu0 %v2393_v47  ;;  %3166 = vmatprep.subr.bf16.mxu1 %v2148_v29  ;;  %v2220_v47 = vld [vmem:[#allocation2 + $0x1058] sm:$0xff]  ;;  %v2482_v29 = vld [vmem:[#allocation2 + $0x1888] sm:$0xff] }
 0x302   :  { %2920 = vmatprep.subr.bf16.mxu0 %v2402_v59  ;;  %v2219_v59 = vld [vmem:[#allocation2 + $0x1050] sm:$0xff] }
 0x304   :  { %3167 = vmatpush1.bf16.msra.mxu1 %v2147_v32  ;;  %v2481_v32 = vld [vmem:[#allocation2 + $0x1880] sm:$0xff] }
 0x305   :  { %2921 = vmatpush1.bf16.msra.mxu0 %v2401_v60  ;;  %3168 = vmatprep.subr.bf16.mxu1 %v2156_v34  ;;  %v2228_v60 = vld [vmem:[#allocation2 + $0x1098] sm:$0xff]  ;;  %v2490_v34 = vld [vmem:[#allocation2 + $0x18c8] sm:$0xff] }
 0x306   :  { %2922 = vmatprep.subr.bf16.mxu0 %v2410_v33  ;;  %v2227_v33 = vld [vmem:[#allocation2 + $0x1090] sm:$0xff] }
 0x308   :  { %3169 = vmatpush1.bf16.msra.mxu1 %v2155_v1  ;;  %v2489_v1 = vld [vmem:[#allocation2 + $0x18c0] sm:$0xff] }
 0x309   :  { %2923 = vmatpush1.bf16.msra.mxu0 %v2409_v41  ;;  %3170 = vmatprep.subr.bf16.mxu1 %v2164_v45  ;;  %v2236_v41 = vld [vmem:[#allocation2 + $0x10d8] sm:$0xff]  ;;  %v2498_v45 = vld [vmem:[#allocation2 + $0x1908] sm:$0xff] }
 0x30a   :  { %2924 = vmatprep.subr.bf16.mxu0 %v2418_v10  ;;  %v2235_v10 = vld [vmem:[#allocation2 + $0x10d0] sm:$0xff] }
 0x30c   :  { %3171 = vmatpush1.bf16.msra.mxu1 %v2163_v48  ;;  %v2497_v48 = vld [vmem:[#allocation2 + $0x1900] sm:$0xff] }
 0x30d   :  { %2925 = vmatpush1.bf16.msra.mxu0 %v2417_v46  ;;  %3172 = vmatprep.subr.bf16.mxu1 %v2172_v53  ;;  %v2244_v46 = vld [vmem:[#allocation2 + $0x1118] sm:$0xff]  ;;  %v2506_v53 = vld [vmem:[#allocation2 + $0x1948] sm:$0xff] }
 0x30e   :  { %2926 = vmatprep.subr.bf16.mxu0 %v2426_v8  ;;  %v2243_v8 = vld [vmem:[#allocation2 + $0x1110] sm:$0xff] }
 0x310   :  { %3173 = vmatpush1.bf16.msra.mxu1 %v2171_v57  ;;  %v2505_v57 = vld [vmem:[#allocation2 + $0x1940] sm:$0xff] }
 0x311   :  { %2927 = vmatpush1.bf16.msra.mxu0 %v2425_v52  ;;  %3174 = vmatprep.subr.bf16.mxu1 %v2180_v31  ;;  %v2252_v52 = vld [vmem:[#allocation2 + $0x1158] sm:$0xff]  ;;  %v2514_v31 = vld [vmem:[#allocation2 + $0x1988] sm:$0xff] }
 0x312   :  { %2928 = vmatprep.subr.bf16.mxu0 %v2434_v63  ;;  %v2251_v63 = vld [vmem:[#allocation2 + $0x1150] sm:$0xff] }
 0x314   :  { %3175 = vmatpush1.bf16.msra.mxu1 %v2179_v54  ;;  %v2513_v54 = vld [vmem:[#allocation2 + $0x1980] sm:$0xff] }
 0x315   :  { %2929 = vmatpush1.bf16.msra.mxu0 %v2433_v50  ;;  %3176 = vmatprep.subr.bf16.mxu1 %v2188_v23  ;;  %v2260_v50 = vld [vmem:[#allocation2 + $0x1198] sm:$0xff]  ;;  %v2522_v23 = vld [vmem:[#allocation2 + $0x19c8] sm:$0xff] }
 0x316   :  { %2930 = vmatprep.subr.bf16.mxu0 %v2442_v3  ;;  %v2259_v3 = vld [vmem:[#allocation2 + $0x1190] sm:$0xff] }
 0x318   :  { %3177 = vmatpush1.bf16.msra.mxu1 %v2187_v13  ;;  %v2521_v13 = vld [vmem:[#allocation2 + $0x19c0] sm:$0xff] }
 0x319   :  { %2931 = vmatpush1.bf16.msra.mxu0 %v2441_v12  ;;  %3178 = vmatprep.subr.bf16.mxu1 %v2196_v15  ;;  %v2268_v12 = vld [vmem:[#allocation2 + $0x11d8] sm:$0xff]  ;;  %v2530_v15 = vld [vmem:[#allocation2 + $0x1a08] sm:$0xff] }
 0x31a   :  { %2932 = vmatprep.subr.bf16.mxu0 %v2450_v58  ;;  %v2267_v58 = vld [vmem:[#allocation2 + $0x11d0] sm:$0xff] }
 0x31c   :  { %3179 = vmatpush1.bf16.msra.mxu1 %v2195_v25  ;;  %v2529_v25 = vld [vmem:[#allocation2 + $0x1a00] sm:$0xff] }
 0x31d   :  { %2933 = vmatpush1.bf16.msra.mxu0 %v2449_v17  ;;  %3180 = vmatprep.subr.bf16.mxu1 %v2204_v14  ;;  %v2276_v17 = vld [vmem:[#allocation2 + $0x1218] sm:$0xff]  ;;  %v2538_v14 = vld [vmem:[#allocation2 + $0x1a48] sm:$0xff] }
 0x31e   :  { %2934 = vmatprep.subr.bf16.mxu0 %v2458_v9  ;;  %v2275_v9 = vld [vmem:[#allocation2 + $0x1210] sm:$0xff] }
 0x320   :  { %3181 = vmatpush1.bf16.msra.mxu1 %v2203_v39  ;;  %v2537_v39 = vld [vmem:[#allocation2 + $0x1a40] sm:$0xff] }
 0x321   :  { %2935 = vmatpush1.bf16.msra.mxu0 %v2457_v22  ;;  %3191 = vmatprep.subr.bf16.mxu1 %v2212_v62  ;;  %v2284_v22 = vld [vmem:[#allocation2 + $0x1258] sm:$0xff]  ;;  %v2546_v62 = vld [vmem:[#allocation2 + $0x1a88] sm:$0xff] }
 0x322   :  { %2945 = vmatprep.subr.bf16.mxu0 %v2466_v56  ;;  %v2283_v56 = vld [vmem:[#allocation2 + $0x1250] sm:$0xff] }
 0x323   :  { %3183 = vmatmul.mubr.bf16.vlgmr.msra.gmra.mrb[40].mxu1 %v5398_v36 }
 0x324   :  { %2937 = vmatmul.mubr.bf16.vlgmr.msra.gmra.mrb[24].mxu0 %v5289_v6  ;;  %3192 = vmatpush1.bf16.msra.mxu1 %v2211_v49  ;;  %v2545_v49 = vld [vmem:[#allocation2 + $0x1a80] sm:$0xff] }
 0x325   :  { %2946 = vmatpush1.bf16.msra.mxu0 %v2465_v42  ;;  %3193 = vmatprep.subr.bf16.mxu1 %v2220_v47  ;;  %v2292_v42 = vld [vmem:[#allocation2 + $0x1298] sm:$0xff]  ;;  %v2554_v47 = vld [vmem:[#allocation2 + $0x1ac8] sm:$0xff] }
 0x326   :  { %2947 = vmatprep.subr.bf16.mxu0 %v2474_v51  ;;  %2977 = vmatprep.mubr.bf16.mxu0 %v5459_v20  ;;  %v2291_v51 = vld [vmem:[#allocation2 + $0x1290] sm:$0xff] }
 0x327   :  { %3223 = vmatprep.mubr.bf16.mxu1 %v5479_v27 }
 0x328   :  { %3194 = vmatpush1.bf16.msra.mxu1 %v2219_v59  ;;  %v2553_v59 = vld [vmem:[#allocation2 + $0x1ac0] sm:$0xff] }
 0x329   :  { %2948 = vmatpush1.bf16.msra.mxu0 %v2473_v4  ;;  %3195 = vmatprep.subr.bf16.mxu1 %v2228_v60  ;;  %v2300_v4 = vld [vmem:[#allocation2 + $0x12d8] sm:$0xff]  ;;  %v2562_v60 = vld [vmem:[#allocation2 + $0x1b08] sm:$0xff] }
 0x32a   :  { %2949 = vmatprep.subr.bf16.mxu0 %v2482_v29  ;;  %v2299_v29 = vld [vmem:[#allocation2 + $0x12d0] sm:$0xff] }
 0x32c   :  { %3196 = vmatpush1.bf16.msra.mxu1 %v2227_v33  ;;  %v2561_v33 = vld [vmem:[#allocation2 + $0x1b00] sm:$0xff] }
 0x32d   :  { %2950 = vmatpush1.bf16.msra.mxu0 %v2481_v32  ;;  %3197 = vmatprep.subr.bf16.mxu1 %v2236_v41  ;;  %v2308_v32 = vld [vmem:[#allocation2 + $0x1318] sm:$0xff]  ;;  %v2570_v41 = vld [vmem:[#allocation2 + $0x1b48] sm:$0xff] }
 0x32e   :  { %2951 = vmatprep.subr.bf16.mxu0 %v2490_v34  ;;  %v2307_v34 = vld [vmem:[#allocation2 + $0x1310] sm:$0xff] }
 0x330   :  { %3198 = vmatpush1.bf16.msra.mxu1 %v2235_v10  ;;  %v2569_v10 = vld [vmem:[#allocation2 + $0x1b40] sm:$0xff] }
 0x331   :  { %2952 = vmatpush1.bf16.msra.mxu0 %v2489_v1  ;;  %3199 = vmatprep.subr.bf16.mxu1 %v2244_v46  ;;  %v2316_v1 = vld [vmem:[#allocation2 + $0x1358] sm:$0xff]  ;;  %v2578_v46 = vld [vmem:[#allocation2 + $0x1b88] sm:$0xff] }
 0x332   :  { %2953 = vmatprep.subr.bf16.mxu0 %v2498_v45  ;;  %v2315_v45 = vld [vmem:[#allocation2 + $0x1350] sm:$0xff] }
 0x334   :  { %3200 = vmatpush1.bf16.msra.mxu1 %v2243_v8  ;;  %v2577_v8 = vld [vmem:[#allocation2 + $0x1b80] sm:$0xff] }
 0x335   :  { %2954 = vmatpush1.bf16.msra.mxu0 %v2497_v48  ;;  %3201 = vmatprep.subr.bf16.mxu1 %v2252_v52  ;;  %v2324_v48 = vld [vmem:[#allocation2 + $0x1398] sm:$0xff]  ;;  %v2586_v52 = vld [vmem:[#allocation2 + $0x1bc8] sm:$0xff] }
 0x336   :  { %2955 = vmatprep.subr.bf16.mxu0 %v2506_v53  ;;  %v2323_v53 = vld [vmem:[#allocation2 + $0x1390] sm:$0xff] }
 0x338   :  { %3202 = vmatpush1.bf16.msra.mxu1 %v2251_v63  ;;  %v2585_v63 = vld [vmem:[#allocation2 + $0x1bc0] sm:$0xff] }
 0x339   :  { %2956 = vmatpush1.bf16.msra.mxu0 %v2505_v57  ;;  %3203 = vmatprep.subr.bf16.mxu1 %v2260_v50  ;;  %v2332_v57 = vld [vmem:[#allocation2 + $0x13d8] sm:$0xff]  ;;  %v2594_v50 = vld [vmem:[#allocation2 + $0x1c08] sm:$0xff] }
 0x33a   :  { %2957 = vmatprep.subr.bf16.mxu0 %v2514_v31  ;;  %v2331_v31 = vld [vmem:[#allocation2 + $0x13d0] sm:$0xff] }
 0x33c   :  { %3204 = vmatpush1.bf16.msra.mxu1 %v2259_v3  ;;  %v2593_v3 = vld [vmem:[#allocation2 + $0x1c00] sm:$0xff] }
 0x33d   :  { %2958 = vmatpush1.bf16.msra.mxu0 %v2513_v54  ;;  %3205 = vmatprep.subr.bf16.mxu1 %v2268_v12  ;;  %v2340_v54 = vld [vmem:[#allocation2 + $0x1418] sm:$0xff]  ;;  %v2602_v12 = vld [vmem:[#allocation2 + $0x1c48] sm:$0xff] }
 0x33e   :  { %2959 = vmatprep.subr.bf16.mxu0 %v2522_v23  ;;  %v2339_v23 = vld [vmem:[#allocation2 + $0x1410] sm:$0xff] }
 0x340   :  { %3206 = vmatpush1.bf16.msra.mxu1 %v2267_v58  ;;  %v2601_v58 = vld [vmem:[#allocation2 + $0x1c40] sm:$0xff] }
 0x341   :  { %2960 = vmatpush1.bf16.msra.mxu0 %v2521_v13  ;;  %3207 = vmatprep.subr.bf16.mxu1 %v2276_v17  ;;  %v2348_v13 = vld [vmem:[#allocation2 + $0x1458] sm:$0xff]  ;;  %v2610_v17 = vld [vmem:[#allocation2 + $0x1c88] sm:$0xff] }
 0x342   :  { %2961 = vmatprep.subr.bf16.mxu0 %v2530_v15  ;;  %v2347_v15 = vld [vmem:[#allocation2 + $0x1450] sm:$0xff] }
 0x344   :  { %3208 = vmatpush1.bf16.msra.mxu1 %v2275_v9  ;;  %v2609_v9 = vld [vmem:[#allocation2 + $0x1c80] sm:$0xff] }
 0x345   :  { %2962 = vmatpush1.bf16.msra.mxu0 %v2529_v25  ;;  %3209 = vmatprep.subr.bf16.mxu1 %v2284_v22  ;;  %v2356_v25 = vld [vmem:[#allocation2 + $0x1498] sm:$0xff]  ;;  %v2618_v22 = vld [vmem:[#allocation2 + $0x1cc8] sm:$0xff] }
 0x346   :  { %2963 = vmatprep.subr.bf16.mxu0 %v2538_v14  ;;  %v2355_v14 = vld [vmem:[#allocation2 + $0x1490] sm:$0xff] }
 0x348   :  { %3210 = vmatpush1.bf16.msra.mxu1 %v2283_v56  ;;  %v2617_v56 = vld [vmem:[#allocation2 + $0x1cc0] sm:$0xff] }
 0x349   :  { %2964 = vmatpush1.bf16.msra.mxu0 %v2537_v39  ;;  %3211 = vmatprep.subr.bf16.mxu1 %v2292_v42  ;;  %v2364_v39 = vld [vmem:[#allocation2 + $0x14d8] sm:$0xff]  ;;  %v2626_v42 = vld [vmem:[#allocation2 + $0x1d08] sm:$0xff] }
 0x34a   :  { %2965 = vmatprep.subr.bf16.mxu0 %v2546_v62  ;;  %v2363_v62 = vld [vmem:[#allocation2 + $0x14d0] sm:$0xff] }
 0x34c   :  { %3212 = vmatpush1.bf16.msra.mxu1 %v2291_v51  ;;  %v2625_v51 = vld [vmem:[#allocation2 + $0x1d00] sm:$0xff] }
 0x34d   :  { %2966 = vmatpush1.bf16.msra.mxu0 %v2545_v49  ;;  %3213 = vmatprep.subr.bf16.mxu1 %v2300_v4  ;;  %v2372_v49 = vld [vmem:[#allocation2 + $0x1518] sm:$0xff]  ;;  %v2634_v4 = vld [vmem:[#allocation2 + $0x1d48] sm:$0xff] }
 0x34e   :  { %2967 = vmatprep.subr.bf16.mxu0 %v2554_v47  ;;  %v2371_v47 = vld [vmem:[#allocation2 + $0x1510] sm:$0xff] }
 0x350   :  { %3214 = vmatpush1.bf16.msra.mxu1 %v2299_v29  ;;  %v2633_v29 = vld [vmem:[#allocation2 + $0x1d40] sm:$0xff] }
 0x351   :  { %2968 = vmatpush1.bf16.msra.mxu0 %v2553_v59  ;;  %3215 = vmatprep.subr.bf16.mxu1 %v2308_v32  ;;  %v2380_v59 = vld [vmem:[#allocation2 + $0x1558] sm:$0xff]  ;;  %v2642_v32 = vld [vmem:[#allocation2 + $0x1d88] sm:$0xff] }
 0x352   :  { %2969 = vmatprep.subr.bf16.mxu0 %v2562_v60  ;;  %v2379_v60 = vld [vmem:[#allocation2 + $0x1550] sm:$0xff] }
 0x354   :  { %3216 = vmatpush1.bf16.msra.mxu1 %v2307_v34  ;;  %v2641_v34 = vld [vmem:[#allocation2 + $0x1d80] sm:$0xff] }
 0x355   :  { %2970 = vmatpush1.bf16.msra.mxu0 %v2561_v33  ;;  %3217 = vmatprep.subr.bf16.mxu1 %v2316_v1  ;;  %v2388_v33 = vld [vmem:[#allocation2 + $0x1598] sm:$0xff]  ;;  %v2650_v1 = vld [vmem:[#allocation2 + $0x1dc8] sm:$0xff] }
 0x356   :  { %2971 = vmatprep.subr.bf16.mxu0 %v2570_v41  ;;  %v2387_v41 = vld [vmem:[#allocation2 + $0x1590] sm:$0xff] }
 0x358   :  { %3218 = vmatpush1.bf16.msra.mxu1 %v2315_v45  ;;  %v2649_v45 = vld [vmem:[#allocation2 + $0x1dc0] sm:$0xff] }
 0x359   :  { %2972 = vmatpush1.bf16.msra.mxu0 %v2569_v10  ;;  %3219 = vmatprep.subr.bf16.mxu1 %v2324_v48  ;;  %v2396_v10 = vld [vmem:[#allocation2 + $0x15d8] sm:$0xff] }
 0x35a   :  { %2973 = vmatprep.subr.bf16.mxu0 %v2578_v46  ;;  %v2395_v46 = vld [vmem:[#allocation2 + $0x15d0] sm:$0xff]  ;;  %v2404_v48 = vld [vmem:[#allocation2 + $0x1618] sm:$0xff] }
 0x35c   :  { %3220 = vmatpush1.bf16.msra.mxu1 %v2323_v53  ;;  %v2403_v53 = vld [vmem:[#allocation2 + $0x1610] sm:$0xff] }
 0x35d   :  { %2974 = vmatpush1.bf16.msra.mxu0 %v2577_v8  ;;  %3221 = vmatprep.subr.bf16.mxu1 %v2332_v57  ;;  %v1702_v8 = vld [vmem:[#allocation2 + $0x28] sm:$0xff]  ;;  %v2412_v57 = vld [vmem:[#allocation2 + $0x1658] sm:$0xff] }
 0x35e   :  { %2975 = vmatprep.subr.bf16.mxu0 %v2586_v52  ;;  %v1701_v52 = vld [vmem:[#allocation2 + $0x20] sm:$0xff] }
 0x360   :  { %3222 = vmatpush1.bf16.msra.mxu1 %v2331_v31  ;;  %v2411_v31 = vld [vmem:[#allocation2 + $0x1650] sm:$0xff] }
 0x361   :  { %2976 = vmatpush1.bf16.msra.mxu0 %v2585_v63  ;;  %3232 = vmatprep.subr.bf16.mxu1 %v2340_v54  ;;  %v1710_v63 = vld [vmem:[#allocation2 + $0x68] sm:$0xff]  ;;  %v2420_v54 = vld [vmem:[#allocation2 + $0x1698] sm:$0xff] }
 0x362   :  { %2986 = vmatprep.subr.bf16.mxu0 %v2594_v50  ;;  %v1709_v50 = vld [vmem:[#allocation2 + $0x60] sm:$0xff] }
 0x363   :  { %3224 = vmatmul.mubr.bf16.vlgmr.msra.gmra.mrb[40].mxu1 %v5456_v18 }
 0x364   :  { %2978 = vmatmul.mubr.bf16.vlgmr.msra.gmra.mrb[24].mxu0 %v5406_v44  ;;  %3233 = vmatpush1.bf16.msra.mxu1 %v2339_v23  ;;  %v2419_v23 = vld [vmem:[#allocation2 + $0x1690] sm:$0xff] }
 0x365   :  { %2987 = vmatpush1.bf16.msra.mxu0 %v2593_v3  ;;  %3234 = vmatprep.subr.bf16.mxu1 %v2348_v13  ;;  %v1718_v3 = vld [vmem:[#allocation2 + $0xa8] sm:$0xff]  ;;  %v2428_v13 = vld [vmem:[#allocation2 + $0x16d8] sm:$0xff] }
 0x366   :  { %2988 = vmatprep.subr.bf16.mxu0 %v2602_v12  ;;  %3018 = vmatprep.mubr.bf16.mxu0 %v5108_v0  ;;  %v1717_v12 = vld [vmem:[#allocation2 + $0xa0] sm:$0xff] }
 0x367   :  { %3264 = vmatprep.mubr.bf16.mxu1 %v5404_v37 }
 0x368   :  { %3235 = vmatpush1.bf16.msra.mxu1 %v2347_v15  ;;  %v2427_v15 = vld [vmem:[#allocation2 + $0x16d0] sm:$0xff] }
 0x369   :  { %2989 = vmatpush1.bf16.msra.mxu0 %v2601_v58  ;;  %3236 = vmatprep.subr.bf16.mxu1 %v2356_v25  ;;  %v1726_v58 = vld [vmem:[#allocation2 + $0xe8] sm:$0xff]  ;;  %v2436_v25 = vld [vmem:[#allocation2 + $0x1718] sm:$0xff] }
 0x36a   :  { %2990 = vmatprep.subr.bf16.mxu0 %v2610_v17  ;;  %v1725_v17 = vld [vmem:[#allocation2 + $0xe0] sm:$0xff] }
 0x36c   :  { %3237 = vmatpush1.bf16.msra.mxu1 %v2355_v14  ;;  %v2435_v14 = vld [vmem:[#allocation2 + $0x1710] sm:$0xff] }
 0x36d   :  { %2991 = vmatpush1.bf16.msra.mxu0 %v2609_v9  ;;  %3238 = vmatprep.subr.bf16.mxu1 %v2364_v39  ;;  %v1734_v9 = vld [vmem:[#allocation2 + $0x128] sm:$0xff]  ;;  %v2444_v39 = vld [vmem:[#allocation2 + $0x1758] sm:$0xff] }
 0x36e   :  { %2992 = vmatprep.subr.bf16.mxu0 %v2618_v22  ;;  %v1733_v22 = vld [vmem:[#allocation2 + $0x120] sm:$0xff] }
 0x370   :  { %3239 = vmatpush1.bf16.msra.mxu1 %v2363_v62  ;;  %v2443_v62 = vld [vmem:[#allocation2 + $0x1750] sm:$0xff] }
 0x371   :  { %2993 = vmatpush1.bf16.msra.mxu0 %v2617_v56  ;;  %3240 = vmatprep.subr.bf16.mxu1 %v2372_v49  ;;  %v1742_v56 = vld [vmem:[#allocation2 + $0x168] sm:$0xff]  ;;  %v2452_v49 = vld [vmem:[#allocation2 + $0x1798] sm:$0xff] }
 0x372   :  { %2994 = vmatprep.subr.bf16.mxu0 %v2626_v42  ;;  %v1741_v42 = vld [vmem:[#allocation2 + $0x160] sm:$0xff] }
 0x374   :  { %3241 = vmatpush1.bf16.msra.mxu1 %v2371_v47  ;;  %v2451_v47 = vld [vmem:[#allocation2 + $0x1790] sm:$0xff] }
 0x375   :  { %2995 = vmatpush1.bf16.msra.mxu0 %v2625_v51  ;;  %3242 = vmatprep.subr.bf16.mxu1 %v2380_v59  ;;  %v1750_v51 = vld [vmem:[#allocation2 + $0x1a8] sm:$0xff]  ;;  %v2460_v59 = vld [vmem:[#allocation2 + $0x17d8] sm:$0xff] }
 0x376   :  { %2996 = vmatprep.subr.bf16.mxu0 %v2634_v4  ;;  %v1749_v4 = vld [vmem:[#allocation2 + $0x1a0] sm:$0xff] }
 0x378   :  { %3243 = vmatpush1.bf16.msra.mxu1 %v2379_v60  ;;  %v2459_v60 = vld [vmem:[#allocation2 + $0x17d0] sm:$0xff] }
 0x379   :  { %2997 = vmatpush1.bf16.msra.mxu0 %v2633_v29  ;;  %3244 = vmatprep.subr.bf16.mxu1 %v2388_v33  ;;  %v1758_v29 = vld [vmem:[#allocation2 + $0x1e8] sm:$0xff]  ;;  %v2468_v33 = vld [vmem:[#allocation2 + $0x1818] sm:$0xff] }
 0x37a   :  { %2998 = vmatprep.subr.bf16.mxu0 %v2642_v32  ;;  %v1757_v32 = vld [vmem:[#allocation2 + $0x1e0] sm:$0xff] }
 0x37c   :  { %3245 = vmatpush1.bf16.msra.mxu1 %v2387_v41  ;;  %v2467_v41 = vld [vmem:[#allocation2 + $0x1810] sm:$0xff] }
 0x37d   :  { %2999 = vmatpush1.bf16.msra.mxu0 %v2641_v34  ;;  %3246 = vmatprep.subr.bf16.mxu1 %v2396_v10  ;;  %v1766_v34 = vld [vmem:[#allocation2 + $0x228] sm:$0xff]  ;;  %v2476_v10 = vld [vmem:[#allocation2 + $0x1858] sm:$0xff] }
 0x37e   :  { %3000 = vmatprep.subr.bf16.mxu0 %v2650_v1  ;;  %v1765_v1 = vld [vmem:[#allocation2 + $0x220] sm:$0xff] }
 0x380   :  { %3247 = vmatpush1.bf16.msra.mxu1 %v2395_v46  ;;  %v2475_v46 = vld [vmem:[#allocation2 + $0x1850] sm:$0xff] }
 0x381   :  { %3001 = vmatpush1.bf16.msra.mxu0 %v2649_v45  ;;  %3248 = vmatprep.subr.bf16.mxu1 %v2404_v48  ;;  %v1774_v45 = vld [vmem:[#allocation2 + $0x268] sm:$0xff]  ;;  %v1773_v48 = vld [vmem:[#allocation2 + $0x260] sm:$0xff] }
 0x382   :  { %3355 = vmatprep.subr.bf16.mxu0 %v1702_v8  ;;  %v2484_v8 = vld [vmem:[#allocation2 + $0x1898] sm:$0xff] }
 0x384   :  { %3019 = vmatmul.mubr.bf16.vlgmr.msra.gmra.mrb[24].mxu0 %v5481_v16  ;;  %3249 = vmatpush1.bf16.msra.mxu1 %v2403_v53  ;;  %v1782_v53 = vld [vmem:[#allocation2 + $0x2a8] sm:$0xff] }
 0x385   :  { %3356 = vmatpush1.bf16.msra.mxu0 %v1701_v52  ;;  %3250 = vmatprep.subr.bf16.mxu1 %v2412_v57  ;;  %v2483_v52 = vld [vmem:[#allocation2 + $0x1890] sm:$0xff]  ;;  %v1781_v57 = vld [vmem:[#allocation2 + $0x2a0] sm:$0xff] }
 0x386   :  { %3357 = vmatprep.subr.bf16.mxu0 %v1710_v63  ;;  %3387 = vmatprep.mubr.bf16.mxu0 %v5394_v28  ;;  %v2492_v63 = vld [vmem:[#allocation2 + $0x18d8] sm:$0xff] }
 0x388   :  { %3251 = vmatpush1.bf16.msra.mxu1 %v2411_v31  ;;  %v1790_v31 = vld [vmem:[#allocation2 + $0x2e8] sm:$0xff] }
 0x389   :  { %3358 = vmatpush1.bf16.msra.mxu0 %v1709_v50  ;;  %3252 = vmatprep.subr.bf16.mxu1 %v2420_v54  ;;  %v2491_v50 = vld [vmem:[#allocation2 + $0x18d0] sm:$0xff]  ;;  %v1789_v54 = vld [vmem:[#allocation2 + $0x2e0] sm:$0xff] }
 0x38a   :  { %3359 = vmatprep.subr.bf16.mxu0 %v1718_v3  ;;  %v2500_v3 = vld [vmem:[#allocation2 + $0x1918] sm:$0xff] }
 0x38c   :  { %3253 = vmatpush1.bf16.msra.mxu1 %v2419_v23  ;;  %v1798_v23 = vld [vmem:[#allocation2 + $0x328] sm:$0xff] }
 0x38d   :  { %3360 = vmatpush1.bf16.msra.mxu0 %v1717_v12  ;;  %3254 = vmatprep.subr.bf16.mxu1 %v2428_v13  ;;  %v2499_v12 = vld [vmem:[#allocation2 + $0x1910] sm:$0xff]  ;;  %v1797_v13 = vld [vmem:[#allocation2 + $0x320] sm:$0xff] }
 0x38e   :  { %3361 = vmatprep.subr.bf16.mxu0 %v1726_v58  ;;  %v2508_v58 = vld [vmem:[#allocation2 + $0x1958] sm:$0xff] }
 0x390   :  { %3255 = vmatpush1.bf16.msra.mxu1 %v2427_v15  ;;  %v1806_v15 = vld [vmem:[#allocation2 + $0x368] sm:$0xff] }
 0x391   :  { %3362 = vmatpush1.bf16.msra.mxu0 %v1725_v17  ;;  %3256 = vmatprep.subr.bf16.mxu1 %v2436_v25  ;;  %v2507_v17 = vld [vmem:[#allocation2 + $0x1950] sm:$0xff]  ;;  %v1805_v25 = vld [vmem:[#allocation2 + $0x360] sm:$0xff] }
 0x392   :  { %3363 = vmatprep.subr.bf16.mxu0 %v1734_v9  ;;  %v2516_v9 = vld [vmem:[#allocation2 + $0x1998] sm:$0xff] }
 0x394   :  { %3257 = vmatpush1.bf16.msra.mxu1 %v2435_v14  ;;  %v1814_v14 = vld [vmem:[#allocation2 + $0x3a8] sm:$0xff] }
 0x395   :  { %3364 = vmatpush1.bf16.msra.mxu0 %v1733_v22  ;;  %3258 = vmatprep.subr.bf16.mxu1 %v2444_v39  ;;  %v2515_v22 = vld [vmem:[#allocation2 + $0x1990] sm:$0xff]  ;;  %v1813_v39 = vld [vmem:[#allocation2 + $0x3a0] sm:$0xff] }
 0x396   :  { %3365 = vmatprep.subr.bf16.mxu0 %v1742_v56  ;;  %v2524_v56 = vld [vmem:[#allocation2 + $0x19d8] sm:$0xff] }
 0x398   :  { %3259 = vmatpush1.bf16.msra.mxu1 %v2443_v62  ;;  %v1822_v62 = vld [vmem:[#allocation2 + $0x3e8] sm:$0xff] }
 0x399   :  { %3366 = vmatpush1.bf16.msra.mxu0 %v1741_v42  ;;  %3260 = vmatprep.subr.bf16.mxu1 %v2452_v49  ;;  %v2523_v42 = vld [vmem:[#allocation2 + $0x19d0] sm:$0xff]  ;;  %v1821_v49 = vld [vmem:[#allocation2 + $0x3e0] sm:$0xff] }
 0x39a   :  { %3367 = vmatprep.subr.bf16.mxu0 %v1750_v51  ;;  %v2532_v51 = vld [vmem:[#allocation2 + $0x1a18] sm:$0xff] }
 0x39c   :  { %3261 = vmatpush1.bf16.msra.mxu1 %v2451_v47  ;;  %v1830_v47 = vld [vmem:[#allocation2 + $0x428] sm:$0xff] }
 0x39d   :  { %3368 = vmatpush1.bf16.msra.mxu0 %v1749_v4  ;;  %3262 = vmatprep.subr.bf16.mxu1 %v2460_v59  ;;  %v2531_v4 = vld [vmem:[#allocation2 + $0x1a10] sm:$0xff]  ;;  %v1829_v59 = vld [vmem:[#allocation2 + $0x420] sm:$0xff] }
 0x39e   :  { %3369 = vmatprep.subr.bf16.mxu0 %v1758_v29  ;;  %v2540_v29 = vld [vmem:[#allocation2 + $0x1a58] sm:$0xff] }
 0x3a0   :  { %3263 = vmatpush1.bf16.msra.mxu1 %v2459_v60  ;;  %v1838_v60 = vld [vmem:[#allocation2 + $0x468] sm:$0xff] }
 0x3a1   :  { %3370 = vmatpush1.bf16.msra.mxu0 %v1757_v32  ;;  %3273 = vmatprep.subr.bf16.mxu1 %v2468_v33  ;;  %v2539_v32 = vld [vmem:[#allocation2 + $0x1a50] sm:$0xff]  ;;  %v1837_v33 = vld [vmem:[#allocation2 + $0x460] sm:$0xff] }
 0x3a2   :  { %3371 = vmatprep.subr.bf16.mxu0 %v1766_v34  ;;  %v2548_v34 = vld [vmem:[#allocation2 + $0x1a98] sm:$0xff] }
 0x3a3   :  { %3265 = vmatmul.mubr.bf16.vlgmr.msra.gmra.mrb[40].mxu1 %v5289_v6 }
 0x3a4   :  { %3274 = vmatpush1.bf16.msra.mxu1 %v2467_v41  ;;  %3305 = vmatprep.mubr.bf16.mxu1 %v5459_v20  ;;  %v1846_v41 = vld [vmem:[#allocation2 + $0x4a8] sm:$0xff] }
 0x3a5   :  { %3372 = vmatpush1.bf16.msra.mxu0 %v1765_v1  ;;  %3275 = vmatprep.subr.bf16.mxu1 %v2476_v10  ;;  %v2547_v1 = vld [vmem:[#allocation2 + $0x1a90] sm:$0xff]  ;;  %v1845_v10 = vld [vmem:[#allocation2 + $0x4a0] sm:$0xff] }
 0x3a6   :  { %3373 = vmatprep.subr.bf16.mxu0 %v1774_v45  ;;  %v2556_v45 = vld [vmem:[#allocation2 + $0x1ad8] sm:$0xff] }
 0x3a8   :  { %3276 = vmatpush1.bf16.msra.mxu1 %v2475_v46  ;;  %v1854_v46 = vld [vmem:[#allocation2 + $0x4e8] sm:$0xff] }
 0x3a9   :  { %3374 = vmatpush1.bf16.msra.mxu0 %v1773_v48  ;;  %3277 = vmatprep.subr.bf16.mxu1 %v2484_v8  ;;  %v2555_v48 = vld [vmem:[#allocation2 + $0x1ad0] sm:$0xff]  ;;  %v1853_v8 = vld [vmem:[#allocation2 + $0x4e0] sm:$0xff] }
 0x3aa   :  { %3375 = vmatprep.subr.bf16.mxu0 %v1782_v53  ;;  %v2564_v53 = vld [vmem:[#allocation2 + $0x1b18] sm:$0xff] }
 0x3ac   :  { %3278 = vmatpush1.bf16.msra.mxu1 %v2483_v52  ;;  %v1862_v52 = vld [vmem:[#allocation2 + $0x528] sm:$0xff] }
 0x3ad   :  { %3376 = vmatpush1.bf16.msra.mxu0 %v1781_v57  ;;  %3279 = vmatprep.subr.bf16.mxu1 %v2492_v63  ;;  %v2563_v57 = vld [vmem:[#allocation2 + $0x1b10] sm:$0xff]  ;;  %v1861_v63 = vld [vmem:[#allocation2 + $0x520] sm:$0xff] }
 0x3ae   :  { %3377 = vmatprep.subr.bf16.mxu0 %v1790_v31  ;;  %v2572_v31 = vld [vmem:[#allocation2 + $0x1b58] sm:$0xff] }
 0x3b0   :  { %3280 = vmatpush1.bf16.msra.mxu1 %v2491_v50  ;;  %v1870_v50 = vld [vmem:[#allocation2 + $0x568] sm:$0xff] }
 0x3b1   :  { %3378 = vmatpush1.bf16.msra.mxu0 %v1789_v54  ;;  %3281 = vmatprep.subr.bf16.mxu1 %v2500_v3  ;;  %v2571_v54 = vld [vmem:[#allocation2 + $0x1b50] sm:$0xff]  ;;  %v1869_v3 = vld [vmem:[#allocation2 + $0x560] sm:$0xff] }
 0x3b2   :  { %3379 = vmatprep.subr.bf16.mxu0 %v1798_v23  ;;  %v2580_v23 = vld [vmem:[#allocation2 + $0x1b98] sm:$0xff] }
 0x3b4   :  { %3282 = vmatpush1.bf16.msra.mxu1 %v2499_v12  ;;  %v1878_v12 = vld [vmem:[#allocation2 + $0x5a8] sm:$0xff] }
 0x3b5   :  { %3380 = vmatpush1.bf16.msra.mxu0 %v1797_v13  ;;  %3283 = vmatprep.subr.bf16.mxu1 %v2508_v58  ;;  %v2579_v13 = vld [vmem:[#allocation2 + $0x1b90] sm:$0xff]  ;;  %v1877_v58 = vld [vmem:[#allocation2 + $0x5a0] sm:$0xff] }
 0x3b6   :  { %3381 = vmatprep.subr.bf16.mxu0 %v1806_v15  ;;  %v2588_v15 = vld [vmem:[#allocation2 + $0x1bd8] sm:$0xff] }
 0x3b8   :  { %3284 = vmatpush1.bf16.msra.mxu1 %v2507_v17  ;;  %v1886_v17 = vld [vmem:[#allocation2 + $0x5e8] sm:$0xff] }
 0x3b9   :  { %3382 = vmatpush1.bf16.msra.mxu0 %v1805_v25  ;;  %3285 = vmatprep.subr.bf16.mxu1 %v2516_v9  ;;  %v2587_v25 = vld [vmem:[#allocation2 + $0x1bd0] sm:$0xff]  ;;  %v1885_v9 = vld [vmem:[#allocation2 + $0x5e0] sm:$0xff] }
 0x3ba   :  { %3383 = vmatprep.subr.bf16.mxu0 %v1814_v14  ;;  %v2596_v14 = vld [vmem:[#allocation2 + $0x1c18] sm:$0xff] }
 0x3bc   :  { %3286 = vmatpush1.bf16.msra.mxu1 %v2515_v22  ;;  %v1894_v22 = vld [vmem:[#allocation2 + $0x628] sm:$0xff] }
 0x3bd   :  { %3384 = vmatpush1.bf16.msra.mxu0 %v1813_v39  ;;  %3287 = vmatprep.subr.bf16.mxu1 %v2524_v56  ;;  %v2595_v39 = vld [vmem:[#allocation2 + $0x1c10] sm:$0xff]  ;;  %v1893_v56 = vld [vmem:[#allocation2 + $0x620] sm:$0xff] }
 0x3be   :  { %3385 = vmatprep.subr.bf16.mxu0 %v1822_v62  ;;  %v2604_v62 = vld [vmem:[#allocation2 + $0x1c58] sm:$0xff] }
 0x3c0   :  { %3288 = vmatpush1.bf16.msra.mxu1 %v2523_v42  ;;  %v1902_v42 = vld [vmem:[#allocation2 + $0x668] sm:$0xff] }
 0x3c1   :  { %3386 = vmatpush1.bf16.msra.mxu0 %v1821_v49  ;;  %3289 = vmatprep.subr.bf16.mxu1 %v2532_v51  ;;  %v2603_v49 = vld [vmem:[#allocation2 + $0x1c50] sm:$0xff]  ;;  %v1901_v51 = vld [vmem:[#allocation2 + $0x660] sm:$0xff] }
 0x3c2   :  { %3396 = vmatprep.subr.bf16.mxu0 %v1830_v47  ;;  %v2612_v47 = vld [vmem:[#allocation2 + $0x1c98] sm:$0xff] }
 0x3c4   :  { %3388 = vmatmul.mubr.bf16.vlgmr.msra.gmra.mrb[28].mxu0 %v5285_v2  ;;  %3290 = vmatpush1.bf16.msra.mxu1 %v2531_v4  ;;  %v1910_v4 = vld [vmem:[#allocation2 + $0x6a8] sm:$0xff] }
 0x3c5   :  { %3397 = vmatpush1.bf16.msra.mxu0 %v1829_v59  ;;  %3291 = vmatprep.subr.bf16.mxu1 %v2540_v29  ;;  %v2611_v59 = vld [vmem:[#allocation2 + $0x1c90] sm:$0xff]  ;;  %v1909_v29 = vld [vmem:[#allocation2 + $0x6a0] sm:$0xff] }
 0x3c6   :  { %3398 = vmatprep.subr.bf16.mxu0 %v1838_v60  ;;  %3428 = vmatprep.mubr.bf16.mxu0 %v5452_v35  ;;  %v2620_v60 = vld [vmem:[#allocation2 + $0x1cd8] sm:$0xff] }
 0x3c8   :  { %3292 = vmatpush1.bf16.msra.mxu1 %v2539_v32  ;;  %v1918_v32 = vld [vmem:[#allocation2 + $0x6e8] sm:$0xff] }
 0x3c9   :  { %3399 = vmatpush1.bf16.msra.mxu0 %v1837_v33  ;;  %3293 = vmatprep.subr.bf16.mxu1 %v2548_v34  ;;  %v2619_v33 = vld [vmem:[#allocation2 + $0x1cd0] sm:$0xff]  ;;  %v1917_v34 = vld [vmem:[#allocation2 + $0x6e0] sm:$0xff] }
 0x3ca   :  { %3400 = vmatprep.subr.bf16.mxu0 %v1846_v41  ;;  %v2628_v41 = vld [vmem:[#allocation2 + $0x1d18] sm:$0xff] }
 0x3cc   :  { %3294 = vmatpush1.bf16.msra.mxu1 %v2547_v1  ;;  %v1926_v1 = vld [vmem:[#allocation2 + $0x728] sm:$0xff] }
 0x3cd   :  { %3401 = vmatpush1.bf16.msra.mxu0 %v1845_v10  ;;  %3295 = vmatprep.subr.bf16.mxu1 %v2556_v45  ;;  %v2627_v10 = vld [vmem:[#allocation2 + $0x1d10] sm:$0xff]  ;;  %v1925_v45 = vld [vmem:[#allocation2 + $0x720] sm:$0xff] }
 0x3ce   :  { %3402 = vmatprep.subr.bf16.mxu0 %v1854_v46  ;;  %v2636_v46 = vld [vmem:[#allocation2 + $0x1d58] sm:$0xff] }
 0x3d0   :  { %3296 = vmatpush1.bf16.msra.mxu1 %v2555_v48  ;;  %v1934_v48 = vld [vmem:[#allocation2 + $0x768] sm:$0xff] }
 0x3d1   :  { %3403 = vmatpush1.bf16.msra.mxu0 %v1853_v8  ;;  %3297 = vmatprep.subr.bf16.mxu1 %v2564_v53  ;;  %v2635_v8 = vld [vmem:[#allocation2 + $0x1d50] sm:$0xff]  ;;  %v1933_v53 = vld [vmem:[#allocation2 + $0x760] sm:$0xff] }
 0x3d2   :  { %3404 = vmatprep.subr.bf16.mxu0 %v1862_v52  ;;  %v2644_v52 = vld [vmem:[#allocation2 + $0x1d98] sm:$0xff] }
 0x3d4   :  { %3298 = vmatpush1.bf16.msra.mxu1 %v2563_v57  ;;  %v1942_v57 = vld [vmem:[#allocation2 + $0x7a8] sm:$0xff] }
 0x3d5   :  { %3405 = vmatpush1.bf16.msra.mxu0 %v1861_v63  ;;  %3299 = vmatprep.subr.bf16.mxu1 %v2572_v31  ;;  %v2643_v63 = vld [vmem:[#allocation2 + $0x1d90] sm:$0xff]  ;;  %v1941_v31 = vld [vmem:[#allocation2 + $0x7a0] sm:$0xff] }
 0x3d6   :  { %3406 = vmatprep.subr.bf16.mxu0 %v1870_v50  ;;  %v2652_v50 = vld [vmem:[#allocation2 + $0x1dd8] sm:$0xff] }
 0x3d8   :  { %3300 = vmatpush1.bf16.msra.mxu1 %v2571_v54  ;;  %v1950_v54 = vld [vmem:[#allocation2 + $0x7e8] sm:$0xff] }
 0x3d9   :  { %3407 = vmatpush1.bf16.msra.mxu0 %v1869_v3  ;;  %3301 = vmatprep.subr.bf16.mxu1 %v2580_v23  ;;  %v2651_v3 = vld [vmem:[#allocation2 + $0x1dd0] sm:$0xff]  ;;  %v1949_v23 = vld [vmem:[#allocation2 + $0x7e0] sm:$0xff] }
 0x3da   :  { %3408 = vmatprep.subr.bf16.mxu0 %v1878_v12  ;;  %v1958_v12 = vld [vmem:[#allocation2 + $0x828] sm:$0xff] }
 0x3dc   :  { %3302 = vmatpush1.bf16.msra.mxu1 %v2579_v13  ;;  %v1704_v13 = vld [vmem:[#allocation2 + $0x38] sm:$0xff] }
 0x3dd   :  { %3409 = vmatpush1.bf16.msra.mxu0 %v1877_v58  ;;  %3303 = vmatprep.subr.bf16.mxu1 %v2588_v15  ;;  %v1957_v58 = vld [vmem:[#allocation2 + $0x820] sm:$0xff]  ;;  %v1703_v15 = vld [vmem:[#allocation2 + $0x30] sm:$0xff] }
 0x3de   :  { %3410 = vmatprep.subr.bf16.mxu0 %v1886_v17  ;;  %v1966_v17 = vld [vmem:[#allocation2 + $0x868] sm:$0xff] }
 0x3e0   :  { %3304 = vmatpush1.bf16.msra.mxu1 %v2587_v25  ;;  %v1712_v25 = vld [vmem:[#allocation2 + $0x78] sm:$0xff] }
 0x3e1   :  { %3411 = vmatpush1.bf16.msra.mxu0 %v1885_v9  ;;  %3314 = vmatprep.subr.bf16.mxu1 %v2596_v14  ;;  %v1965_v9 = vld [vmem:[#allocation2 + $0x860] sm:$0xff]  ;;  %v1711_v14 = vld [vmem:[#allocation2 + $0x70] sm:$0xff] }
 0x3e2   :  { %3412 = vmatprep.subr.bf16.mxu0 %v1894_v22  ;;  %v1974_v22 = vld [vmem:[#allocation2 + $0x8a8] sm:$0xff] }
 0x3e3   :  { %3306 = vmatmul.mubr.bf16.vlgmr.msra.gmra.mrb[40].mxu1 %v5406_v44 }
 0x3e4   :  { %3315 = vmatpush1.bf16.msra.mxu1 %v2595_v39  ;;  %3346 = vmatprep.mubr.bf16.mxu1 %v5108_v0  ;;  %v1720_v39 = vld [vmem:[#allocation2 + $0xb8] sm:$0xff] }
 0x3e5   :  { %3413 = vmatpush1.bf16.msra.mxu0 %v1893_v56  ;;  %3316 = vmatprep.subr.bf16.mxu1 %v2604_v62  ;;  %v1973_v56 = vld [vmem:[#allocation2 + $0x8a0] sm:$0xff]  ;;  %v1719_v62 = vld [vmem:[#allocation2 + $0xb0] sm:$0xff] }
 0x3e6   :  { %3414 = vmatprep.subr.bf16.mxu0 %v1902_v42  ;;  %v1982_v42 = vld [vmem:[#allocation2 + $0x8e8] sm:$0xff] }
 0x3e8   :  { %3317 = vmatpush1.bf16.msra.mxu1 %v2603_v49  ;;  %v1728_v49 = vld [vmem:[#allocation2 + $0xf8] sm:$0xff] }
 0x3e9   :  { %3415 = vmatpush1.bf16.msra.mxu0 %v1901_v51  ;;  %3318 = vmatprep.subr.bf16.mxu1 %v2612_v47  ;;  %v1981_v51 = vld [vmem:[#allocation2 + $0x8e0] sm:$0xff]  ;;  %v1727_v47 = vld [vmem:[#allocation2 + $0xf0] sm:$0xff] }
 0x3ea   :  { %3416 = vmatprep.subr.bf16.mxu0 %v1910_v4  ;;  %v1990_v4 = vld [vmem:[#allocation2 + $0x928] sm:$0xff] }
 0x3ec   :  { %3319 = vmatpush1.bf16.msra.mxu1 %v2611_v59  ;;  %v1736_v59 = vld [vmem:[#allocation2 + $0x138] sm:$0xff] }
 0x3ed   :  { %3417 = vmatpush1.bf16.msra.mxu0 %v1909_v29  ;;  %3320 = vmatprep.subr.bf16.mxu1 %v2620_v60  ;;  %v1735_v29 = vld [vmem:[#allocation2 + $0x130] sm:$0xff]  ;;  %v1998_v60 = vld [vmem:[#allocation2 + $0x968] sm:$0xff] }
 0x3ee   :  { %3418 = vmatprep.subr.bf16.mxu0 %v1918_v32  ;;  %v1744_v32 = vld [vmem:[#allocation2 + $0x178] sm:$0xff] }
 0x3f0   :  { %3321 = vmatpush1.bf16.msra.mxu1 %v2619_v33  ;;  %v1997_v33 = vld [vmem:[#allocation2 + $0x960] sm:$0xff] }
 0x3f1   :  { %3419 = vmatpush1.bf16.msra.mxu0 %v1917_v34  ;;  %3322 = vmatprep.subr.bf16.mxu1 %v2628_v41  ;;  %v1743_v34 = vld [vmem:[#allocation2 + $0x170] sm:$0xff]  ;;  %v2006_v41 = vld [vmem:[#allocation2 + $0x9a8] sm:$0xff] }
 0x3f2   :  { %3420 = vmatprep.subr.bf16.mxu0 %v1926_v1  ;;  %v1752_v1 = vld [vmem:[#allocation2 + $0x1b8] sm:$0xff] }
 0x3f4   :  { %3323 = vmatpush1.bf16.msra.mxu1 %v2627_v10  ;;  %v2005_v10 = vld [vmem:[#allocation2 + $0x9a0] sm:$0xff] }
 0x3f5   :  { %3421 = vmatpush1.bf16.msra.mxu0 %v1925_v45  ;;  %3324 = vmatprep.subr.bf16.mxu1 %v2636_v46  ;;  %v1751_v45 = vld [vmem:[#allocation2 + $0x1b0] sm:$0xff]  ;;  %v2014_v46 = vld [vmem:[#allocation2 + $0x9e8] sm:$0xff] }
 0x3f6   :  { %3422 = vmatprep.subr.bf16.mxu0 %v1934_v48  ;;  %v1760_v48 = vld [vmem:[#allocation2 + $0x1f8] sm:$0xff] }
 0x3f8   :  { %3325 = vmatpush1.bf16.msra.mxu1 %v2635_v8  ;;  %v2013_v8 = vld [vmem:[#allocation2 + $0x9e0] sm:$0xff] }
 0x3f9   :  { %3423 = vmatpush1.bf16.msra.mxu0 %v1933_v53  ;;  %3326 = vmatprep.subr.bf16.mxu1 %v2644_v52  ;;  %v1759_v53 = vld [vmem:[#allocation2 + $0x1f0] sm:$0xff]  ;;  %v2022_v52 = vld [vmem:[#allocation2 + $0xa28] sm:$0xff] }
 0x3fa   :  { %3424 = vmatprep.subr.bf16.mxu0 %v1942_v57  ;;  %v1768_v57 = vld [vmem:[#allocation2 + $0x238] sm:$0xff] }
 0x3fc   :  { %3327 = vmatpush1.bf16.msra.mxu1 %v2643_v63  ;;  %v2021_v63 = vld [vmem:[#allocation2 + $0xa20] sm:$0xff] }
 0x3fd   :  { %3425 = vmatpush1.bf16.msra.mxu0 %v1941_v31  ;;  %3328 = vmatprep.subr.bf16.mxu1 %v2652_v50  ;;  %v1767_v31 = vld [vmem:[#allocation2 + $0x230] sm:$0xff]  ;;  %v2030_v50 = vld [vmem:[#allocation2 + $0xa68] sm:$0xff] }
 0x3fe   :  { %3426 = vmatprep.subr.bf16.mxu0 %v1950_v54  ;;  %v1776_v54 = vld [vmem:[#allocation2 + $0x278] sm:$0xff] }
 0x400   :  { %3329 = vmatpush1.bf16.msra.mxu1 %v2651_v3  ;;  %v2029_v3 = vld [vmem:[#allocation2 + $0xa60] sm:$0xff] }
 0x401   :  { %3427 = vmatpush1.bf16.msra.mxu0 %v1949_v23  ;;  %3683 = vmatprep.subr.bf16.mxu1 %v1704_v13  ;;  %v1775_v23 = vld [vmem:[#allocation2 + $0x270] sm:$0xff]  ;;  %v1784_v13 = vld [vmem:[#allocation2 + $0x2b8] sm:$0xff] }
 0x402   :  { %3437 = vmatprep.subr.bf16.mxu0 %v1958_v12  ;;  %v2038_v12 = vld [vmem:[#allocation2 + $0xaa8] sm:$0xff] }
 0x403   :  { %3347 = vmatmul.mubr.bf16.vlgmr.msra.gmra.mrb[40].mxu1 %v5481_v16 }
 0x404   :  { %3429 = vmatmul.mubr.bf16.vlgmr.msra.gmra.mrb[28].mxu0 %v5396_v30  ;;  %3684 = vmatpush1.bf16.msra.mxu1 %v1703_v15  ;;  %v1783_v15 = vld [vmem:[#allocation2 + $0x2b0] sm:$0xff] }
 0x405   :  { %3438 = vmatpush1.bf16.msra.mxu0 %v1957_v58  ;;  %3685 = vmatprep.subr.bf16.mxu1 %v1712_v25  ;;  %v2037_v58 = vld [vmem:[#allocation2 + $0xaa0] sm:$0xff]  ;;  %v1792_v25 = vld [vmem:[#allocation2 + $0x2f8] sm:$0xff] }
 0x406   :  { %3439 = vmatprep.subr.bf16.mxu0 %v1966_v17  ;;  %3469 = vmatprep.mubr.bf16.mxu0 %v5287_v5  ;;  %v2046_v17 = vld [vmem:[#allocation2 + $0xae8] sm:$0xff] }
 0x407   :  { %3715 = vmatprep.mubr.bf16.mxu1 %v5394_v28  ;;  %v1989_v28 = vld [vmem:[#allocation2 + $0x920] sm:$0xff] }
 0x408   :  { %3686 = vmatpush1.bf16.msra.mxu1 %v1711_v14  ;;  %v1791_v14 = vld [vmem:[#allocation2 + $0x2f0] sm:$0xff] }
 0x409   :  { %3440 = vmatpush1.bf16.msra.mxu0 %v1965_v9  ;;  %3687 = vmatprep.subr.bf16.mxu1 %v1720_v39  ;;  %v2045_v9 = vld [vmem:[#allocation2 + $0xae0] sm:$0xff]  ;;  %v1800_v39 = vld [vmem:[#allocation2 + $0x338] sm:$0xff] }
 0x40a   :  { %3441 = vmatprep.subr.bf16.mxu0 %v1974_v22  ;;  %v2054_v22 = vld [vmem:[#allocation2 + $0xb28] sm:$0xff] }
 0x40c   :  { %3688 = vmatpush1.bf16.msra.mxu1 %v1719_v62  ;;  %v1799_v62 = vld [vmem:[#allocation2 + $0x330] sm:$0xff] }
 0x40d   :  { %3442 = vmatpush1.bf16.msra.mxu0 %v1973_v56  ;;  %3689 = vmatprep.subr.bf16.mxu1 %v1728_v49  ;;  %v2053_v56 = vld [vmem:[#allocation2 + $0xb20] sm:$0xff]  ;;  %v1808_v49 = vld [vmem:[#allocation2 + $0x378] sm:$0xff] }
 0x40e   :  { %3443 = vmatprep.subr.bf16.mxu0 %v1982_v42  ;;  %v2062_v42 = vld [vmem:[#allocation2 + $0xb68] sm:$0xff] }
 0x410   :  { %3690 = vmatpush1.bf16.msra.mxu1 %v1727_v47  ;;  %v1807_v47 = vld [vmem:[#allocation2 + $0x370] sm:$0xff] }
 0x411   :  { %3444 = vmatpush1.bf16.msra.mxu0 %v1981_v51  ;;  %3691 = vmatprep.subr.bf16.mxu1 %v1736_v59  ;;  %v2061_v51 = vld [vmem:[#allocation2 + $0xb60] sm:$0xff]  ;;  %v1816_v59 = vld [vmem:[#allocation2 + $0x3b8] sm:$0xff] }
 0x412   :  { %3445 = vmatprep.subr.bf16.mxu0 %v1990_v4  ;;  %v2070_v4 = vld [vmem:[#allocation2 + $0xba8] sm:$0xff] }
 0x414   :  { %3692 = vmatpush1.bf16.msra.mxu1 %v1735_v29  ;;  %v1815_v29 = vld [vmem:[#allocation2 + $0x3b0] sm:$0xff] }
 0x415   :  { %3446 = vmatpush1.bf16.msra.mxu0 %v1989_v28  ;;  %3693 = vmatprep.subr.bf16.mxu1 %v1744_v32  ;;  %v2069_v28 = vld [vmem:[#allocation2 + $0xba0] sm:$0xff]  ;;  %v1824_v32 = vld [vmem:[#allocation2 + $0x3f8] sm:$0xff] }
 0x416   :  { %3447 = vmatprep.subr.bf16.mxu0 %v1998_v60  ;;  %v2078_v60 = vld [vmem:[#allocation2 + $0xbe8] sm:$0xff] }
 0x418   :  { %3694 = vmatpush1.bf16.msra.mxu1 %v1743_v34  ;;  %v1823_v34 = vld [vmem:[#allocation2 + $0x3f0] sm:$0xff] }
 0x419   :  { %3448 = vmatpush1.bf16.msra.mxu0 %v1997_v33  ;;  %3695 = vmatprep.subr.bf16.mxu1 %v1752_v1  ;;  %v2077_v33 = vld [vmem:[#allocation2 + $0xbe0] sm:$0xff]  ;;  %v1832_v1 = vld [vmem:[#allocation2 + $0x438] sm:$0xff] }
 0x41a   :  { %3449 = vmatprep.subr.bf16.mxu0 %v2006_v41  ;;  %v2086_v41 = vld [vmem:[#allocation2 + $0xc28] sm:$0xff] }
 0x41c   :  { %3696 = vmatpush1.bf16.msra.mxu1 %v1751_v45  ;;  %v1831_v45 = vld [vmem:[#allocation2 + $0x430] sm:$0xff] }
 0x41d   :  { %3450 = vmatpush1.bf16.msra.mxu0 %v2005_v10  ;;  %3697 = vmatprep.subr.bf16.mxu1 %v1760_v48  ;;  %v2085_v10 = vld [vmem:[#allocation2 + $0xc20] sm:$0xff]  ;;  %v1840_v48 = vld [vmem:[#allocation2 + $0x478] sm:$0xff] }
 0x41e   :  { %3451 = vmatprep.subr.bf16.mxu0 %v2014_v46  ;;  %v2094_v46 = vld [vmem:[#allocation2 + $0xc68] sm:$0xff] }
 0x420   :  { %3698 = vmatpush1.bf16.msra.mxu1 %v1759_v53  ;;  %v1839_v53 = vld [vmem:[#allocation2 + $0x470] sm:$0xff] }
 0x421   :  { %3452 = vmatpush1.bf16.msra.mxu0 %v2013_v8  ;;  %3699 = vmatprep.subr.bf16.mxu1 %v1768_v57  ;;  %v2093_v8 = vld [vmem:[#allocation2 + $0xc60] sm:$0xff]  ;;  %v1848_v57 = vld [vmem:[#allocation2 + $0x4b8] sm:$0xff] }
 0x422   :  { %3453 = vmatprep.subr.bf16.mxu0 %v2022_v52  ;;  %v2102_v52 = vld [vmem:[#allocation2 + $0xca8] sm:$0xff] }
 0x424   :  { %3700 = vmatpush1.bf16.msra.mxu1 %v1767_v31  ;;  %v1847_v31 = vld [vmem:[#allocation2 + $0x4b0] sm:$0xff] }
 0x425   :  { %3454 = vmatpush1.bf16.msra.mxu0 %v2021_v63  ;;  %3701 = vmatprep.subr.bf16.mxu1 %v1776_v54  ;;  %v2101_v63 = vld [vmem:[#allocation2 + $0xca0] sm:$0xff] }
 0x426   :  { %3455 = vmatprep.subr.bf16.mxu0 %v2030_v50  ;;  %v2110_v50 = vld [vmem:[#allocation2 + $0xce8] sm:$0xff]  ;;  %v2109_v54 = vld [vmem:[#allocation2 + $0xce0] sm:$0xff] }
 0x428   :  { %3702 = vmatpush1.bf16.msra.mxu1 %v1775_v23  ;;  %v5529_v23 = vld [vmem:[#allocation11 + $0x5] sm:$0xff] }
 0x429   :  { %3456 = vmatpush1.bf16.msra.mxu0 %v2029_v3  ;;  %3703 = vmatprep.subr.bf16.mxu1 %v1784_v13  ;;  %v1855_v3 = vld [vmem:[#allocation2 + $0x4f0] sm:$0xff]  ;;  %v1864_v13 = vld [vmem:[#allocation2 + $0x538] sm:$0xff] }
 0x42a   :  { %3457 = vmatprep.subr.bf16.mxu0 %v2038_v12  ;;  %v2118_v12 = vld [vmem:[#allocation2 + $0xd28] sm:$0xff] }
 0x42c   :  { %3704 = vmatpush1.bf16.msra.mxu1 %v1783_v15  ;;  %v1863_v15 = vld [vmem:[#allocation2 + $0x530] sm:$0xff] }
 0x42d   :  { %3458 = vmatpush1.bf16.msra.mxu0 %v2037_v58  ;;  %3705 = vmatprep.subr.bf16.mxu1 %v1792_v25  ;;  %v2117_v58 = vld [vmem:[#allocation2 + $0xd20] sm:$0xff]  ;;  %v2126_v25 = vld [vmem:[#allocation2 + $0xd68] sm:$0xff] }
 0x42e   :  { %3459 = vmatprep.subr.bf16.mxu0 %v2046_v17  ;;  %v2666_v17 = vrot.slane %v5529_v23, %v5317_v24 }
 0x430   :  { %3706 = vmatpush1.bf16.msra.mxu1 %v1791_v14 }
 0x431   :  { %3460 = vmatpush1.bf16.msra.mxu0 %v2045_v9  ;;  %3707 = vmatprep.subr.bf16.mxu1 %v1800_v39  ;;  %v1872_v9 = vld [vmem:[#allocation2 + $0x578] sm:$0xff]  ;;  %v1871_v39 = vld [vmem:[#allocation2 + $0x570] sm:$0xff] }
 0x432   :  { %3461 = vmatprep.subr.bf16.mxu0 %v2054_v22  ;;  %v2125_v22 = vld [vmem:[#allocation2 + $0xd60] sm:$0xff] }
 0x434   :  { %3708 = vmatpush1.bf16.msra.mxu1 %v1799_v62 }
 0x435   :  { %3462 = vmatpush1.bf16.msra.mxu0 %v2053_v56  ;;  %3709 = vmatprep.subr.bf16.mxu1 %v1808_v49  ;;  %v2736_v56 = vadd.f32 %v5503_v61, %v2666_v17  ;;  %v1880_v49 = vld [vmem:[#allocation2 + $0x5b8] sm:$0xff]  ;;  %v2190_v17 = vld [vmem:[#allocation2 + $0xf68] sm:$0xff] }
 0x436   :  { %3463 = vmatprep.subr.bf16.mxu0 %v2062_v42  ;;  %v2134_v42 = vld [vmem:[#allocation2 + $0xda8] sm:$0xff] }
 0x438   :  { %3710 = vmatpush1.bf16.msra.mxu1 %v1807_v47 }
 0x439   :  { %3464 = vmatpush1.bf16.msra.mxu0 %v2061_v51  ;;  %3711 = vmatprep.subr.bf16.mxu1 %v1816_v59 }
 0x43a   :  { %3465 = vmatprep.subr.bf16.mxu0 %v2070_v4 }
 0x43c   :  { %3712 = vmatpush1.bf16.msra.mxu1 %v1815_v29  ;;  %v2133_v29 = vld [vmem:[#allocation2 + $0xda0] sm:$0xff] }
 0x43d   :  { %3466 = vmatpush1.bf16.msra.mxu0 %v2069_v28  ;;  %3713 = vmatprep.subr.bf16.mxu1 %v1824_v32  ;;  %v2142_v32 = vld [vmem:[#allocation2 + $0xde8] sm:$0xff] }
 0x43e   :  { %3467 = vmatprep.subr.bf16.mxu0 %v2078_v60  ;;  %v1879_v60 = vld [vmem:[#allocation2 + $0x5b0] sm:$0xff] }
 0x440   :  { %3714 = vmatpush1.bf16.msra.mxu1 %v1823_v34  ;;  %v2141_v34 = vld [vmem:[#allocation2 + $0xde0] sm:$0xff] }
 0x441   :  { %3468 = vmatpush1.bf16.msra.mxu0 %v2077_v33  ;;  %3724 = vmatprep.subr.bf16.mxu1 %v1832_v1  ;;  %v1888_v33 = vld [vmem:[#allocation2 + $0x5f8] sm:$0xff]  ;;  %v2150_v1 = vld [vmem:[#allocation2 + $0xe28] sm:$0xff] }
 0x442   :  { %3478 = vmatprep.subr.bf16.mxu0 %v2086_v41  ;;  %v1887_v41 = vld [vmem:[#allocation2 + $0x5f0] sm:$0xff] }
 0x443   :  { %3716 = vmatmul.mubr.bf16.vlgmr.msra.gmra.mrb[44].mxu1 %v5285_v2  ;;  %v1856_v2 = vld [vmem:[#allocation2 + $0x4f8] sm:$0xff] }
 0x444   :  { %3470 = vmatmul.mubr.bf16.vlgmr.msra.gmra.mrb[28].mxu0 %v5477_v26  ;;  %3725 = vmatpush1.bf16.msra.mxu1 %v1831_v45  ;;  %v2149_v45 = vld [vmem:[#allocation2 + $0xe20] sm:$0xff] }
 0x445   :  { %3479 = vmatpush1.bf16.msra.mxu0 %v2085_v10  ;;  %3726 = vmatprep.subr.bf16.mxu1 %v1840_v48  ;;  %v1896_v10 = vld [vmem:[#allocation2 + $0x638] sm:$0xff]  ;;  %v2158_v48 = vld [vmem:[#allocation2 + $0xe68] sm:$0xff] }
 0x446   :  { %3480 = vmatprep.subr.bf16.mxu0 %v2094_v46  ;;  %3510 = vmatprep.mubr.bf16.mxu0 %v5400_v43  ;;  %v1895_v46 = vld [vmem:[#allocation2 + $0x630] sm:$0xff] }
 0x447   :  { %3756 = vmatprep.mubr.bf16.mxu1 %v5452_v35  ;;  %v2662_v35 = vrot.slane %v5529_v23, %v5261_v38 }
 0x448   :  { %3727 = vmatpush1.bf16.msra.mxu1 %v1839_v53  ;;  %v2157_v53 = vld [vmem:[#allocation2 + $0xe60] sm:$0xff] }
 0x449   :  { %3481 = vmatpush1.bf16.msra.mxu0 %v2093_v8  ;;  %3728 = vmatprep.subr.bf16.mxu1 %v1848_v57  ;;  %v2734_v14 = vadd.f32 %v5501_v21, %v2662_v35  ;;  %v1904_v8 = vld [vmem:[#allocation2 + $0x678] sm:$0xff]  ;;  %v2166_v57 = vld [vmem:[#allocation2 + $0xea8] sm:$0xff] }
 0x44a   :  { %3482 = vmatprep.subr.bf16.mxu0 %v2102_v52  ;;  %v1903_v52 = vld [vmem:[#allocation2 + $0x670] sm:$0xff]  ;;  %v1928_v35 = vld [vmem:[#allocation2 + $0x738] sm:$0xff] }
 0x44c   :  { %3729 = vmatpush1.bf16.msra.mxu1 %v1847_v31  ;;  %v2165_v31 = vld [vmem:[#allocation2 + $0xea0] sm:$0xff] }
 0x44d   :  { %3483 = vmatpush1.bf16.msra.mxu0 %v2101_v63  ;;  %3730 = vmatprep.subr.bf16.mxu1 %v1856_v2  ;;  %v1912_v63 = vld [vmem:[#allocation2 + $0x6b8] sm:$0xff]  ;;  %v2174_v2 = vld [vmem:[#allocation2 + $0xee8] sm:$0xff] }
 0x44e   :  { %3484 = vmatprep.subr.bf16.mxu0 %v2110_v50  ;;  %v1911_v50 = vld [vmem:[#allocation2 + $0x6b0] sm:$0xff] }
 0x450   :  { %3731 = vmatpush1.bf16.msra.mxu1 %v1855_v3  ;;  %v2173_v3 = vld [vmem:[#allocation2 + $0xee0] sm:$0xff] }
 0x451   :  { %3485 = vmatpush1.bf16.msra.mxu0 %v2109_v54  ;;  %3732 = vmatprep.subr.bf16.mxu1 %v1864_v13  ;;  %v1920_v54 = vld [vmem:[#allocation2 + $0x6f8] sm:$0xff]  ;;  %v2182_v13 = vld [vmem:[#allocation2 + $0xf28] sm:$0xff] }
 0x452   :  { %3486 = vmatprep.subr.bf16.mxu0 %v2118_v12  ;;  %v1919_v12 = vld [vmem:[#allocation2 + $0x6f0] sm:$0xff] }
 0x454   :  { %3733 = vmatpush1.bf16.msra.mxu1 %v1863_v15  ;;  %v1927_v15 = vld [vmem:[#allocation2 + $0x730] sm:$0xff] }
 0x455   :  { %3487 = vmatpush1.bf16.msra.mxu0 %v2117_v58  ;;  %3734 = vmatprep.subr.bf16.mxu1 %v1872_v9  ;;  %v2181_v58 = vld [vmem:[#allocation2 + $0xf20] sm:$0xff] }
 0x456   :  { %3488 = vmatprep.subr.bf16.mxu0 %v2126_v25  ;;  %v1936_v25 = vld [vmem:[#allocation2 + $0x778] sm:$0xff]  ;;  %v2189_v9 = vld [vmem:[#allocation2 + $0xf60] sm:$0xff] }
 0x457   :  { %v3020_v62 = vpop.f32.mrb[24].mxu0 }
 0x458   :  { %v5537_v51 = vadd.f32 %v3020_v62, %v2734_v14  ;;  %v3022_v47 = vpop.f32.mrb[25].mxu0  ;;  %3735 = vmatpush1.bf16.msra.mxu1 %v1871_v39  ;;  %v1935_v14 = vld [vmem:[#allocation2 + $0x770] sm:$0xff]  ;;  %v1944_v39 = vld [vmem:[#allocation2 + $0x7b8] sm:$0xff] }
 0x459   :  { %v5539_v4 = vadd.f32 %v3022_v47, %v2736_v56  ;;  %v3024_v59 = vpop.f32.mrb[26].mxu0  ;;  %3489 = vmatpush1.bf16.msra.mxu0 %v2125_v22  ;;  %3736 = vmatprep.subr.bf16.mxu1 %v1880_v49  ;;  %v2198_v22 = vld [vmem:[#allocation2 + $0xfa8] sm:$0xff]  ;;  %v2197_v56 = vld [vmem:[#allocation2 + $0xfa0] sm:$0xff]  ;;  %v1943_v62 = vld [vmem:[#allocation2 + $0x7b0] sm:$0xff] }
 0x45a   :  { %v4011_v28 = vmax.f32 %v5537_v51, 0.0  ;;  %v3025_v21 = vpop.f32.mrb[27].mxu0  ;;  %3490 = vmatprep.subr.bf16.mxu0 %v2134_v42  ;;  %v2206_v42 = vld [vmem:[#allocation2 + $0xfe8] sm:$0xff]  ;;  %v1952_v49 = vld [vmem:[#allocation2 + $0x7f8] sm:$0xff]  ;;  %v2205_v47 = vld [vmem:[#allocation2 + $0xfe0] sm:$0xff] }
 0x45b   :  { %v4012_v61 = vmax.f32 %v5539_v4, 0.0  ;;  %v1951_v59 = vld [vmem:[#allocation2 + $0x7f0] sm:$0xff]  ;;  %v2214_v21 = vld [vmem:[#allocation2 + $0x1028] sm:$0xff] }
 0x45c   :  { %3737 = vmatpush1.bf16.msra.mxu1 %v1879_v60  ;;  %v2213_v60 = vld [vmem:[#allocation2 + $0x1020] sm:$0xff] }
 0x45d   :  { %3491 = vmatpush1.bf16.msra.mxu0 %v2133_v29  ;;  %3738 = vmatprep.subr.bf16.mxu1 %v1888_v33  ;;  %v1960_v29 = vld [vmem:[#allocation2 + $0x838] sm:$0xff]  ;;  %v2222_v33 = vld [vmem:[#allocation2 + $0x1068] sm:$0xff] }
 0x45e   :  { %3492 = vmatprep.subr.bf16.mxu0 %v2142_v32  ;;  %v1959_v32 = vld [vmem:[#allocation2 + $0x830] sm:$0xff] }
 0x460   :  { %3739 = vmatpush1.bf16.msra.mxu1 %v1887_v41  ;;  %v2221_v41 = vld [vmem:[#allocation2 + $0x1060] sm:$0xff] }
 0x461   :  { %3493 = vmatpush1.bf16.msra.mxu0 %v2141_v34  ;;  %3740 = vmatprep.subr.bf16.mxu1 %v1896_v10  ;;  %v1968_v34 = vld [vmem:[#allocation2 + $0x878] sm:$0xff]  ;;  %v2230_v10 = vld [vmem:[#allocation2 + $0x10a8] sm:$0xff] }
 0x462   :  { %3494 = vmatprep.subr.bf16.mxu0 %v2150_v1  ;;  %v1967_v1 = vld [vmem:[#allocation2 + $0x870] sm:$0xff] }
 0x464   :  { %3741 = vmatpush1.bf16.msra.mxu1 %v1895_v46  ;;  %v2229_v46 = vld [vmem:[#allocation2 + $0x10a0] sm:$0xff] }
 0x465   :  { %3495 = vmatpush1.bf16.msra.mxu0 %v2149_v45  ;;  %3742 = vmatprep.subr.bf16.mxu1 %v1904_v8  ;;  %v1976_v45 = vld [vmem:[#allocation2 + $0x8b8] sm:$0xff]  ;;  %v2238_v8 = vld [vmem:[#allocation2 + $0x10e8] sm:$0xff] }
 0x466   :  { %3496 = vmatprep.subr.bf16.mxu0 %v2158_v48  ;;  %v1975_v48 = vld [vmem:[#allocation2 + $0x8b0] sm:$0xff] }
 0x468   :  { %3743 = vmatpush1.bf16.msra.mxu1 %v1903_v52  ;;  %v1983_v52 = vld [vmem:[#allocation2 + $0x8f0] sm:$0xff] }
 0x469   :  { %3497 = vmatpush1.bf16.msra.mxu0 %v2157_v53  ;;  %3744 = vmatprep.subr.bf16.mxu1 %v1912_v63  ;;  %v2237_v53 = vld [vmem:[#allocation2 + $0x10e0] sm:$0xff]  ;;  %v1992_v63 = vld [vmem:[#allocation2 + $0x938] sm:$0xff] }
 0x46a   :  { %3498 = vmatprep.subr.bf16.mxu0 %v2166_v57  ;;  %v2246_v57 = vld [vmem:[#allocation2 + $0x1128] sm:$0xff] }
 0x46c   :  { %3745 = vmatpush1.bf16.msra.mxu1 %v1911_v50  ;;  %v2254_v50 = vld [vmem:[#allocation2 + $0x1168] sm:$0xff] }
 0x46d   :  { %3499 = vmatpush1.bf16.msra.mxu0 %v2165_v31  ;;  %3746 = vmatprep.subr.bf16.mxu1 %v1920_v54  ;;  %v1991_v31 = vld [vmem:[#allocation2 + $0x930] sm:$0xff]  ;;  %v2253_v54 = vld [vmem:[#allocation2 + $0x1160] sm:$0xff] }
 0x46e   :  { %3500 = vmatprep.subr.bf16.mxu0 %v2174_v2  ;;  %v2000_v2 = vld [vmem:[#allocation2 + $0x978] sm:$0xff] }
 0x470   :  { %3747 = vmatpush1.bf16.msra.mxu1 %v1919_v12  ;;  %v2262_v12 = vld [vmem:[#allocation2 + $0x11a8] sm:$0xff] }
 0x471   :  { %3501 = vmatpush1.bf16.msra.mxu0 %v2173_v3  ;;  %3748 = vmatprep.subr.bf16.mxu1 %v1928_v35  ;;  %v1999_v3 = vld [vmem:[#allocation2 + $0x970] sm:$0xff]  ;;  %v2261_v35 = vld [vmem:[#allocation2 + $0x11a0] sm:$0xff] }
 0x472   :  { %3502 = vmatprep.subr.bf16.mxu0 %v2182_v13  ;;  %v2008_v13 = vld [vmem:[#allocation2 + $0x9b8] sm:$0xff] }
 0x474   :  { %3749 = vmatpush1.bf16.msra.mxu1 %v1927_v15  ;;  %v2270_v15 = vld [vmem:[#allocation2 + $0x11e8] sm:$0xff] }
 0x475   :  { %3503 = vmatpush1.bf16.msra.mxu0 %v2181_v58  ;;  %3750 = vmatprep.subr.bf16.mxu1 %v1936_v25  ;;  %v2007_v58 = vld [vmem:[#allocation2 + $0x9b0] sm:$0xff]  ;;  %v2269_v25 = vld [vmem:[#allocation2 + $0x11e0] sm:$0xff] }
 0x476   :  { %3504 = vmatprep.subr.bf16.mxu0 %v2190_v17  ;;  %v2016_v17 = vld [vmem:[#allocation2 + $0x9f8] sm:$0xff] }
 0x478   :  { %3751 = vmatpush1.bf16.msra.mxu1 %v1935_v14  ;;  %v2278_v14 = vld [vmem:[#allocation2 + $0x1228] sm:$0xff] }
 0x479   :  { %3505 = vmatpush1.bf16.msra.mxu0 %v2189_v9  ;;  %3752 = vmatprep.subr.bf16.mxu1 %v1944_v39  ;;  %v2015_v9 = vld [vmem:[#allocation2 + $0x9f0] sm:$0xff]  ;;  %v2277_v39 = vld [vmem:[#allocation2 + $0x1220] sm:$0xff] }
 0x47a   :  { %3506 = vmatprep.subr.bf16.mxu0 %v2198_v22  ;;  %v2024_v22 = vld [vmem:[#allocation2 + $0xa38] sm:$0xff] }
 0x47c   :  { %3753 = vmatpush1.bf16.msra.mxu1 %v1943_v62  ;;  %v2286_v62 = vld [vmem:[#allocation2 + $0x1268] sm:$0xff] }
 0x47d   :  { %3507 = vmatpush1.bf16.msra.mxu0 %v2197_v56  ;;  %3754 = vmatprep.subr.bf16.mxu1 %v1952_v49  ;;  %v2023_v56 = vld [vmem:[#allocation2 + $0xa30] sm:$0xff]  ;;  %v2285_v49 = vld [vmem:[#allocation2 + $0x1260] sm:$0xff] }
 0x47e   :  { %3508 = vmatprep.subr.bf16.mxu0 %v2206_v42  ;;  %v2032_v42 = vld [vmem:[#allocation2 + $0xa78] sm:$0xff] }
 0x480   :  { %3755 = vmatpush1.bf16.msra.mxu1 %v1951_v59  ;;  %v2294_v59 = vld [vmem:[#allocation2 + $0x12a8] sm:$0xff] }
 0x481   :  { %3509 = vmatpush1.bf16.msra.mxu0 %v2205_v47  ;;  %3765 = vmatprep.subr.bf16.mxu1 %v1960_v29  ;;  %v2031_v47 = vld [vmem:[#allocation2 + $0xa70] sm:$0xff]  ;;  %v2293_v29 = vld [vmem:[#allocation2 + $0x12a0] sm:$0xff] }
 0x482   :  { %3519 = vmatprep.subr.bf16.mxu0 %v2214_v21  ;;  %v2040_v21 = vld [vmem:[#allocation2 + $0xab8] sm:$0xff] }
 0x483   :  { %3757 = vmatmul.mubr.bf16.vlgmr.msra.gmra.mrb[44].mxu1 %v5396_v30  ;;  %v1984_v30 = vld [vmem:[#allocation2 + $0x8f8] sm:$0xff] }
 0x484   :  { %3511 = vmatmul.mubr.bf16.vlgmr.msra.gmra.mrb[28].mxu0 %v5398_v36  ;;  %3766 = vmatpush1.bf16.msra.mxu1 %v1959_v32  ;;  %v2302_v32 = vld [vmem:[#allocation2 + $0x12e8] sm:$0xff] }
 0x485   :  { %3520 = vmatpush1.bf16.msra.mxu0 %v2213_v60  ;;  %3767 = vmatprep.subr.bf16.mxu1 %v1968_v34  ;;  %v2039_v60 = vld [vmem:[#allocation2 + $0xab0] sm:$0xff]  ;;  %v2301_v34 = vld [vmem:[#allocation2 + $0x12e0] sm:$0xff] }
 0x486   :  { %3521 = vmatprep.subr.bf16.mxu0 %v2222_v33  ;;  %3551 = vmatprep.mubr.bf16.mxu0 %v5479_v27  ;;  %v2048_v33 = vld [vmem:[#allocation2 + $0xaf8] sm:$0xff] }
 0x487   :  { %3797 = vmatprep.mubr.bf16.mxu1 %v5287_v5  ;;  %v2245_v5 = vld [vmem:[#allocation2 + $0x1120] sm:$0xff] }
 0x488   :  { %3768 = vmatpush1.bf16.msra.mxu1 %v1967_v1  ;;  %v2310_v1 = vld [vmem:[#allocation2 + $0x1328] sm:$0xff] }
 0x489   :  { %3522 = vmatpush1.bf16.msra.mxu0 %v2221_v41  ;;  %3769 = vmatprep.subr.bf16.mxu1 %v1976_v45  ;;  %v2047_v41 = vld [vmem:[#allocation2 + $0xaf0] sm:$0xff]  ;;  %v2309_v45 = vld [vmem:[#allocation2 + $0x1320] sm:$0xff] }
 0x48a   :  { %3523 = vmatprep.subr.bf16.mxu0 %v2230_v10  ;;  %v2056_v10 = vld [vmem:[#allocation2 + $0xb38] sm:$0xff] }
 0x48c   :  { %3770 = vmatpush1.bf16.msra.mxu1 %v1975_v48  ;;  %v2318_v48 = vld [vmem:[#allocation2 + $0x1368] sm:$0xff] }
 0x48d   :  { %3524 = vmatpush1.bf16.msra.mxu0 %v2229_v46  ;;  %3771 = vmatprep.subr.bf16.mxu1 %v1984_v30  ;;  %v2055_v46 = vld [vmem:[#allocation2 + $0xb30] sm:$0xff]  ;;  %v2317_v30 = vld [vmem:[#allocation2 + $0x1360] sm:$0xff] }
 0x48e   :  { %3525 = vmatprep.subr.bf16.mxu0 %v2238_v8  ;;  %v2064_v8 = vld [vmem:[#allocation2 + $0xb78] sm:$0xff] }
 0x490   :  { %3772 = vmatpush1.bf16.msra.mxu1 %v1983_v52  ;;  %v2326_v52 = vld [vmem:[#allocation2 + $0x13a8] sm:$0xff] }
 0x491   :  { %3526 = vmatpush1.bf16.msra.mxu0 %v2237_v53  ;;  %3773 = vmatprep.subr.bf16.mxu1 %v1992_v63  ;;  %v2063_v53 = vld [vmem:[#allocation2 + $0xb70] sm:$0xff]  ;;  %v2325_v63 = vld [vmem:[#allocation2 + $0x13a0] sm:$0xff] }
 0x492   :  { %3527 = vmatprep.subr.bf16.mxu0 %v2246_v57  ;;  %v2072_v57 = vld [vmem:[#allocation2 + $0xbb8] sm:$0xff] }
 0x494   :  { %3774 = vmatpush1.bf16.msra.mxu1 %v1991_v31  ;;  %v2334_v31 = vld [vmem:[#allocation2 + $0x13e8] sm:$0xff] }
 0x495   :  { %3528 = vmatpush1.bf16.msra.mxu0 %v2245_v5  ;;  %3775 = vmatprep.subr.bf16.mxu1 %v2000_v2  ;;  %v2071_v5 = vld [vmem:[#allocation2 + $0xbb0] sm:$0xff]  ;;  %v2333_v2 = vld [vmem:[#allocation2 + $0x13e0] sm:$0xff] }
 0x496   :  { %3529 = vmatprep.subr.bf16.mxu0 %v2254_v50  ;;  %v2080_v50 = vld [vmem:[#allocation2 + $0xbf8] sm:$0xff] }
 0x498   :  { %3776 = vmatpush1.bf16.msra.mxu1 %v1999_v3  ;;  %v2342_v3 = vld [vmem:[#allocation2 + $0x1428] sm:$0xff] }
 0x499   :  { %3530 = vmatpush1.bf16.msra.mxu0 %v2253_v54  ;;  %3777 = vmatprep.subr.bf16.mxu1 %v2008_v13  ;;  %v2079_v54 = vld [vmem:[#allocation2 + $0xbf0] sm:$0xff]  ;;  %v2341_v13 = vld [vmem:[#allocation2 + $0x1420] sm:$0xff] }
 0x49a   :  { %3531 = vmatprep.subr.bf16.mxu0 %v2262_v12  ;;  %v2088_v12 = vld [vmem:[#allocation2 + $0xc38] sm:$0xff] }
 0x49c   :  { %3778 = vmatpush1.bf16.msra.mxu1 %v2007_v58  ;;  %v2350_v58 = vld [vmem:[#allocation2 + $0x1468] sm:$0xff] }
 0x49d   :  { %3532 = vmatpush1.bf16.msra.mxu0 %v2261_v35  ;;  %3779 = vmatprep.subr.bf16.mxu1 %v2016_v17  ;;  %v2087_v35 = vld [vmem:[#allocation2 + $0xc30] sm:$0xff]  ;;  %v2349_v17 = vld [vmem:[#allocation2 + $0x1460] sm:$0xff] }
 0x49e   :  { %3533 = vmatprep.subr.bf16.mxu0 %v2270_v15  ;;  %v2096_v15 = vld [vmem:[#allocation2 + $0xc78] sm:$0xff] }
 0x4a0   :  { %3780 = vmatpush1.bf16.msra.mxu1 %v2015_v9  ;;  %v2358_v9 = vld [vmem:[#allocation2 + $0x14a8] sm:$0xff] }
 0x4a1   :  { %3534 = vmatpush1.bf16.msra.mxu0 %v2269_v25  ;;  %3781 = vmatprep.subr.bf16.mxu1 %v2024_v22  ;;  %v2095_v25 = vld [vmem:[#allocation2 + $0xc70] sm:$0xff]  ;;  %v2357_v22 = vld [vmem:[#allocation2 + $0x14a0] sm:$0xff] }
 0x4a2   :  { %3535 = vmatprep.subr.bf16.mxu0 %v2278_v14  ;;  %v2104_v14 = vld [vmem:[#allocation2 + $0xcb8] sm:$0xff] }
 0x4a4   :  { %3782 = vmatpush1.bf16.msra.mxu1 %v2023_v56  ;;  %v2366_v56 = vld [vmem:[#allocation2 + $0x14e8] sm:$0xff] }
 0x4a5   :  { %3536 = vmatpush1.bf16.msra.mxu0 %v2277_v39  ;;  %3783 = vmatprep.subr.bf16.mxu1 %v2032_v42  ;;  %v2103_v39 = vld [vmem:[#allocation2 + $0xcb0] sm:$0xff] }
 0x4a6   :  { %3537 = vmatprep.subr.bf16.mxu0 %v2286_v62  ;;  %v2365_v62 = vld [vmem:[#allocation2 + $0x14e0] sm:$0xff]  ;;  %v2111_v42 = vld [vmem:[#allocation2 + $0xcf0] sm:$0xff] }
 0x4a8   :  { %3784 = vmatpush1.bf16.msra.mxu1 %v2031_v47  ;;  %v2120_v47 = vld [vmem:[#allocation2 + $0xd38] sm:$0xff] }
 0x4a9   :  { %3538 = vmatpush1.bf16.msra.mxu0 %v2285_v49  ;;  %3785 = vmatprep.subr.bf16.mxu1 %v2040_v21  ;;  %v2374_v49 = vld [vmem:[#allocation2 + $0x1528] sm:$0xff] }
 0x4aa   :  { %3539 = vmatprep.subr.bf16.mxu0 %v2294_v59  ;;  %v2119_v59 = vld [vmem:[#allocation2 + $0xd30] sm:$0xff]  ;;  %v2382_v21 = vld [vmem:[#allocation2 + $0x1568] sm:$0xff] }
 0x4ac   :  { %3786 = vmatpush1.bf16.msra.mxu1 %v2039_v60  ;;  %v2670_v60 = vrot.slane %v5529_v23, %v1638_v19 }
 0x4ad   :  { %3540 = vmatpush1.bf16.msra.mxu0 %v2293_v29  ;;  %3787 = vmatprep.subr.bf16.mxu1 %v2048_v33  ;;  %v2128_v29 = vld [vmem:[#allocation2 + $0xd78] sm:$0xff]  ;;  %v2381_v33 = vld [vmem:[#allocation2 + $0x1560] sm:$0xff] }
 0x4ae   :  { %3541 = vmatprep.subr.bf16.mxu0 %v2302_v32  ;;  %v2674_v32 = vrot.slane %v5529_v23, %v1642_v55  ;;  %v2389_v55 = vld [vmem:[#allocation2 + $0x15a0] sm:$0xff]  ;;  %v2135_v23 = vld [vmem:[#allocation2 + $0xdb0] sm:$0xff] }
 0x4b0   :  { %3788 = vmatpush1.bf16.msra.mxu1 %v2047_v41 }
 0x4b1   :  { %3542 = vmatpush1.bf16.msra.mxu0 %v2301_v34  ;;  %3789 = vmatprep.subr.bf16.mxu1 %v2056_v10  ;;  %v2127_v34 = vld [vmem:[#allocation2 + $0xd70] sm:$0xff]  ;;  %v2136_v10 = vld [vmem:[#allocation2 + $0xdb8] sm:$0xff] }
 0x4b2   :  { %3543 = vmatprep.subr.bf16.mxu0 %v2310_v1  ;;  %v2390_v1 = vld [vmem:[#allocation2 + $0x15a8] sm:$0xff] }
 0x4b4   :  { %3790 = vmatpush1.bf16.msra.mxu1 %v2055_v46 }
 0x4b5   :  { %3544 = vmatpush1.bf16.msra.mxu0 %v2309_v45  ;;  %3791 = vmatprep.subr.bf16.mxu1 %v2064_v8 }
 0x4b6   :  { %3545 = vmatprep.subr.bf16.mxu0 %v2318_v48 }
 0x4b8   :  { %3792 = vmatpush1.bf16.msra.mxu1 %v2063_v53 }
 0x4b9   :  { %3546 = vmatpush1.bf16.msra.mxu0 %v2317_v30  ;;  %3793 = vmatprep.subr.bf16.mxu1 %v2072_v57  ;;  %v2144_v57 = vld [vmem:[#allocation2 + $0xdf8] sm:$0xff] }
 0x4ba   :  { %3547 = vmatprep.subr.bf16.mxu0 %v2326_v52  ;;  %v2398_v52 = vld [vmem:[#allocation2 + $0x15e8] sm:$0xff] }
 0x4bc   :  { %3794 = vmatpush1.bf16.msra.mxu1 %v2071_v5  ;;  %v2143_v5 = vld [vmem:[#allocation2 + $0xdf0] sm:$0xff] }
 0x4bd   :  { %3548 = vmatpush1.bf16.msra.mxu0 %v2325_v63  ;;  %3795 = vmatprep.subr.bf16.mxu1 %v2080_v50  ;;  %v2397_v63 = vld [vmem:[#allocation2 + $0x15e0] sm:$0xff]  ;;  %v2152_v50 = vld [vmem:[#allocation2 + $0xe38] sm:$0xff] }
 0x4be   :  { %3549 = vmatprep.subr.bf16.mxu0 %v2334_v31  ;;  %v2406_v31 = vld [vmem:[#allocation2 + $0x1628] sm:$0xff] }
 0x4c0   :  { %3796 = vmatpush1.bf16.msra.mxu1 %v2079_v54  ;;  %v2151_v54 = vld [vmem:[#allocation2 + $0xe30] sm:$0xff] }
 0x4c1   :  { %3550 = vmatpush1.bf16.msra.mxu0 %v2333_v2  ;;  %3806 = vmatprep.subr.bf16.mxu1 %v2088_v12  ;;  %v2405_v2 = vld [vmem:[#allocation2 + $0x1620] sm:$0xff]  ;;  %v2160_v12 = vld [vmem:[#allocation2 + $0xe78] sm:$0xff] }
 0x4c2   :  { %3560 = vmatprep.subr.bf16.mxu0 %v2342_v3  ;;  %v2414_v3 = vld [vmem:[#allocation2 + $0x1668] sm:$0xff] }
 0x4c3   :  { %3798 = vmatmul.mubr.bf16.vlgmr.msra.gmra.mrb[44].mxu1 %v5477_v26  ;;  %v2112_v26 = vld [vmem:[#allocation2 + $0xcf8] sm:$0xff] }
 0x4c4   :  { %3552 = vmatmul.mubr.bf16.vlgmr.msra.gmra.mrb[28].mxu0 %v5456_v18  ;;  %3807 = vmatpush1.bf16.msra.mxu1 %v2087_v35  ;;  %v2159_v35 = vld [vmem:[#allocation2 + $0xe70] sm:$0xff] }
 0x4c5   :  { %3561 = vmatpush1.bf16.msra.mxu0 %v2341_v13  ;;  %3808 = vmatprep.subr.bf16.mxu1 %v2096_v15  ;;  %v2413_v13 = vld [vmem:[#allocation2 + $0x1660] sm:$0xff]  ;;  %v2168_v15 = vld [vmem:[#allocation2 + $0xeb8] sm:$0xff] }
 0x4c6   :  { %3562 = vmatprep.subr.bf16.mxu0 %v2350_v58  ;;  %3592 = vmatprep.mubr.bf16.mxu0 %v5404_v37  ;;  %v2422_v58 = vld [vmem:[#allocation2 + $0x16a8] sm:$0xff] }
 0x4c7   :  { %3838 = vmatprep.mubr.bf16.mxu1 %v5400_v43  ;;  %v2373_v43 = vld [vmem:[#allocation2 + $0x1520] sm:$0xff] }
 0x4c8   :  { %3809 = vmatpush1.bf16.msra.mxu1 %v2095_v25  ;;  %v2167_v25 = vld [vmem:[#allocation2 + $0xeb0] sm:$0xff] }
 0x4c9   :  { %3563 = vmatpush1.bf16.msra.mxu0 %v2349_v17  ;;  %3810 = vmatprep.subr.bf16.mxu1 %v2104_v14  ;;  %v2421_v17 = vld [vmem:[#allocation2 + $0x16a0] sm:$0xff]  ;;  %v2176_v14 = vld [vmem:[#allocation2 + $0xef8] sm:$0xff] }
 0x4ca   :  { %3564 = vmatprep.subr.bf16.mxu0 %v2358_v9  ;;  %v2430_v9 = vld [vmem:[#allocation2 + $0x16e8] sm:$0xff] }
 0x4cc   :  { %3811 = vmatpush1.bf16.msra.mxu1 %v2103_v39  ;;  %v2175_v39 = vld [vmem:[#allocation2 + $0xef0] sm:$0xff] }
 0x4cd   :  { %3565 = vmatpush1.bf16.msra.mxu0 %v2357_v22  ;;  %3812 = vmatprep.subr.bf16.mxu1 %v2112_v26  ;;  %v2429_v22 = vld [vmem:[#allocation2 + $0x16e0] sm:$0xff]  ;;  %v2184_v26 = vld [vmem:[#allocation2 + $0xf38] sm:$0xff] }
 0x4ce   :  { %3566 = vmatprep.subr.bf16.mxu0 %v2366_v56  ;;  %v2438_v56 = vld [vmem:[#allocation2 + $0x1728] sm:$0xff] }
 0x4d0   :  { %3813 = vmatpush1.bf16.msra.mxu1 %v2111_v42  ;;  %v2183_v42 = vld [vmem:[#allocation2 + $0xf30] sm:$0xff] }
 0x4d1   :  { %3567 = vmatpush1.bf16.msra.mxu0 %v2365_v62  ;;  %3814 = vmatprep.subr.bf16.mxu1 %v2120_v47  ;;  %v2437_v62 = vld [vmem:[#allocation2 + $0x1720] sm:$0xff]  ;;  %v2192_v47 = vld [vmem:[#allocation2 + $0xf78] sm:$0xff] }
 0x4d2   :  { %3568 = vmatprep.subr.bf16.mxu0 %v2374_v49  ;;  %v2446_v49 = vld [vmem:[#allocation2 + $0x1768] sm:$0xff] }
 0x4d4   :  { %3815 = vmatpush1.bf16.msra.mxu1 %v2119_v59  ;;  %v2191_v59 = vld [vmem:[#allocation2 + $0xf70] sm:$0xff] }
 0x4d5   :  { %3569 = vmatpush1.bf16.msra.mxu0 %v2373_v43  ;;  %3816 = vmatprep.subr.bf16.mxu1 %v2128_v29  ;;  %v2445_v43 = vld [vmem:[#allocation2 + $0x1760] sm:$0xff]  ;;  %v2200_v29 = vld [vmem:[#allocation2 + $0xfb8] sm:$0xff] }
 0x4d6   :  { %3570 = vmatprep.subr.bf16.mxu0 %v2382_v21  ;;  %v3348_v41 = vpop.f32.mrb[40].mxu1  ;;  %v2454_v21 = vld [vmem:[#allocation2 + $0x17a8] sm:$0xff] }
 0x4d7   :  { %v5557_v45 = vadd.f32 %v3348_v41, %v2670_v60  ;;  %v3350_v46 = vpop.f32.mrb[41].mxu1  ;;  %v2453_v60 = vld [vmem:[#allocation2 + $0x17a0] sm:$0xff] }
 0x4d8   :  { %v5559_v48 = vadd.f32 %v3350_v46, %v2674_v32  ;;  %v3352_v8 = vpop.f32.mrb[42].mxu1  ;;  %3817 = vmatpush1.bf16.msra.mxu1 %v2127_v34  ;;  %v2199_v32 = vld [vmem:[#allocation2 + $0xfb0] sm:$0xff]  ;;  %v2208_v34 = vld [vmem:[#allocation2 + $0xff8] sm:$0xff]  ;;  %v2461_v41 = vld [vmem:[#allocation2 + $0x17e0] sm:$0xff] }
 0x4d9   :  { %3571 = vmatpush1.bf16.msra.mxu0 %v2381_v33  ;;  %v4013_v19 = vmax.f32 %v5557_v45, 0.0  ;;  %v3353_v30 = vpop.f32.mrb[43].mxu1  ;;  %3818 = vmatprep.subr.bf16.mxu1 %v2136_v10  ;;  %v2462_v33 = vld [vmem:[#allocation2 + $0x17e8] sm:$0xff]  ;;  %v2216_v46 = vld [vmem:[#allocation2 + $0x1038] sm:$0xff]  ;;  %v2469_v8 = vld [vmem:[#allocation2 + $0x1820] sm:$0xff] }
 0x4da   :  { %3572 = vmatprep.subr.bf16.mxu0 %v2390_v1  ;;  %v4014_v53 = vmax.f32 %v5559_v48, 0.0  ;;  %v2207_v1 = vld [vmem:[#allocation2 + $0xff0] sm:$0xff]  ;;  %v2470_v10 = vld [vmem:[#allocation2 + $0x1828] sm:$0xff] }
 0x4db   :  { %v2215_v30 = vld [vmem:[#allocation2 + $0x1030] sm:$0xff] }
 0x4dc   :  { %3819 = vmatpush1.bf16.msra.mxu1 %v2135_v23  ;;  %v2224_v23 = vld [vmem:[#allocation2 + $0x1078] sm:$0xff] }
 0x4dd   :  { %3573 = vmatpush1.bf16.msra.mxu0 %v2389_v55  ;;  %3820 = vmatprep.subr.bf16.mxu1 %v2144_v57  ;;  %v2478_v55 = vld [vmem:[#allocation2 + $0x1868] sm:$0xff]  ;;  %v2223_v57 = vld [vmem:[#allocation2 + $0x1070] sm:$0xff] }
 0x4de   :  { %3574 = vmatprep.subr.bf16.mxu0 %v2398_v52  ;;  %v2477_v52 = vld [vmem:[#allocation2 + $0x1860] sm:$0xff] }
 0x4e0   :  { %3821 = vmatpush1.bf16.msra.mxu1 %v2143_v5  ;;  %v2232_v5 = vld [vmem:[#allocation2 + $0x10b8] sm:$0xff] }
 0x4e1   :  { %3575 = vmatpush1.bf16.msra.mxu0 %v2397_v63  ;;  %3822 = vmatprep.subr.bf16.mxu1 %v2152_v50  ;;  %v2486_v63 = vld [vmem:[#allocation2 + $0x18a8] sm:$0xff]  ;;  %v2231_v50 = vld [vmem:[#allocation2 + $0x10b0] sm:$0xff] }
 0x4e2   :  { %3576 = vmatprep.subr.bf16.mxu0 %v2406_v31  ;;  %v2485_v31 = vld [vmem:[#allocation2 + $0x18a0] sm:$0xff] }
 0x4e4   :  { %3823 = vmatpush1.bf16.msra.mxu1 %v2151_v54  ;;  %v2493_v54 = vld [vmem:[#allocation2 + $0x18e0] sm:$0xff] }
 0x4e5   :  { %3577 = vmatpush1.bf16.msra.mxu0 %v2405_v2  ;;  %3824 = vmatprep.subr.bf16.mxu1 %v2160_v12  ;;  %v2494_v2 = vld [vmem:[#allocation2 + $0x18e8] sm:$0xff] }
 0x4e6   :  { %3578 = vmatprep.subr.bf16.mxu0 %v2414_v3  ;;  %v2239_v3 = vld [vmem:[#allocation2 + $0x10f0] sm:$0xff]  ;;  %v2502_v12 = vld [vmem:[#allocation2 + $0x1928] sm:$0xff] }
 0x4e8   :  { %3825 = vmatpush1.bf16.msra.mxu1 %v2159_v35  ;;  %v2247_v35 = vld [vmem:[#allocation2 + $0x1130] sm:$0xff] }
 0x4e9   :  { %3579 = vmatpush1.bf16.msra.mxu0 %v2413_v13  ;;  %3826 = vmatprep.subr.bf16.mxu1 %v2168_v15  ;;  %v2248_v13 = vld [vmem:[#allocation2 + $0x1138] sm:$0xff] }
 0x4ea   :  { %3580 = vmatprep.subr.bf16.mxu0 %v2422_v58  ;;  %v2510_v58 = vld [vmem:[#allocation2 + $0x1968] sm:$0xff]  ;;  %v2256_v15 = vld [vmem:[#allocation2 + $0x1178] sm:$0xff] }
 0x4ec   :  { %3827 = vmatpush1.bf16.msra.mxu1 %v2167_v25  ;;  %v2255_v25 = vld [vmem:[#allocation2 + $0x1170] sm:$0xff] }
 0x4ed   :  { %3581 = vmatpush1.bf16.msra.mxu0 %v2421_v17  ;;  %3828 = vmatprep.subr.bf16.mxu1 %v2176_v14  ;;  %v2509_v17 = vld [vmem:[#allocation2 + $0x1960] sm:$0xff]  ;;  %v2264_v14 = vld [vmem:[#allocation2 + $0x11b8] sm:$0xff] }
 0x4ee   :  { %3582 = vmatprep.subr.bf16.mxu0 %v2430_v9  ;;  %v2518_v9 = vld [vmem:[#allocation2 + $0x19a8] sm:$0xff] }
 0x4f0   :  { %3829 = vmatpush1.bf16.msra.mxu1 %v2175_v39  ;;  %v2263_v39 = vld [vmem:[#allocation2 + $0x11b0] sm:$0xff] }
 0x4f1   :  { %3583 = vmatpush1.bf16.msra.mxu0 %v2429_v22  ;;  %3830 = vmatprep.subr.bf16.mxu1 %v2184_v26  ;;  %v2517_v22 = vld [vmem:[#allocation2 + $0x19a0] sm:$0xff]  ;;  %v2272_v26 = vld [vmem:[#allocation2 + $0x11f8] sm:$0xff] }
 0x4f2   :  { %3584 = vmatprep.subr.bf16.mxu0 %v2438_v56  ;;  %v2526_v56 = vld [vmem:[#allocation2 + $0x19e8] sm:$0xff] }
 0x4f4   :  { %3831 = vmatpush1.bf16.msra.mxu1 %v2183_v42  ;;  %v2271_v42 = vld [vmem:[#allocation2 + $0x11f0] sm:$0xff] }
 0x4f5   :  { %3585 = vmatpush1.bf16.msra.mxu0 %v2437_v62  ;;  %3832 = vmatprep.subr.bf16.mxu1 %v2192_v47  ;;  %v2525_v62 = vld [vmem:[#allocation2 + $0x19e0] sm:$0xff]  ;;  %v2280_v47 = vld [vmem:[#allocation2 + $0x1238] sm:$0xff] }
 0x4f6   :  { %3586 = vmatprep.subr.bf16.mxu0 %v2446_v49  ;;  %v2534_v49 = vld [vmem:[#allocation2 + $0x1a28] sm:$0xff] }
 0x4f8   :  { %3833 = vmatpush1.bf16.msra.mxu1 %v2191_v59  ;;  %v2279_v59 = vld [vmem:[#allocation2 + $0x1230] sm:$0xff] }
 0x4f9   :  { %3587 = vmatpush1.bf16.msra.mxu0 %v2445_v43  ;;  %3834 = vmatprep.subr.bf16.mxu1 %v2200_v29  ;;  %v2533_v43 = vld [vmem:[#allocation2 + $0x1a20] sm:$0xff]  ;;  %v2288_v29 = vld [vmem:[#allocation2 + $0x1278] sm:$0xff] }
 0x4fa   :  { %3588 = vmatprep.subr.bf16.mxu0 %v2454_v21  ;;  %v2542_v21 = vld [vmem:[#allocation2 + $0x1a68] sm:$0xff] }
 0x4fc   :  { %3835 = vmatpush1.bf16.msra.mxu1 %v2199_v32  ;;  %v2287_v32 = vld [vmem:[#allocation2 + $0x1270] sm:$0xff] }
 0x4fd   :  { %3589 = vmatpush1.bf16.msra.mxu0 %v2453_v60  ;;  %3836 = vmatprep.subr.bf16.mxu1 %v2208_v34  ;;  %v2541_v60 = vld [vmem:[#allocation2 + $0x1a60] sm:$0xff]  ;;  %v2296_v34 = vld [vmem:[#allocation2 + $0x12b8] sm:$0xff] }
 0x4fe   :  { %3590 = vmatprep.subr.bf16.mxu0 %v2462_v33  ;;  %v2550_v33 = vld [vmem:[#allocation2 + $0x1aa8] sm:$0xff] }
 0x500   :  { %3837 = vmatpush1.bf16.msra.mxu1 %v2207_v1  ;;  %v2295_v1 = vld [vmem:[#allocation2 + $0x12b0] sm:$0xff] }
 0x501   :  { %3591 = vmatpush1.bf16.msra.mxu0 %v2461_v41  ;;  %3847 = vmatprep.subr.bf16.mxu1 %v2216_v46  ;;  %v2549_v41 = vld [vmem:[#allocation2 + $0x1aa0] sm:$0xff]  ;;  %v2304_v46 = vld [vmem:[#allocation2 + $0x12f8] sm:$0xff] }
 0x502   :  { %3601 = vmatprep.subr.bf16.mxu0 %v2470_v10  ;;  %v2558_v10 = vld [vmem:[#allocation2 + $0x1ae8] sm:$0xff] }
 0x503   :  { %3839 = vmatmul.mubr.bf16.vlgmr.msra.gmra.mrb[44].mxu1 %v5398_v36  ;;  %v2240_v36 = vld [vmem:[#allocation2 + $0x10f8] sm:$0xff] }
 0x504   :  { %3593 = vmatmul.mubr.bf16.vlgmr.msra.gmra.mrb[28].mxu0 %v5289_v6  ;;  %3848 = vmatpush1.bf16.msra.mxu1 %v2215_v30  ;;  %v2303_v30 = vld [vmem:[#allocation2 + $0x12f0] sm:$0xff] }
 0x505   :  { %3602 = vmatpush1.bf16.msra.mxu0 %v2469_v8  ;;  %3849 = vmatprep.subr.bf16.mxu1 %v2224_v23  ;;  %v2557_v8 = vld [vmem:[#allocation2 + $0x1ae0] sm:$0xff]  ;;  %v2312_v23 = vld [vmem:[#allocation2 + $0x1338] sm:$0xff] }
 0x506   :  { %3603 = vmatprep.subr.bf16.mxu0 %v2478_v55  ;;  %3633 = vmatprep.mubr.bf16.mxu0 %v5459_v20  ;;  %v2566_v55 = vld [vmem:[#allocation2 + $0x1b28] sm:$0xff] }
 0x507   :  { %3879 = vmatprep.mubr.bf16.mxu1 %v5479_v27  ;;  %v2501_v27 = vld [vmem:[#allocation2 + $0x1920] sm:$0xff] }
 0x508   :  { %3850 = vmatpush1.bf16.msra.mxu1 %v2223_v57  ;;  %v2311_v57 = vld [vmem:[#allocation2 + $0x1330] sm:$0xff] }
 0x509   :  { %3604 = vmatpush1.bf16.msra.mxu0 %v2477_v52  ;;  %3851 = vmatprep.subr.bf16.mxu1 %v2232_v5  ;;  %v2565_v52 = vld [vmem:[#allocation2 + $0x1b20] sm:$0xff]  ;;  %v2320_v5 = vld [vmem:[#allocation2 + $0x1378] sm:$0xff] }
 0x50a   :  { %3605 = vmatprep.subr.bf16.mxu0 %v2486_v63  ;;  %v2574_v63 = vld [vmem:[#allocation2 + $0x1b68] sm:$0xff] }
 0x50c   :  { %3852 = vmatpush1.bf16.msra.mxu1 %v2231_v50  ;;  %v2319_v50 = vld [vmem:[#allocation2 + $0x1370] sm:$0xff] }
 0x50d   :  { %3606 = vmatpush1.bf16.msra.mxu0 %v2485_v31  ;;  %3853 = vmatprep.subr.bf16.mxu1 %v2240_v36  ;;  %v2573_v31 = vld [vmem:[#allocation2 + $0x1b60] sm:$0xff]  ;;  %v2328_v36 = vld [vmem:[#allocation2 + $0x13b8] sm:$0xff] }
 0x50e   :  { %3607 = vmatprep.subr.bf16.mxu0 %v2494_v2  ;;  %v2582_v2 = vld [vmem:[#allocation2 + $0x1ba8] sm:$0xff] }
 0x510   :  { %3854 = vmatpush1.bf16.msra.mxu1 %v2239_v3  ;;  %v2327_v3 = vld [vmem:[#allocation2 + $0x13b0] sm:$0xff] }
 0x511   :  { %3608 = vmatpush1.bf16.msra.mxu0 %v2493_v54  ;;  %3855 = vmatprep.subr.bf16.mxu1 %v2248_v13  ;;  %v2581_v54 = vld [vmem:[#allocation2 + $0x1ba0] sm:$0xff]  ;;  %v2336_v13 = vld [vmem:[#allocation2 + $0x13f8] sm:$0xff] }
 0x512   :  { %3609 = vmatprep.subr.bf16.mxu0 %v2502_v12  ;;  %v2590_v12 = vld [vmem:[#allocation2 + $0x1be8] sm:$0xff] }
 0x514   :  { %3856 = vmatpush1.bf16.msra.mxu1 %v2247_v35  ;;  %v2335_v35 = vld [vmem:[#allocation2 + $0x13f0] sm:$0xff] }
 0x515   :  { %3610 = vmatpush1.bf16.msra.mxu0 %v2501_v27  ;;  %3857 = vmatprep.subr.bf16.mxu1 %v2256_v15  ;;  %v2589_v27 = vld [vmem:[#allocation2 + $0x1be0] sm:$0xff]  ;;  %v2344_v15 = vld [vmem:[#allocation2 + $0x1438] sm:$0xff] }
 0x516   :  { %3611 = vmatprep.subr.bf16.mxu0 %v2510_v58  ;;  %v2598_v58 = vld [vmem:[#allocation2 + $0x1c28] sm:$0xff] }
 0x518   :  { %3858 = vmatpush1.bf16.msra.mxu1 %v2255_v25  ;;  %v2343_v25 = vld [vmem:[#allocation2 + $0x1430] sm:$0xff] }
 0x519   :  { %3612 = vmatpush1.bf16.msra.mxu0 %v2509_v17  ;;  %3859 = vmatprep.subr.bf16.mxu1 %v2264_v14  ;;  %v2597_v17 = vld [vmem:[#allocation2 + $0x1c20] sm:$0xff]  ;;  %v2352_v14 = vld [vmem:[#allocation2 + $0x1478] sm:$0xff] }
 0x51a   :  { %3613 = vmatprep.subr.bf16.mxu0 %v2518_v9  ;;  %v2606_v9 = vld [vmem:[#allocation2 + $0x1c68] sm:$0xff] }
 0x51c   :  { %3860 = vmatpush1.bf16.msra.mxu1 %v2263_v39  ;;  %v2351_v39 = vld [vmem:[#allocation2 + $0x1470] sm:$0xff] }
 0x51d   :  { %3614 = vmatpush1.bf16.msra.mxu0 %v2517_v22  ;;  %3861 = vmatprep.subr.bf16.mxu1 %v2272_v26  ;;  %v2605_v22 = vld [vmem:[#allocation2 + $0x1c60] sm:$0xff]  ;;  %v2360_v26 = vld [vmem:[#allocation2 + $0x14b8] sm:$0xff] }
 0x51e   :  { %3615 = vmatprep.subr.bf16.mxu0 %v2526_v56  ;;  %v2614_v56 = vld [vmem:[#allocation2 + $0x1ca8] sm:$0xff] }
 0x520   :  { %3862 = vmatpush1.bf16.msra.mxu1 %v2271_v42  ;;  %v2359_v42 = vld [vmem:[#allocation2 + $0x14b0] sm:$0xff] }
 0x521   :  { %3616 = vmatpush1.bf16.msra.mxu0 %v2525_v62  ;;  %3863 = vmatprep.subr.bf16.mxu1 %v2280_v47  ;;  %v2613_v62 = vld [vmem:[#allocation2 + $0x1ca0] sm:$0xff] }
 0x522   :  { %3617 = vmatprep.subr.bf16.mxu0 %v2534_v49  ;;  %v2622_v49 = vld [vmem:[#allocation2 + $0x1ce8] sm:$0xff]  ;;  %v2621_v47 = vld [vmem:[#allocation2 + $0x1ce0] sm:$0xff] }
 0x524   :  { %3864 = vmatpush1.bf16.msra.mxu1 %v2279_v59  ;;  %v2630_v59 = vld [vmem:[#allocation2 + $0x1d28] sm:$0xff] }
 0x525   :  { %3618 = vmatpush1.bf16.msra.mxu0 %v2533_v43  ;;  %3865 = vmatprep.subr.bf16.mxu1 %v2288_v29  ;;  %v2367_v43 = vld [vmem:[#allocation2 + $0x14f0] sm:$0xff] }
 0x526   :  { %3619 = vmatprep.subr.bf16.mxu0 %v2542_v21  ;;  %v2376_v21 = vld [vmem:[#allocation2 + $0x1538] sm:$0xff]  ;;  %v2375_v29 = vld [vmem:[#allocation2 + $0x1530] sm:$0xff] }
 0x528   :  { %3866 = vmatpush1.bf16.msra.mxu1 %v2287_v32  ;;  %v2384_v32 = vld [vmem:[#allocation2 + $0x1578] sm:$0xff] }
 0x529   :  { %3620 = vmatpush1.bf16.msra.mxu0 %v2541_v60  ;;  %3867 = vmatprep.subr.bf16.mxu1 %v2296_v34  ;;  %v2638_v60 = vld [vmem:[#allocation2 + $0x1d68] sm:$0xff]  ;;  %v2383_v34 = vld [vmem:[#allocation2 + $0x1570] sm:$0xff] }
 0x52a   :  { %3621 = vmatprep.subr.bf16.mxu0 %v2550_v33  ;;  %v2637_v33 = vld [vmem:[#allocation2 + $0x1d60] sm:$0xff] }
 0x52c   :  { %3868 = vmatpush1.bf16.msra.mxu1 %v2295_v1  ;;  %v2392_v1 = vld [vmem:[#allocation2 + $0x15b8] sm:$0xff] }
 0x52d   :  { %3622 = vmatpush1.bf16.msra.mxu0 %v2549_v41  ;;  %3869 = vmatprep.subr.bf16.mxu1 %v2304_v46  ;;  %v2646_v41 = vld [vmem:[#allocation2 + $0x1da8] sm:$0xff]  ;;  %v2391_v46 = vld [vmem:[#allocation2 + $0x15b0] sm:$0xff] }
 0x52e   :  { %3623 = vmatprep.subr.bf16.mxu0 %v2558_v10  ;;  %v2645_v10 = vld [vmem:[#allocation2 + $0x1da0] sm:$0xff] }
 0x530   :  { %3870 = vmatpush1.bf16.msra.mxu1 %v2303_v30  ;;  %v2400_v30 = vld [vmem:[#allocation2 + $0x15f8] sm:$0xff] }
 0x531   :  { %3624 = vmatpush1.bf16.msra.mxu0 %v2557_v8  ;;  %3871 = vmatprep.subr.bf16.mxu1 %v2312_v23  ;;  %v2654_v8 = vld [vmem:[#allocation2 + $0x1de8] sm:$0xff]  ;;  %v2399_v23 = vld [vmem:[#allocation2 + $0x15f0] sm:$0xff] }
 0x532   :  { %3625 = vmatprep.subr.bf16.mxu0 %v2566_v55  ;;  %v2653_v55 = vld [vmem:[#allocation2 + $0x1de0] sm:$0xff] }
 0x534   :  { %3872 = vmatpush1.bf16.msra.mxu1 %v2311_v57  ;;  %v2407_v57 = vld [vmem:[#allocation2 + $0x1630] sm:$0xff] }
 0x535   :  { %3626 = vmatpush1.bf16.msra.mxu0 %v2565_v52  ;;  %3873 = vmatprep.subr.bf16.mxu1 %v2320_v5  ;;  %v2408_v52 = vld [vmem:[#allocation2 + $0x1638] sm:$0xff]  ;;  %v2415_v5 = vld [vmem:[#allocation2 + $0x1670] sm:$0xff] }
 0x536   :  { %3627 = vmatprep.subr.bf16.mxu0 %v2574_v63  ;;  %v2416_v63 = vld [vmem:[#allocation2 + $0x1678] sm:$0xff] }
 0x538   :  { %3874 = vmatpush1.bf16.msra.mxu1 %v2319_v50  ;;  %v2423_v50 = vld [vmem:[#allocation2 + $0x16b0] sm:$0xff] }
 0x539   :  { %3628 = vmatpush1.bf16.msra.mxu0 %v2573_v31  ;;  %3875 = vmatprep.subr.bf16.mxu1 %v2328_v36  ;;  %v2424_v31 = vld [vmem:[#allocation2 + $0x16b8] sm:$0xff]  ;;  %v2431_v36 = vld [vmem:[#allocation2 + $0x16f0] sm:$0xff] }
 0x53a   :  { %3629 = vmatprep.subr.bf16.mxu0 %v2582_v2  ;;  %v2432_v2 = vld [vmem:[#allocation2 + $0x16f8] sm:$0xff] }
 0x53c   :  { %3876 = vmatpush1.bf16.msra.mxu1 %v2327_v3  ;;  %v2439_v3 = vld [vmem:[#allocation2 + $0x1730] sm:$0xff] }
 0x53d   :  { %3630 = vmatpush1.bf16.msra.mxu0 %v2581_v54  ;;  %3877 = vmatprep.subr.bf16.mxu1 %v2336_v13  ;;  %v2440_v54 = vld [vmem:[#allocation2 + $0x1738] sm:$0xff]  ;;  %v2447_v13 = vld [vmem:[#allocation2 + $0x1770] sm:$0xff] }
 0x53e   :  { %3631 = vmatprep.subr.bf16.mxu0 %v2590_v12  ;;  %v2448_v12 = vld [vmem:[#allocation2 + $0x1778] sm:$0xff] }
 0x540   :  { %3878 = vmatpush1.bf16.msra.mxu1 %v2335_v35  ;;  %v2455_v35 = vld [vmem:[#allocation2 + $0x17b0] sm:$0xff] }
 0x541   :  { %3632 = vmatpush1.bf16.msra.mxu0 %v2589_v27  ;;  %3888 = vmatprep.subr.bf16.mxu1 %v2344_v15  ;;  %v2456_v27 = vld [vmem:[#allocation2 + $0x17b8] sm:$0xff]  ;;  %v2463_v15 = vld [vmem:[#allocation2 + $0x17f0] sm:$0xff] }
 0x542   :  { %3642 = vmatprep.subr.bf16.mxu0 %v2598_v58  ;;  %v2464_v58 = vld [vmem:[#allocation2 + $0x17f8] sm:$0xff] }
 0x543   :  { %3880 = vmatmul.mubr.bf16.vlgmr.msra.gmra.mrb[44].mxu1 %v5456_v18  ;;  %v2368_v18 = vld [vmem:[#allocation2 + $0x14f8] sm:$0xff] }
 0x544   :  { %3634 = vmatmul.mubr.bf16.vlgmr.msra.gmra.mrb[28].mxu0 %v5406_v44  ;;  %3889 = vmatpush1.bf16.msra.mxu1 %v2343_v25  ;;  %v2471_v25 = vld [vmem:[#allocation2 + $0x1830] sm:$0xff] }
 0x545   :  { %3643 = vmatpush1.bf16.msra.mxu0 %v2597_v17  ;;  %3890 = vmatprep.subr.bf16.mxu1 %v2352_v14  ;;  %v2472_v17 = vld [vmem:[#allocation2 + $0x1838] sm:$0xff]  ;;  %v2479_v14 = vld [vmem:[#allocation2 + $0x1870] sm:$0xff] }
 0x546   :  { %3644 = vmatprep.subr.bf16.mxu0 %v2606_v9  ;;  %3674 = vmatprep.mubr.bf16.mxu0 %v5108_v0  ;;  %v2480_v9 = vld [vmem:[#allocation2 + $0x1878] sm:$0xff] }
 0x547   :  { %3920 = vmatprep.mubr.bf16.mxu1 %v5404_v37  ;;  %v2629_v37 = vld [vmem:[#allocation2 + $0x1d20] sm:$0xff] }
 0x548   :  { %3891 = vmatpush1.bf16.msra.mxu1 %v2351_v39  ;;  %v2487_v39 = vld [vmem:[#allocation2 + $0x18b0] sm:$0xff] }
 0x549   :  { %3645 = vmatpush1.bf16.msra.mxu0 %v2605_v22  ;;  %3892 = vmatprep.subr.bf16.mxu1 %v2360_v26  ;;  %v2488_v22 = vld [vmem:[#allocation2 + $0x18b8] sm:$0xff]  ;;  %v2495_v26 = vld [vmem:[#allocation2 + $0x18f0] sm:$0xff] }
 0x54a   :  { %3646 = vmatprep.subr.bf16.mxu0 %v2614_v56  ;;  %v2496_v56 = vld [vmem:[#allocation2 + $0x18f8] sm:$0xff] }
 0x54c   :  { %3893 = vmatpush1.bf16.msra.mxu1 %v2359_v42  ;;  %v2503_v42 = vld [vmem:[#allocation2 + $0x1930] sm:$0xff] }
 0x54d   :  { %3647 = vmatpush1.bf16.msra.mxu0 %v2613_v62  ;;  %3894 = vmatprep.subr.bf16.mxu1 %v2368_v18  ;;  %v2504_v62 = vld [vmem:[#allocation2 + $0x1938] sm:$0xff] }
 0x54e   :  { %3648 = vmatprep.subr.bf16.mxu0 %v2622_v49  ;;  %v2512_v49 = vld [vmem:[#allocation2 + $0x1978] sm:$0xff] }
 0x54f   :  { %v2520_v18 = vld [vmem:[#allocation2 + $0x19b8] sm:$0xff] }
 0x550   :  { %3895 = vmatpush1.bf16.msra.mxu1 %v2367_v43  ;;  %v2527_v43 = vld [vmem:[#allocation2 + $0x19f0] sm:$0xff] }
 0x551   :  { %3649 = vmatpush1.bf16.msra.mxu0 %v2621_v47  ;;  %3896 = vmatprep.subr.bf16.mxu1 %v2376_v21  ;;  %v2528_v47 = vld [vmem:[#allocation2 + $0x19f8] sm:$0xff]  ;;  %v2535_v21 = vld [vmem:[#allocation2 + $0x1a30] sm:$0xff] }
 0x552   :  { %3650 = vmatprep.subr.bf16.mxu0 %v2630_v59  ;;  %v2536_v59 = vld [vmem:[#allocation2 + $0x1a38] sm:$0xff] }
 0x554   :  { %3897 = vmatpush1.bf16.msra.mxu1 %v2375_v29  ;;  %v2543_v29 = vld [vmem:[#allocation2 + $0x1a70] sm:$0xff] }
 0x555   :  { %3651 = vmatpush1.bf16.msra.mxu0 %v2629_v37  ;;  %3898 = vmatprep.subr.bf16.mxu1 %v2384_v32  ;;  %v2544_v37 = vld [vmem:[#allocation2 + $0x1a78] sm:$0xff]  ;;  %v2551_v32 = vld [vmem:[#allocation2 + $0x1ab0] sm:$0xff] }
 0x556   :  { %3652 = vmatprep.subr.bf16.mxu0 %v2638_v60  ;;  %v2552_v60 = vld [vmem:[#allocation2 + $0x1ab8] sm:$0xff] }
 0x558   :  { %3899 = vmatpush1.bf16.msra.mxu1 %v2383_v34  ;;  %v2559_v34 = vld [vmem:[#allocation2 + $0x1af0] sm:$0xff] }
 0x559   :  { %3653 = vmatpush1.bf16.msra.mxu0 %v2637_v33  ;;  %3900 = vmatprep.subr.bf16.mxu1 %v2392_v1  ;;  %v2560_v33 = vld [vmem:[#allocation2 + $0x1af8] sm:$0xff]  ;;  %v2567_v1 = vld [vmem:[#allocation2 + $0x1b30] sm:$0xff] }
 0x55a   :  { %3654 = vmatprep.subr.bf16.mxu0 %v2646_v41  ;;  %v2568_v41 = vld [vmem:[#allocation2 + $0x1b38] sm:$0xff] }
 0x55c   :  { %3901 = vmatpush1.bf16.msra.mxu1 %v2391_v46  ;;  %v2575_v46 = vld [vmem:[#allocation2 + $0x1b70] sm:$0xff] }
 0x55d   :  { %3655 = vmatpush1.bf16.msra.mxu0 %v2645_v10  ;;  %3902 = vmatprep.subr.bf16.mxu1 %v2400_v30  ;;  %v2576_v10 = vld [vmem:[#allocation2 + $0x1b78] sm:$0xff]  ;;  %v2583_v30 = vld [vmem:[#allocation2 + $0x1bb0] sm:$0xff] }
 0x55e   :  { %3656 = vmatprep.subr.bf16.mxu0 %v2654_v8  ;;  %v2584_v8 = vld [vmem:[#allocation2 + $0x1bb8] sm:$0xff] }
 0x560   :  { %3903 = vmatpush1.bf16.msra.mxu1 %v2399_v23  ;;  %v2591_v23 = vld [vmem:[#allocation2 + $0x1bf0] sm:$0xff] }
 0x561   :  { %3657 = vmatpush1.bf16.msra.mxu0 %v2653_v55  ;;  %3904 = vmatprep.subr.bf16.mxu1 %v2408_v52  ;;  %v2592_v55 = vld [vmem:[#allocation2 + $0x1bf8] sm:$0xff] }
 0x562   :  { %v2600_v52 = vld [vmem:[#allocation2 + $0x1c38] sm:$0xff] }
 0x564   :  { %3675 = vmatmul.mubr.bf16.vlgmr.msra.gmra.mrb[28].mxu0 %v5481_v16  ;;  %3905 = vmatpush1.bf16.msra.mxu1 %v2407_v57  ;;  %v2599_v57 = vld [vmem:[#allocation2 + $0x1c30] sm:$0xff] }
 0x565   :  { %3906 = vmatprep.subr.bf16.mxu1 %v2416_v63  ;;  %v2608_v63 = vld [vmem:[#allocation2 + $0x1c78] sm:$0xff] }
 0x568   :  { %3907 = vmatpush1.bf16.msra.mxu1 %v2415_v5  ;;  %v2607_v5 = vld [vmem:[#allocation2 + $0x1c70] sm:$0xff] }
 0x569   :  { %3908 = vmatprep.subr.bf16.mxu1 %v2424_v31  ;;  %v2616_v31 = vld [vmem:[#allocation2 + $0x1cb8] sm:$0xff] }
 0x56c   :  { %3909 = vmatpush1.bf16.msra.mxu1 %v2423_v50  ;;  %v2615_v50 = vld [vmem:[#allocation2 + $0x1cb0] sm:$0xff] }
 0x56d   :  { %3910 = vmatprep.subr.bf16.mxu1 %v2432_v2  ;;  %v2624_v2 = vld [vmem:[#allocation2 + $0x1cf8] sm:$0xff] }
 0x570   :  { %3911 = vmatpush1.bf16.msra.mxu1 %v2431_v36  ;;  %v2623_v36 = vld [vmem:[#allocation2 + $0x1cf0] sm:$0xff] }
 0x571   :  { %3912 = vmatprep.subr.bf16.mxu1 %v2440_v54  ;;  %v2632_v54 = vld [vmem:[#allocation2 + $0x1d38] sm:$0xff] }
 0x574   :  { %3913 = vmatpush1.bf16.msra.mxu1 %v2439_v3  ;;  %v2631_v3 = vld [vmem:[#allocation2 + $0x1d30] sm:$0xff] }
 0x575   :  { %3914 = vmatprep.subr.bf16.mxu1 %v2448_v12  ;;  %v2640_v12 = vld [vmem:[#allocation2 + $0x1d78] sm:$0xff] }
 0x578   :  { %3915 = vmatpush1.bf16.msra.mxu1 %v2447_v13  ;;  %v2648_v13 = vld [vmem:[#allocation2 + $0x1db8] sm:$0xff] }
 0x579   :  { %3916 = vmatprep.subr.bf16.mxu1 %v2456_v27  ;;  %v2656_v27 = vld [vmem:[#allocation2 + $0x1df8] sm:$0xff] }
 0x57c   :  { %3917 = vmatpush1.bf16.msra.mxu1 %v2455_v35  ;;  %v2655_v35 = vld [vmem:[#allocation2 + $0x1df0] sm:$0xff] }
 0x57d   :  { %3918 = vmatprep.subr.bf16.mxu1 %v2464_v58  ;;  %v2681_v58 = vsub.s32 5, %v5249_v40 }
 0x580   :  { %3919 = vmatpush1.bf16.msra.mxu1 %v2463_v15  ;;  %v4973_v15 = vld [vmem:[#allocation11 + $0x5] sm:$0xff] }
 0x581   :  { %3929 = vmatprep.subr.bf16.mxu1 %v2472_v17  ;;  %v2678_v17 = vrot.slane %v4973_v15, %v1646_v11 }
 0x583   :  { %3921 = vmatmul.mubr.bf16.vlgmr.msra.gmra.mrb[44].mxu1 %v5289_v6  ;;  %v2511_v6 = vld [vmem:[#allocation2 + $0x1970] sm:$0xff] }
 0x584   :  { %3930 = vmatpush1.bf16.msra.mxu1 %v2471_v25  ;;  %3961 = vmatprep.mubr.bf16.mxu1 %v5459_v20  ;;  %v2519_v20 = vld [vmem:[#allocation2 + $0x19b0] sm:$0xff]  ;;  %v2682_v25 = vrot.slane %v4973_v15, %v2681_v58 }
 0x585   :  { %3931 = vmatprep.subr.bf16.mxu1 %v2480_v9 }
 0x588   :  { %3932 = vmatpush1.bf16.msra.mxu1 %v2479_v14 }
 0x589   :  { %3933 = vmatprep.subr.bf16.mxu1 %v2488_v22 }
 0x58c   :  { %3934 = vmatpush1.bf16.msra.mxu1 %v2487_v39 }
 0x58d   :  { %3935 = vmatprep.subr.bf16.mxu1 %v2496_v56 }
 0x590   :  { %3936 = vmatpush1.bf16.msra.mxu1 %v2495_v26 }
 0x591   :  { %3937 = vmatprep.subr.bf16.mxu1 %v2504_v62 }
 0x594   :  { %3938 = vmatpush1.bf16.msra.mxu1 %v2503_v42 }
 0x595   :  { %3939 = vmatprep.subr.bf16.mxu1 %v2512_v49  ;;  %v2689_v49 = vsub.s32 7, %v5249_v40 }
 0x598   :  { %3940 = vmatpush1.bf16.msra.mxu1 %v2511_v6 }
 0x599   :  { %3941 = vmatprep.subr.bf16.mxu1 %v2520_v18  ;;  %v2690_v18 = vrot.slane %v4973_v15, %v2689_v49 }
 0x59c   :  { %3942 = vmatpush1.bf16.msra.mxu1 %v2519_v20 }
 0x59d   :  { %3943 = vmatprep.subr.bf16.mxu1 %v2528_v47 }
 0x5a0   :  { %3944 = vmatpush1.bf16.msra.mxu1 %v2527_v43 }
 0x5a1   :  { %3945 = vmatprep.subr.bf16.mxu1 %v2536_v59 }
 0x5a4   :  { %3946 = vmatpush1.bf16.msra.mxu1 %v2535_v21 }
 0x5a5   :  { %3947 = vmatprep.subr.bf16.mxu1 %v2544_v37 }
 0x5a8   :  { %3948 = vmatpush1.bf16.msra.mxu1 %v2543_v29 }
 0x5a9   :  { %3949 = vmatprep.subr.bf16.mxu1 %v2552_v60 }
 0x5ac   :  { %3950 = vmatpush1.bf16.msra.mxu1 %v2551_v32 }
 0x5ad   :  { %3951 = vmatprep.subr.bf16.mxu1 %v2560_v33 }
 0x5b0   :  { %3952 = vmatpush1.bf16.msra.mxu1 %v2559_v34 }
 0x5b1   :  { %3953 = vmatprep.subr.bf16.mxu1 %v2568_v41 }
 0x5b4   :  { %3954 = vmatpush1.bf16.msra.mxu1 %v2567_v1 }
 0x5b5   :  { %3955 = vmatprep.subr.bf16.mxu1 %v2576_v10 }
 0x5b8   :  { %3956 = vmatpush1.bf16.msra.mxu1 %v2575_v46 }
 0x5b9   :  { %3957 = vmatprep.subr.bf16.mxu1 %v2584_v8 }
 0x5bc   :  { %3958 = vmatpush1.bf16.msra.mxu1 %v2583_v30 }
 0x5bd   :  { %3959 = vmatprep.subr.bf16.mxu1 %v2592_v55 }
 0x5c0   :  { %3960 = vmatpush1.bf16.msra.mxu1 %v2591_v23 }
 0x5c1   :  { %3970 = vmatprep.subr.bf16.mxu1 %v2600_v52 }
 0x5c3   :  { %3962 = vmatmul.mubr.bf16.vlgmr.msra.gmra.mrb[44].mxu1 %v5406_v44  ;;  %v2639_v44 = vld [vmem:[#allocation2 + $0x1d70] sm:$0xff] }
 0x5c4   :  { %3971 = vmatpush1.bf16.msra.mxu1 %v2599_v57  ;;  %4002 = vmatprep.mubr.bf16.mxu1 %v5108_v0  ;;  %v2647_v0 = vld [vmem:[#allocation2 + $0x1db0] sm:$0xff] }
 0x5c5   :  { %3972 = vmatprep.subr.bf16.mxu1 %v2608_v63 }
 0x5c8   :  { %3973 = vmatpush1.bf16.msra.mxu1 %v2607_v5 }
 0x5c9   :  { %3974 = vmatprep.subr.bf16.mxu1 %v2616_v31 }
 0x5cc   :  { %3975 = vmatpush1.bf16.msra.mxu1 %v2615_v50 }
 0x5cd   :  { %3976 = vmatprep.subr.bf16.mxu1 %v2624_v2 }
 0x5d0   :  { %3977 = vmatpush1.bf16.msra.mxu1 %v2623_v36 }
 0x5d1   :  { %3978 = vmatprep.subr.bf16.mxu1 %v2632_v54 }
 0x5d4   :  { %3979 = vmatpush1.bf16.msra.mxu1 %v2631_v3 }
 0x5d5   :  { %3980 = vmatprep.subr.bf16.mxu1 %v2640_v12 }
 0x5d8   :  { %3981 = vmatpush1.bf16.msra.mxu1 %v2639_v44 }
 0x5d9   :  { %3982 = vmatprep.subr.bf16.mxu1 %v2648_v13 }
 0x5dc   :  { %3983 = vmatpush1.bf16.msra.mxu1 %v2647_v0 }
 0x5dd   :  { %3984 = vmatprep.subr.bf16.mxu1 %v2656_v27 }
 0x5e0   :  { %3985 = vmatpush1.bf16.msra.mxu1 %v2655_v35 }
 0x5e3   :  { %4003 = vmatmul.mubr.bf16.vlgmr.msra.gmra.mrb[44].mxu1 %v5481_v16  ;;  %v2685_v16 = vsub.s32 6, %v5249_v40 }
 0x5e5   :  { %v2686_v6 = vrot.slane %v4973_v15, %v2685_v16 }
 0x637   :  { %v3676_v9 = vpop.f32.mrb[28].mxu0 }
 0x638   :  { %v5580_v14 = vadd.f32 %v3676_v9, %v2678_v17  ;;  %v3678_v22 = vpop.f32.mrb[29].mxu0 }
 0x639   :  { %v5582_v39 = vadd.f32 %v3678_v22, %v2682_v25  ;;  %v3680_v56 = vpop.f32.mrb[30].mxu0 }
 0x63a   :  { %v4015_v26 = vmax.f32 %v5580_v14, 0.0  ;;  %v3681_v62 = vpop.f32.mrb[31].mxu0 }
 0x63b   :  { %v4016_v42 = vmax.f32 %v5582_v39, 0.0 }
 0x6b6   :  { %v4004_v11 = vpop.f32.mrb[44].mxu1 }
 0x6b7   :  { %v5588_v20 = vadd.f32 %v4004_v11, %v2686_v6  ;;  %v4006_v47 = vpop.f32.mrb[45].mxu1 }
 0x6b8   :  { %v5590_v43 = vadd.f32 %v4006_v47, %v2690_v18  ;;  %v4008_v59 = vpop.f32.mrb[46].mxu1 }
 0x6b9   :  { %v4017_v21 = vmax.f32 %v5588_v20, 0.0  ;;  %v4009_v37 = vpop.f32.mrb[47].mxu1 }
 0x6ba   :  { %v4018_v29 = vmax.f32 %v5590_v43, 0.0 }
 0x6bb   :  { %5094 = dma.done.wait [#allocation5 + $0x1], 16384 }
 0x6bc   :  { %5095 = vsyncadd [#allocation5 + $0x1], 4294950912  ;;  %v4024_v40 = vpack.c.bf16 %v4012_v61, %v4012_v61  ;;  %v4032_v60 = vld [vmem:[#allocation3 + $0x8] sm:$0xff]  ;;  %v4031_v32 = vld [vmem:[#allocation3] sm:$0xff]  ;;  %v4023_v25 = vpack.c.bf16 %v4011_v28, %v4011_v28  ;;  %v4026_v9 = vpack.c.bf16 %v4014_v53, %v4014_v53 }
 0x6bd   :  { %v4034_v33 = vld [vmem:[#allocation3 + $0x18] sm:$0xff]  ;;  %4171 = vmatprep.subr.bf16.mxu0 %v4032_v60  ;;  %v4033_v34 = vld [vmem:[#allocation3 + $0x10] sm:$0xff]  ;;  %v4036_v41 = vld [vmem:[#allocation3 + $0x28] sm:$0xff] }
 0x6be   :  { %4203 = vmatprep.mubr.bf16.mxu0 %v4024_v40  ;;  %4172 = vmatpush1.bf16.msra.mxu0 %v4031_v32  ;;  %v4035_v1 = vld [vmem:[#allocation3 + $0x20] sm:$0xff]  ;;  %v4038_v10 = vld [vmem:[#allocation3 + $0x38] sm:$0xff]  ;;  %v4037_v46 = vld [vmem:[#allocation3 + $0x30] sm:$0xff] }
 0x6bf   :  { %4173 = vmatprep.subr.bf16.mxu0 %v4034_v33  ;;  %v4040_v8 = vld [vmem:[#allocation3 + $0x48] sm:$0xff]  ;;  %v4039_v4 = vld [vmem:[#allocation3 + $0x40] sm:$0xff]  ;;  %v4042_v61 = vld [vmem:[#allocation3 + $0x58] sm:$0xff] }
 0x6c0   :  { %v4041_v30 = vld [vmem:[#allocation3 + $0x50] sm:$0xff]  ;;  %v4044_v55 = vld [vmem:[#allocation3 + $0x68] sm:$0xff]  ;;  %v4043_v23 = vld [vmem:[#allocation3 + $0x60] sm:$0xff] }
 0x6c1   :  { %v4046_v52 = vld [vmem:[#allocation3 + $0x78] sm:$0xff]  ;;  %v4045_v57 = vld [vmem:[#allocation3 + $0x70] sm:$0xff]  ;;  %v4048_v63 = vld [vmem:[#allocation3 + $0x88] sm:$0xff] }
 0x6c2   :  { %4174 = vmatpush1.bf16.msra.mxu0 %v4033_v34  ;;  %v4047_v5 = vld [vmem:[#allocation3 + $0x80] sm:$0xff]  ;;  %v4050_v31 = vld [vmem:[#allocation3 + $0x98] sm:$0xff]  ;;  %v4049_v50 = vld [vmem:[#allocation3 + $0x90] sm:$0xff] }
 0x6c3   :  { %4175 = vmatprep.subr.bf16.mxu0 %v4036_v41  ;;  %v4052_v2 = vld [vmem:[#allocation3 + $0xa8] sm:$0xff]  ;;  %v4051_v36 = vld [vmem:[#allocation3 + $0xa0] sm:$0xff]  ;;  %v4054_v54 = vld [vmem:[#allocation3 + $0xb8] sm:$0xff] }
 0x6c4   :  { %v4053_v3 = vld [vmem:[#allocation3 + $0xb0] sm:$0xff]  ;;  %v4056_v12 = vld [vmem:[#allocation3 + $0xc8] sm:$0xff]  ;;  %v4055_v44 = vld [vmem:[#allocation3 + $0xc0] sm:$0xff] }
 0x6c5   :  { %v4058_v13 = vld [vmem:[#allocation3 + $0xd8] sm:$0xff]  ;;  %v4057_v0 = vld [vmem:[#allocation3 + $0xd0] sm:$0xff]  ;;  %v4060_v27 = vld [vmem:[#allocation3 + $0xe8] sm:$0xff] }
 0x6c6   :  { %4176 = vmatpush1.bf16.msra.mxu0 %v4035_v1  ;;  %v4059_v35 = vld [vmem:[#allocation3 + $0xe0] sm:$0xff]  ;;  %v4062_v58 = vld [vmem:[#allocation3 + $0xf8] sm:$0xff]  ;;  %v4061_v15 = vld [vmem:[#allocation3 + $0xf0] sm:$0xff] }
 0x6c7   :  { %4177 = vmatprep.subr.bf16.mxu0 %v4038_v10  ;;  %v4064_v17 = vld [vmem:[#allocation3 + $0x108] sm:$0xff]  ;;  %v4063_v22 = vld [vmem:[#allocation3 + $0x100] sm:$0xff]  ;;  %v4066_v56 = vld [vmem:[#allocation3 + $0x118] sm:$0xff] }
 0x6c8   :  { %v4065_v62 = vld [vmem:[#allocation3 + $0x110] sm:$0xff]  ;;  %v4068_v16 = vld [vmem:[#allocation3 + $0x128] sm:$0xff]  ;;  %v4067_v49 = vld [vmem:[#allocation3 + $0x120] sm:$0xff] }
 0x6c9   :  { %v4070_v51 = vld [vmem:[#allocation3 + $0x138] sm:$0xff]  ;;  %v4069_v28 = vld [vmem:[#allocation3 + $0x130] sm:$0xff]  ;;  %v4072_v6 = vld [vmem:[#allocation3 + $0x148] sm:$0xff] }
 0x6ca   :  { %4178 = vmatpush1.bf16.msra.mxu0 %v4037_v46  ;;  %v4071_v48 = vld [vmem:[#allocation3 + $0x140] sm:$0xff]  ;;  %v4074_v53 = vld [vmem:[#allocation3 + $0x158] sm:$0xff]  ;;  %v4073_v18 = vld [vmem:[#allocation3 + $0x150] sm:$0xff] }
 0x6cb   :  { %4179 = vmatprep.subr.bf16.mxu0 %v4040_v8  ;;  %v4076_v11 = vld [vmem:[#allocation3 + $0x168] sm:$0xff]  ;;  %v4075_v47 = vld [vmem:[#allocation3 + $0x160] sm:$0xff]  ;;  %v4078_v59 = vld [vmem:[#allocation3 + $0x178] sm:$0xff] }
 0x6cc   :  { %v4077_v37 = vld [vmem:[#allocation3 + $0x170] sm:$0xff]  ;;  %v4080_v40 = vld [vmem:[#allocation3 + $0x188] sm:$0xff]  ;;  %v4079_v60 = vld [vmem:[#allocation3 + $0x180] sm:$0xff] }
 0x6cd   :  { %v4082_v32 = vld [vmem:[#allocation3 + $0x198] sm:$0xff]  ;;  %v4081_v33 = vld [vmem:[#allocation3 + $0x190] sm:$0xff]  ;;  %v4084_v34 = vld [vmem:[#allocation3 + $0x1a8] sm:$0xff] }
 0x6ce   :  { %4180 = vmatpush1.bf16.msra.mxu0 %v4039_v4  ;;  %v4083_v41 = vld [vmem:[#allocation3 + $0x1a0] sm:$0xff]  ;;  %v4086_v1 = vld [vmem:[#allocation3 + $0x1b8] sm:$0xff]  ;;  %v4085_v10 = vld [vmem:[#allocation3 + $0x1b0] sm:$0xff] }
 0x6cf   :  { %4181 = vmatprep.subr.bf16.mxu0 %v4042_v61  ;;  %v4088_v46 = vld [vmem:[#allocation3 + $0x1c8] sm:$0xff]  ;;  %v4087_v8 = vld [vmem:[#allocation3 + $0x1c0] sm:$0xff]  ;;  %v4090_v4 = vld [vmem:[#allocation3 + $0x1d8] sm:$0xff] }
 0x6d0   :  { %v4089_v61 = vld [vmem:[#allocation3 + $0x1d0] sm:$0xff]  ;;  %v4102_v45 = vld [vmem:[#allocation3 + $0x238] sm:$0xff]  ;;  %v4103_v39 = vld [vmem:[#allocation3 + $0x240] sm:$0xff] }
 0x6d1   :  { %v4134_v14 = vld [vmem:[#allocation3 + $0x338] sm:$0xff]  ;;  %v4135_v43 = vld [vmem:[#allocation3 + $0x340] sm:$0xff] }
 0x6d2   :  { %4182 = vmatpush1.bf16.msra.mxu0 %v4041_v30  ;;  %v4092_v30 = vld [vmem:[#allocation3 + $0x1e8] sm:$0xff] }
 0x6d3   :  { %4183 = vmatprep.subr.bf16.mxu0 %v4044_v55  ;;  %v4091_v55 = vld [vmem:[#allocation3 + $0x1e0] sm:$0xff] }
 0x6d6   :  { %4184 = vmatpush1.bf16.msra.mxu0 %v4043_v23  ;;  %v4094_v23 = vld [vmem:[#allocation3 + $0x1f8] sm:$0xff] }
 0x6d7   :  { %4185 = vmatprep.subr.bf16.mxu0 %v4046_v52  ;;  %v4093_v52 = vld [vmem:[#allocation3 + $0x1f0] sm:$0xff] }
 0x6da   :  { %4186 = vmatpush1.bf16.msra.mxu0 %v4045_v57  ;;  %v4096_v57 = vld [vmem:[#allocation3 + $0x208] sm:$0xff] }
 0x6db   :  { %4187 = vmatprep.subr.bf16.mxu0 %v4048_v63  ;;  %v4025_v63 = vpack.c.bf16 %v4013_v19, %v4013_v19  ;;  %v4101_v19 = vld [vmem:[#allocation3 + $0x230] sm:$0xff] }
 0x6de   :  { %4188 = vmatpush1.bf16.msra.mxu0 %v4047_v5  ;;  %v4028_v5 = vpack.c.bf16 %v4016_v42, %v4016_v42  ;;  %v4106_v42 = vld [vmem:[#allocation3 + $0x258] sm:$0xff] }
 0x6df   :  { %4189 = vmatprep.subr.bf16.mxu0 %v4050_v31  ;;  %v4095_v31 = vld [vmem:[#allocation3 + $0x200] sm:$0xff] }
 0x6e2   :  { %4190 = vmatpush1.bf16.msra.mxu0 %v4049_v50  ;;  %v4098_v50 = vld [vmem:[#allocation3 + $0x218] sm:$0xff] }
 0x6e3   :  { %4191 = vmatprep.subr.bf16.mxu0 %v4052_v2  ;;  %v4097_v2 = vld [vmem:[#allocation3 + $0x210] sm:$0xff] }
 0x6e6   :  { %4192 = vmatpush1.bf16.msra.mxu0 %v4051_v36  ;;  %v4100_v36 = vld [vmem:[#allocation3 + $0x228] sm:$0xff] }
 0x6e7   :  { %4193 = vmatprep.subr.bf16.mxu0 %v4054_v54  ;;  %v4099_v54 = vld [vmem:[#allocation3 + $0x220] sm:$0xff] }
 0x6ea   :  { %4194 = vmatpush1.bf16.msra.mxu0 %v4053_v3  ;;  %v4104_v3 = vld [vmem:[#allocation3 + $0x248] sm:$0xff] }
 0x6eb   :  { %4195 = vmatprep.subr.bf16.mxu0 %v4056_v12  ;;  %v4105_v12 = vld [vmem:[#allocation3 + $0x250] sm:$0xff] }
 0x6ee   :  { %4196 = vmatpush1.bf16.msra.mxu0 %v4055_v44  ;;  %v4108_v44 = vld [vmem:[#allocation3 + $0x268] sm:$0xff] }
 0x6ef   :  { %4197 = vmatprep.subr.bf16.mxu0 %v4058_v13  ;;  %v4107_v13 = vld [vmem:[#allocation3 + $0x260] sm:$0xff] }
 0x6f2   :  { %4198 = vmatpush1.bf16.msra.mxu0 %v4057_v0  ;;  %v4110_v0 = vld [vmem:[#allocation3 + $0x278] sm:$0xff] }
 0x6f3   :  { %4199 = vmatprep.subr.bf16.mxu0 %v4060_v27  ;;  %v4109_v27 = vld [vmem:[#allocation3 + $0x270] sm:$0xff] }
 0x6f6   :  { %4200 = vmatpush1.bf16.msra.mxu0 %v4059_v35  ;;  %v4112_v35 = vld [vmem:[#allocation3 + $0x288] sm:$0xff] }
 0x6f7   :  { %4201 = vmatprep.subr.bf16.mxu0 %v4062_v58  ;;  %v4111_v58 = vld [vmem:[#allocation3 + $0x280] sm:$0xff] }
 0x6fa   :  { %4202 = vmatpush1.bf16.msra.mxu0 %v4061_v15  ;;  %v4114_v15 = vld [vmem:[#allocation3 + $0x298] sm:$0xff] }
 0x6fb   :  { %4212 = vmatprep.subr.bf16.mxu0 %v4064_v17  ;;  %v4113_v17 = vld [vmem:[#allocation3 + $0x290] sm:$0xff] }
 0x6fd   :  { %4204 = vmatmul.mubr.bf16.vlgmr.msra.gmra.mrb[32].mxu0 %v4023_v25  ;;  %v4116_v25 = vld [vmem:[#allocation3 + $0x2a8] sm:$0xff] }
 0x6fe   :  { %4213 = vmatpush1.bf16.msra.mxu0 %v4063_v22  ;;  %4244 = vmatprep.mubr.bf16.mxu0 %v4026_v9  ;;  %v4115_v9 = vld [vmem:[#allocation3 + $0x2a0] sm:$0xff]  ;;  %v4118_v22 = vld [vmem:[#allocation3 + $0x2b8] sm:$0xff] }
 0x6ff   :  { %4214 = vmatprep.subr.bf16.mxu0 %v4066_v56  ;;  %v4117_v56 = vld [vmem:[#allocation3 + $0x2b0] sm:$0xff] }
 0x702   :  { %4215 = vmatpush1.bf16.msra.mxu0 %v4065_v62  ;;  %v4120_v62 = vld [vmem:[#allocation3 + $0x2c8] sm:$0xff] }
 0x703   :  { %4216 = vmatprep.subr.bf16.mxu0 %v4068_v16  ;;  %v4119_v16 = vld [vmem:[#allocation3 + $0x2c0] sm:$0xff] }
 0x706   :  { %4217 = vmatpush1.bf16.msra.mxu0 %v4067_v49  ;;  %v4122_v49 = vld [vmem:[#allocation3 + $0x2d8] sm:$0xff] }
 0x707   :  { %4218 = vmatprep.subr.bf16.mxu0 %v4070_v51  ;;  %v4121_v51 = vld [vmem:[#allocation3 + $0x2d0] sm:$0xff] }
 0x70a   :  { %4219 = vmatpush1.bf16.msra.mxu0 %v4069_v28  ;;  %v4124_v28 = vld [vmem:[#allocation3 + $0x2e8] sm:$0xff] }
 0x70b   :  { %4220 = vmatprep.subr.bf16.mxu0 %v4072_v6  ;;  %v4123_v6 = vld [vmem:[#allocation3 + $0x2e0] sm:$0xff] }
 0x70e   :  { %4221 = vmatpush1.bf16.msra.mxu0 %v4071_v48  ;;  %v4126_v48 = vld [vmem:[#allocation3 + $0x2f8] sm:$0xff] }
 0x70f   :  { %4222 = vmatprep.subr.bf16.mxu0 %v4074_v53  ;;  %v4125_v53 = vld [vmem:[#allocation3 + $0x2f0] sm:$0xff] }
 0x712   :  { %4223 = vmatpush1.bf16.msra.mxu0 %v4073_v18  ;;  %v4128_v18 = vld [vmem:[#allocation3 + $0x308] sm:$0xff] }
 0x713   :  { %4224 = vmatprep.subr.bf16.mxu0 %v4076_v11  ;;  %v4027_v11 = vpack.c.bf16 %v4015_v26, %v4015_v26  ;;  %v4133_v26 = vld [vmem:[#allocation3 + $0x330] sm:$0xff] }
 0x716   :  { %4225 = vmatpush1.bf16.msra.mxu0 %v4075_v47  ;;  %v4030_v47 = vpack.c.bf16 %v4018_v29, %v4018_v29  ;;  %v4138_v29 = vld [vmem:[#allocation3 + $0x358] sm:$0xff] }
 0x717   :  { %4226 = vmatprep.subr.bf16.mxu0 %v4078_v59  ;;  %v4127_v59 = vld [vmem:[#allocation3 + $0x300] sm:$0xff] }
 0x71a   :  { %4227 = vmatpush1.bf16.msra.mxu0 %v4077_v37  ;;  %v4130_v37 = vld [vmem:[#allocation3 + $0x318] sm:$0xff] }
 0x71b   :  { %4228 = vmatprep.subr.bf16.mxu0 %v4080_v40  ;;  %v4129_v40 = vld [vmem:[#allocation3 + $0x310] sm:$0xff] }
 0x71e   :  { %4229 = vmatpush1.bf16.msra.mxu0 %v4079_v60  ;;  %v4132_v60 = vld [vmem:[#allocation3 + $0x328] sm:$0xff] }
 0x71f   :  { %4230 = vmatprep.subr.bf16.mxu0 %v4082_v32  ;;  %v4131_v32 = vld [vmem:[#allocation3 + $0x320] sm:$0xff] }
 0x722   :  { %4231 = vmatpush1.bf16.msra.mxu0 %v4081_v33  ;;  %v4136_v33 = vld [vmem:[#allocation3 + $0x348] sm:$0xff] }
 0x723   :  { %4232 = vmatprep.subr.bf16.mxu0 %v4084_v34  ;;  %v4137_v34 = vld [vmem:[#allocation3 + $0x350] sm:$0xff] }
 0x726   :  { %4233 = vmatpush1.bf16.msra.mxu0 %v4083_v41  ;;  %v4140_v41 = vld [vmem:[#allocation3 + $0x368] sm:$0xff] }
 0x727   :  { %4234 = vmatprep.subr.bf16.mxu0 %v4086_v1  ;;  %v4139_v1 = vld [vmem:[#allocation3 + $0x360] sm:$0xff] }
 0x72a   :  { %4235 = vmatpush1.bf16.msra.mxu0 %v4085_v10  ;;  %v4142_v10 = vld [vmem:[#allocation3 + $0x378] sm:$0xff] }
 0x72b   :  { %4236 = vmatprep.subr.bf16.mxu0 %v4088_v46  ;;  %v4141_v46 = vld [vmem:[#allocation3 + $0x370] sm:$0xff] }
 0x72e   :  { %4237 = vmatpush1.bf16.msra.mxu0 %v4087_v8  ;;  %v4144_v8 = vld [vmem:[#allocation3 + $0x388] sm:$0xff] }
 0x72f   :  { %4238 = vmatprep.subr.bf16.mxu0 %v4090_v4  ;;  %v4143_v4 = vld [vmem:[#allocation3 + $0x380] sm:$0xff] }
 0x732   :  { %4239 = vmatpush1.bf16.msra.mxu0 %v4089_v61  ;;  %v4146_v61 = vld [vmem:[#allocation3 + $0x398] sm:$0xff] }
 0x733   :  { %4240 = vmatprep.subr.bf16.mxu0 %v4092_v30  ;;  %v4145_v30 = vld [vmem:[#allocation3 + $0x390] sm:$0xff] }
 0x736   :  { %4241 = vmatpush1.bf16.msra.mxu0 %v4091_v55  ;;  %v4148_v55 = vld [vmem:[#allocation3 + $0x3a8] sm:$0xff] }
 0x737   :  { %4242 = vmatprep.subr.bf16.mxu0 %v4094_v23  ;;  %v4147_v23 = vld [vmem:[#allocation3 + $0x3a0] sm:$0xff] }
 0x73a   :  { %4243 = vmatpush1.bf16.msra.mxu0 %v4093_v52  ;;  %v4150_v52 = vld [vmem:[#allocation3 + $0x3b8] sm:$0xff] }
 0x73b   :  { %4253 = vmatprep.subr.bf16.mxu0 %v4096_v57  ;;  %v4149_v57 = vld [vmem:[#allocation3 + $0x3b0] sm:$0xff] }
 0x73d   :  { %4245 = vmatmul.mubr.bf16.vlgmr.msra.gmra.mrb[32].mxu0 %v4025_v63  ;;  %v4152_v63 = vld [vmem:[#allocation3 + $0x3c8] sm:$0xff] }
 0x73e   :  { %4254 = vmatpush1.bf16.msra.mxu0 %v4095_v31  ;;  %4285 = vmatprep.mubr.bf16.mxu0 %v4028_v5  ;;  %v4151_v5 = vld [vmem:[#allocation3 + $0x3c0] sm:$0xff]  ;;  %v4154_v31 = vld [vmem:[#allocation3 + $0x3d8] sm:$0xff] }
 0x73f   :  { %4255 = vmatprep.subr.bf16.mxu0 %v4098_v50  ;;  %v4153_v50 = vld [vmem:[#allocation3 + $0x3d0] sm:$0xff] }
 0x742   :  { %4256 = vmatpush1.bf16.msra.mxu0 %v4097_v2  ;;  %v4156_v2 = vld [vmem:[#allocation3 + $0x3e8] sm:$0xff] }
 0x743   :  { %4257 = vmatprep.subr.bf16.mxu0 %v4100_v36  ;;  %v4155_v36 = vld [vmem:[#allocation3 + $0x3e0] sm:$0xff] }
 0x746   :  { %4258 = vmatpush1.bf16.msra.mxu0 %v4099_v54  ;;  %v4158_v54 = vld [vmem:[#allocation3 + $0x3f8] sm:$0xff] }
 0x747   :  { %4259 = vmatprep.subr.bf16.mxu0 %v4102_v45  ;;  %v4157_v45 = vld [vmem:[#allocation3 + $0x3f0] sm:$0xff] }
 0x74a   :  { %4260 = vmatpush1.bf16.msra.mxu0 %v4101_v19  ;;  %v4029_v19 = vpack.c.bf16 %v4017_v21, %v4017_v21 }
 0x74b   :  { %4261 = vmatprep.subr.bf16.mxu0 %v4104_v3  ;;  %v4159_v3 = vld [vmem:[#allocation11 + $0xd] sm:$0x3] }
 0x74e   :  { %4262 = vmatpush1.bf16.msra.mxu0 %v4103_v39  ;;  %v4164_v39 = vrot.slane %v4159_v3, %v5261_v38 }
 0x74f   :  { %4263 = vmatprep.subr.bf16.mxu0 %v4106_v42  ;;  %v4168_v42 = vrot.slane %v4159_v3, %v5317_v24 }
 0x752   :  { %4264 = vmatpush1.bf16.msra.mxu0 %v4105_v12 }
 0x753   :  { %4265 = vmatprep.subr.bf16.mxu0 %v4108_v44 }
 0x756   :  { %4266 = vmatpush1.bf16.msra.mxu0 %v4107_v13 }
 0x757   :  { %4267 = vmatprep.subr.bf16.mxu0 %v4110_v0 }
 0x75a   :  { %4268 = vmatpush1.bf16.msra.mxu0 %v4109_v27 }
 0x75b   :  { %4269 = vmatprep.subr.bf16.mxu0 %v4112_v35 }
 0x75e   :  { %4270 = vmatpush1.bf16.msra.mxu0 %v4111_v58 }
 0x75f   :  { %4271 = vmatprep.subr.bf16.mxu0 %v4114_v15 }
 0x762   :  { %4272 = vmatpush1.bf16.msra.mxu0 %v4113_v17 }
 0x763   :  { %4273 = vmatprep.subr.bf16.mxu0 %v4116_v25 }
 0x766   :  { %4274 = vmatpush1.bf16.msra.mxu0 %v4115_v9 }
 0x767   :  { %4275 = vmatprep.subr.bf16.mxu0 %v4118_v22 }
 0x76a   :  { %4276 = vmatpush1.bf16.msra.mxu0 %v4117_v56 }
 0x76b   :  { %4277 = vmatprep.subr.bf16.mxu0 %v4120_v62 }
 0x76e   :  { %4278 = vmatpush1.bf16.msra.mxu0 %v4119_v16 }
 0x76f   :  { %4279 = vmatprep.subr.bf16.mxu0 %v4122_v49 }
 0x772   :  { %4280 = vmatpush1.bf16.msra.mxu0 %v4121_v51 }
 0x773   :  { %4281 = vmatprep.subr.bf16.mxu0 %v4124_v28 }
 0x776   :  { %4282 = vmatpush1.bf16.msra.mxu0 %v4123_v6 }
 0x777   :  { %4283 = vmatprep.subr.bf16.mxu0 %v4126_v48 }
 0x77a   :  { %4284 = vmatpush1.bf16.msra.mxu0 %v4125_v53 }
 0x77b   :  { %4294 = vmatprep.subr.bf16.mxu0 %v4128_v18 }
 0x77d   :  { %4286 = vmatmul.mubr.bf16.vlgmr.msra.gmra.mrb[32].mxu0 %v4027_v11 }
 0x77e   :  { %4295 = vmatpush1.bf16.msra.mxu0 %v4127_v59  ;;  %4326 = vmatprep.mubr.bf16.mxu0 %v4030_v47 }
 0x77f   :  { %4296 = vmatprep.subr.bf16.mxu0 %v4130_v37 }
 0x782   :  { %4297 = vmatpush1.bf16.msra.mxu0 %v4129_v40 }
 0x783   :  { %4298 = vmatprep.subr.bf16.mxu0 %v4132_v60 }
 0x786   :  { %4299 = vmatpush1.bf16.msra.mxu0 %v4131_v32 }
 0x787   :  { %4300 = vmatprep.subr.bf16.mxu0 %v4134_v14 }
 0x78a   :  { %4301 = vmatpush1.bf16.msra.mxu0 %v4133_v26 }
 0x78b   :  { %4302 = vmatprep.subr.bf16.mxu0 %v4136_v33 }
 0x78e   :  { %4303 = vmatpush1.bf16.msra.mxu0 %v4135_v43 }
 0x78f   :  { %4304 = vmatprep.subr.bf16.mxu0 %v4138_v29 }
 0x792   :  { %4305 = vmatpush1.bf16.msra.mxu0 %v4137_v34 }
 0x793   :  { %4306 = vmatprep.subr.bf16.mxu0 %v4140_v41 }
 0x796   :  { %4307 = vmatpush1.bf16.msra.mxu0 %v4139_v1 }
 0x797   :  { %4308 = vmatprep.subr.bf16.mxu0 %v4142_v10 }
 0x79a   :  { %4309 = vmatpush1.bf16.msra.mxu0 %v4141_v46 }
 0x79b   :  { %4310 = vmatprep.subr.bf16.mxu0 %v4144_v8 }
 0x79e   :  { %4311 = vmatpush1.bf16.msra.mxu0 %v4143_v4 }
 0x79f   :  { %4312 = vmatprep.subr.bf16.mxu0 %v4146_v61 }
 0x7a2   :  { %4313 = vmatpush1.bf16.msra.mxu0 %v4145_v30 }
 0x7a3   :  { %4314 = vmatprep.subr.bf16.mxu0 %v4148_v55 }
 0x7a6   :  { %4315 = vmatpush1.bf16.msra.mxu0 %v4147_v23 }
 0x7a7   :  { %4316 = vmatprep.subr.bf16.mxu0 %v4150_v52 }
 0x7aa   :  { %4317 = vmatpush1.bf16.msra.mxu0 %v4149_v57 }
 0x7ab   :  { %4318 = vmatprep.subr.bf16.mxu0 %v4152_v63 }
 0x7ae   :  { %4319 = vmatpush1.bf16.msra.mxu0 %v4151_v5 }
 0x7af   :  { %4320 = vmatprep.subr.bf16.mxu0 %v4154_v31 }
 0x7b2   :  { %4321 = vmatpush1.bf16.msra.mxu0 %v4153_v50 }
 0x7b3   :  { %4322 = vmatprep.subr.bf16.mxu0 %v4156_v2 }
 0x7b6   :  { %4323 = vmatpush1.bf16.msra.mxu0 %v4155_v36 }
 0x7b7   :  { %4324 = vmatprep.subr.bf16.mxu0 %v4158_v54 }
 0x7ba   :  { %4325 = vmatpush1.bf16.msra.mxu0 %v4157_v45 }
 0x7bd   :  { %4327 = vmatmul.mubr.bf16.vlgmr.msra.gmra.mrb[32].mxu0 %v4029_v19 }
 0x890   :  { %v4328_v12 = vpop.f32.mrb[32].mxu0 }
 0x891   :  { %v4651_v44 = vadd.f32 %v4328_v12, %v4164_v39  ;;  %v4330_v13 = vpop.f32.mrb[33].mxu0 }
 0x892   :  { %v4652_v0 = vadd.f32 %v4330_v13, %v4168_v42  ;;  %v4332_v27 = vpop.f32.mrb[34].mxu0 }
 0x893   :  { %v4335_v35 = vmax.f32 %v4651_v44, 0.0  ;;  %v4333_v58 = vpop.f32.mrb[35].mxu0 }
 0x894   :  { %v4336_v15 = vmax.f32 %v4652_v0, 0.0 }
 0x895   :  { %5096 = dma.done.wait [#allocation5 + $0x2], 2048 }
 0x896   :  { %5097 = vsyncadd [#allocation5 + $0x2], 4294965248  ;;  %v4342_v20 = vpack.c.bf16 %v4336_v15, %v4336_v15  ;;  %v4351_v21 = vld [vmem:[#allocation4 + $0x40] sm:$0xff]  ;;  %v4352_v25 = vld [vmem:[#allocation4 + $0x48] sm:$0xff]  ;;  %v4341_v18 = vpack.c.bf16 %v4335_v35, %v4335_v35  ;;  %v4407_v11 = vand.u32 127, %v1312_v7  ;;  %vm4410_vm12 = vcmask 1041408  }
 0x897   :  { %v4343_v17 = vld [vmem:[#allocation4] sm:$0xff]  ;;  %4599 = vmatprep.subr.bf16.mxu1 %v4351_v21  ;;  %v4344_v38 = vld [vmem:[#allocation4 + $0x8] sm:$0xff]  ;;  %v4353_v24 = vld [vmem:[#allocation4 + $0x50] sm:$0xff]  ;;  %s5121_s5 = smov [#allocation12]  }
 0x898   :  { %4398 = vmatprep.mubr.bf16.mxu1 %v4342_v20  ;;  %4600 = vmatpush3.bf16.msra.mxu1 %v4343_v17  ;;  %v4345_v9 = vld [vmem:[#allocation4 + $0x10] sm:$0xff]  ;;  %v4354_v22 = vld [vmem:[#allocation4 + $0x58] sm:$0xff]  ;;  %v4355_v62 = vld [vmem:[#allocation4 + $0x60] sm:$0xff]  ;;  %vm4408_vm11 = vcmp.lt.s32.totalorder %v4407_v11, 2  ;;  %s4429_s15 = sshll.u32 %s5121_s5, 4  ;;  %s4430_s15 = int_to_ptr.vmem [resolvable:$true] %s4429_s15 }
 0x899   :  { %4601 = vmatprep.subr.bf16.mxu1 %v4352_v25  ;;  %v4346_v56 = vld [vmem:[#allocation4 + $0x18] sm:$0xff]  ;;  %v4347_v16 = vld [vmem:[#allocation4 + $0x20] sm:$0xff]  ;;  %v4356_v49 = vld [vmem:[#allocation4 + $0x68] sm:$0xff]  ;;  %s5066_s2 = scalar_lea.vmem %s4430_s15, 32  ;;  %p5071_p5 = scmp.lt.s32.totalorder %s4430_s15, %s4430_s15 }
 0x89a   :  { %v4348_v51 = vld [vmem:[#allocation4 + $0x28] sm:$0xff]  ;;  %v4357_v28 = vld [vmem:[#allocation4 + $0x70] sm:$0xff]  ;;  %v4358_v48 = vld [vmem:[#allocation4 + $0x78] sm:$0xff]  ;;  %p5067_p4 = scmp.ne.s32.totalorder %s4430_s15, %s5066_s2  ;;  %p5072_p6 = scmp.lt.s32.totalorder %s5066_s2, %s5066_s2 }
 0x89b   :  { %v4349_v6 = vld [vmem:[#allocation4 + $0x30] sm:$0xff]  ;;  %v4350_v53 = vld [vmem:[#allocation4 + $0x38] sm:$0xff] }
 0x89c   :  { %4602 = vmatpush3.bf16.msra.mxu1 %v4344_v38  ;;  %v4585_v59 = vld [vmem:[#allocation11 + $0xf] ss:$0 sm:$0xff]  ;;  %p5073_p7 = por %p5072_p6, %p5071_p5 }
 0x89d   :  { %4603 = vmatprep.subr.bf16.mxu1 %v4353_v24 }
 0x89e   :  { %p5074_p8 = pnand %p5073_p7, %p5067_p4 }
 0x8a0   :  { %4604 = vmatpush3.bf16.msra.mxu1 %v4345_v9 }
 0x8a1   :  { %4605 = vmatprep.subr.bf16.mxu1 %v4354_v22 }
 0x8a4   :  { %4606 = vmatpush3.bf16.msra.mxu1 %v4346_v56 }
 0x8a5   :  { %4607 = vmatprep.subr.bf16.mxu1 %v4355_v62 }
 0x8a8   :  { %4608 = vmatpush3.bf16.msra.mxu1 %v4347_v16 }
 0x8a9   :  { %4609 = vmatprep.subr.bf16.mxu1 %v4356_v49 }
 0x8ac   :  { %4610 = vmatpush3.bf16.msra.mxu1 %v4348_v51 }
 0x8ad   :  { %4611 = vmatprep.subr.bf16.mxu1 %v4357_v28 }
 0x8b0   :  { %4612 = vmatpush3.bf16.msra.mxu1 %v4349_v6 }
 0x8b1   :  { %4613 = vmatprep.subr.bf16.mxu1 %v4358_v48 }
 0x8b4   :  { %4614 = vmatpush3.bf16.msra.mxu1 %v4350_v53 }
 0x8b7   :  { %4399 = vmatmul.mubr.bf16.vlgmr.msra.gmra.mrb[48].mxu1 %v4341_v18 }
 0x98a   :  { %v4615_v47 = vpop.f32.mrb[48].mxu1 }
 0x98b   :  { %v4616_v37 = vpop.f32.mrb[49].mxu1 }
 0x98c   :  { %v4617_v40 = vadd.f32 %v4616_v37, %v4615_v47  ;;  %v4618_v60 = vpop.f32.mrb[50].mxu1 }
 0x98d   :  { %v4619_v32 = vpop.f32.mrb[51].mxu1 }
 0x98e   :  { %v4401_v14 = vadd.f32 %v4617_v40, %v4585_v59 }
 0x990   :  { %v4409_v26 = vsel %vm4408_vm11, %v4401_v14, -inf }
 0x991   :  { %v4411_v33 = vsel %vm4410_vm12, %v4409_v26, -inf }
 0x992   :  { %4412 = vmax.xlane.f32.xlu0 %v4411_v33 }
 0xa1f   :  { %v4413_v43 = vpop.xlane.xlu0 %4412 }
 0xa20   :  { %v4414_v29 = vsub.f32 %v4409_v26, %v4413_v43 }
 0xa22   :  { %v4415_v34 = vmul.f32 1.442695, %v4414_v29 }
 0xa24   :  { %4974 = vpow2.f32 %v4415_v34 }
 0xa2e   :  { %v4975_v41 = vpop.eup %4974 }
 0xa2f   :  { %v4417_v1 = vsel %vm4410_vm12, %v4975_v41, 0.0 }
 0xa30   :  { %4418 = vadd.xlane.f32.xlu0 %v4417_v1 }
 0xabd   :  { %v4419_v7 = vpop.xlane.xlu0 %4418 }
 0xabe   :  { %4976 = vrcp.f32 %v4419_v7 }
 0xac8   :  { %v4977_v10 = vpop.eup %4976 }
 0xac9   :  { %v4421_v46 = vmul.f32 %v4977_v10, %v4975_v41 }
 0xacb   :  { %4422 = vst [vmem:[#allocation12] sm:$0x3] %v4421_v46 }
 0xacc   :  { %5077 = shalt.err (!%p5074_p8)
}
 0xacd   :  { %s5078_s18 = scalar_lea.hbm %s5639_s6, 32 }
 0xace   :  { %p5079_p9 = scmp.ne.s32.totalorder %s5639_s6, %s5078_s18  ;;  %p5082_p10 = scmp.lt.u32.totalorder %s5078_s18, %s5639_s6 }
 0xad0   :  { %p5084_p11 = pnand %p5082_p10, %p5079_p9 }
 0xad2   :  { %5087 = shalt.err (!%p5084_p11)
}
 0xad3   :  { %4432 = dma.vmem_to_hbm [thread:$0]  %s4430_s15, 32, %s5639_s6, [#allocation8]  }
 0xad4   :  { %5098 = dma.done.wait [#allocation8], 32  }
 0xad5   :  { %5099 = vsyncadd [#allocation8], 4294967264 }
 0xad6   :  { %4436 = vsyncpa [#allocation7], 1 }
 0xad7   :  { %4437 = vsyncpa [#allocation10], 1 }
 0xad8   :  { %4438 = vsyncpa [#allocation8], 1 }
 0xad9   :  { %4439 = vsyncmov [#allocation5] }
 0xadc   :  { %s4440_s26 = vpop.sfrf %4439 }
 0xadd   :  { %p4586_p12 = scmp.ne.s32.totalorder %s4440_s26, 0 }
 0xadf   :  { %4444 = shalt.err (%p4586_p12)  }
 0xae0   :  { %4446 = vsyncmov [#allocation5 + $0x1] }
 0xae3   :  { %s4447_s27 = vpop.sfrf %4446 }
 0xae4   :  { %p4587_p13 = scmp.ne.s32.totalorder %s4447_s27, 0 }
 0xae6   :  { %4451 = shalt.err (%p4587_p13)  }
 0xae7   :  { %4453 = vsyncmov [#allocation5 + $0x2] }
 0xaea   :  { %s4454_s28 = vpop.sfrf %4453 }
 0xaeb   :  { %p4588_p0 = scmp.ne.s32.totalorder %s4454_s28, 0 }
 0xaed   :  { %4458 = shalt.err (%p4588_p0)  }

</bundles_post_ra>
